<compile_context>
chip_gen: v6e
topology: v6e:2x2x1
jax: 0.10.0
libtpu: 0.0.40
codegen_flags: <defaults>
</compile_context>

<pallas_src>
import functools
from types import SimpleNamespace

import numpy as np
import jax
import jax.numpy as jnp
from jax.experimental import pallas as pl
from jax.experimental.pallas import tpu as pltpu

# ---------------- small synthetic config (scaled-down DINOv2 baseline) ------
PATCH_SZ = 14                       # cfg.MODEL.PATCH_SIZE (must be 14)
MULTISCALE = 2                      # cfg.MODEL.MULTISCALE -> 2 intermediate layers
NUM_LAYERS = MULTISCALE
EMB_SIZE = 128                      # cfg.MODEL.EMB_SIZE (synthetic DINOv2 embed dim)
CAT_DIM = NUM_LAYERS * EMB_SIZE     # decoder channels = num_layers * EMB_SIZE
MLP_HIDDEN = 4 * EMB_SIZE           # synthetic ViT-block MLP hidden dim
FEATURE_RESIZE_FACTOR = 4           # cfg.MODEL.FEATURE_RESIZE_FACTOR
NUM_CLASSES = 19                    # cfg.MODEL.NUM_CLASSES
LANE = 128


def _round_up(x, m):
    return ((x + m - 1) // m) * m


# ============================ Pallas kernels =================================
def _apply_act(y, act):
    if act == "relu":
        return jnp.maximum(y, 0.0)
    if act == "gelu":
        # TODO(synk): exact erf nn.GELU approximated with the tanh-form GELU
        # (abs diff ~1e-3) to stay on guaranteed Mosaic-lowerable ops.
        c = 0.7978845608028654  # sqrt(2/pi)
        return 0.5 * y * (1.0 + jnp.tanh(c * (y + 0.044715 * y * y * y)))
    return y


def _mm_single_kernel(x_ref, w_ref, b_ref, o_ref, *, act):
    """Single-K-step fused matmul: o = act(x @ w + bias).  No scratch."""
    y = jnp.dot(x_ref[...], w_ref[...], preferred_element_type=jnp.float32)
    y = _apply_act(y + b_ref[...], act)
    o_ref[...] = y.astype(o_ref.dtype)


def _mm_multi_kernel(x_ref, w_ref, b_ref, o_ref, acc_ref, *, act):
    """K-tiled fused matmul with resident f32 accumulator."""
    k = pl.program_id(1)

    @pl.when(k == 0)
    def _():
        acc_ref[...] = jnp.zeros_like(acc_ref)

    acc_ref[...] += jnp.dot(x_ref[...], w_ref[...],
                            preferred_element_type=jnp.float32)

    @pl.when(k == pl.num_programs(1) - 1)
    def _():
        y = _apply_act(acc_ref[...] + b_ref[...], act)
        o_ref[...] = y.astype(o_ref.dtype)


@functools.lru_cache(maxsize=1)
def _vmem_capacity_bytes():
    """Generation-aware VMEM capacity (v5e/v6e: 128 MiB, v7x: 64 MiB)."""
    try:
        cap = int(pltpu.get_tpu_info().vmem_capacity_bytes)
        if cap > 0:
            return cap
    except Exception:
        pass
    return 64 * 1024 * 1024   # conservative default (v7x per-TC VMEM)


def _choose_tiling(M, K, N):
    """Pick (Mp, tm, Kp, tk, vmem_limit) so double-buffered tiles fit VMEM."""
    cap = _vmem_capacity_bytes()
    budget = int(cap * 0.4)          # headroom for pipelining / internal scratch
    tm = _round_up(min(M, 256), 8)   # 256-row M tiles -> parallel axis for v7x
    Mp = _round_up(M, tm)

    def need(tk_):
        return (2 * (tm * tk_ + tk_ * N) * 2    # 2x double-buffered bf16 inputs
                + 2 * tm * N * 4                # 2x output tile
                + tm * N * 4                    # f32 accumulator scratch
                + 4 * N * 4)                    # bias

    if need(K) <= budget:                       # single K step (no scratch used)
        vmem = min(int(0.9 * cap), max(32 << 20, 2 * need(K)))
        return Mp, tm, K, K, vmem
    Kp = _round_up(K, 128)
    tk = 128
    t = 256
    while t <= Kp:
        if Kp % t == 0 and need(t) <= budget:
            tk = t
        t += 128
    vmem = min(int(0.9 * cap), max(32 << 20, 2 * need(tk)))
    return Mp, tm, Kp, tk, vmem


def fused_matmul(x, w, bias=None, act="none", out_n=None,
                 out_dtype=jnp.bfloat16):
    """y = act(x @ w + bias).  x:(M,K), w:(K,N) [pre-padded bf16 weights OK],
    bias:(N,).  Operands are fed to the MXU in bf16; accumulation is f32.
    out_n optionally slices logically-valid output columns (lane-dense pad)."""
    M, K = x.shape
    Kw, N = w.shape
    assert Kw == K, (Kw, K)
    if bias is None:
        bias = jnp.zeros((N,), jnp.float32)

    # Lane-dense output: pad N up to a multiple of 128.  Weights in this model
    # are pre-padded at init, so this branch is a no-op on the hot path.
    Nn = _round_up(N, LANE)
    if Nn != N:
        w = jnp.pad(w, ((0, 0), (0, Nn - N)))
        bias = jnp.pad(bias, ((0, Nn - N),))

    Mp, tm, Kp, tk, vmem_limit = _choose_tiling(M, K, Nn)

    xb = x.astype(jnp.bfloat16)
    wb = w.astype(jnp.bfloat16)
    if Kp != K:
        xb = jnp.pad(xb, ((0, 0), (0, Kp - K)))
        wb = jnp.pad(wb, ((0, Kp - K), (0, 0)))
    if Mp != M:
        xb = jnp.pad(xb, ((0, Mp - M), (0, 0)))
    b2 = bias.reshape(1, Nn).astype(jnp.float32)

    nm, nk = Mp // tm, Kp // tk
    if nk == 1:
        out = pl.pallas_call(
            functools.partial(_mm_single_kernel, act=act),
            out_shape=jax.ShapeDtypeStruct((Mp, Nn), out_dtype),
            grid_spec=pltpu.PrefetchScalarGridSpec(
                num_scalar_prefetch=0,
                grid=(nm,),
                in_specs=[
                    pl.BlockSpec((tm, Kp), lambda m: (m, 0)),
                    pl.BlockSpec((Kp, Nn), lambda m: (0, 0)),
                    pl.BlockSpec((1, Nn), lambda m: (0, 0)),
                ],
                out_specs=pl.BlockSpec((tm, Nn), lambda m: (m, 0))),
            compiler_params=pltpu.CompilerParams(
                dimension_semantics=("parallel",),
                vmem_limit_bytes=vmem_limit),
        )(xb, wb, b2)
    else:
        out = pl.pallas_call(
            functools.partial(_mm_multi_kernel, act=act),
            out_shape=jax.ShapeDtypeStruct((Mp, Nn), out_dtype),
            grid_spec=pltpu.PrefetchScalarGridSpec(
                num_scalar_prefetch=0,
                grid=(nm, nk),                 # K reduction innermost / last
                in_specs=[
                    pl.BlockSpec((tm, tk), lambda m, k: (m, k)),
                    pl.BlockSpec((tk, Nn), lambda m, k: (k, 0)),
                    pl.BlockSpec((1, Nn), lambda m, k: (0, 0)),
                ],
                out_specs=pl.BlockSpec((tm, Nn), lambda m, k: (m, 0)),
                scratch_shapes=[pltpu.VMEM((tm, Nn), jnp.float32)]),
            compiler_params=pltpu.CompilerParams(
                dimension_semantics=("parallel", "arbitrary"),
                vmem_limit_bytes=vmem_limit),
        )(xb, wb, b2)

    on = N if out_n is None else out_n
    if Mp != M or on != Nn:
        out = out[:M, :on]
    return out


def _ln_kernel(x_ref, g_ref, b_ref, o_ref, *, eps):
    x = x_ref[...].astype(jnp.float32)
    mu = jnp.mean(x, axis=-1, keepdims=True)
    xc = x - mu
    var = jnp.mean(xc * xc, axis=-1, keepdims=True)
    y = xc * jax.lax.rsqrt(var + eps)
    o_ref[...] = (y * g_ref[...] + b_ref[...]).astype(o_ref.dtype)


def layer_norm(x, gamma, beta, eps=1e-6, out_dtype=jnp.bfloat16):
    """Row-tiled LayerNorm over the last dim; rows split across a parallel grid."""
    M, D = x.shape
    tm = _round_up(min(M, 256), 8)
    Mp = _round_up(M, tm)
    xi = x if Mp == M else jnp.pad(x, ((0, Mp - M), (0, 0)))
    out = pl.pallas_call(
        functools.partial(_ln_kernel, eps=eps),
        out_shape=jax.ShapeDtypeStruct((Mp, D), out_dtype),
        grid_spec=pltpu.PrefetchScalarGridSpec(
            num_scalar_prefetch=0,
            grid=(Mp // tm,),
            in_specs=[
                pl.BlockSpec((tm, D), lambda m: (m, 0)),
                pl.BlockSpec((1, D), lambda m: (0, 0)),
                pl.BlockSpec((1, D), lambda m: (0, 0)),
            ],
            out_specs=pl.BlockSpec((tm, D), lambda m: (m, 0))),
        compiler_params=pltpu.CompilerParams(
            dimension_semantics=("parallel",)),
    )(xi, gamma.reshape(1, D).astype(jnp.float32),
      beta.reshape(1, D).astype(jnp.float32))
    return out[:M] if Mp != M else out


# ============================ JAX glue helpers ===============================
def _interp_matrix(out_size, in_size, align_corners):
    """PyTorch-exact 1-D bilinear interpolation matrix (out_size, in_size)."""
    if align_corners:
        if out_size == 1:
            src = np.zeros((out_size,), np.float64)
        else:
            src = np.arange(out_size) * (in_size - 1) / (out_size - 1)
    else:
        src = (np.arange(out_size) + 0.5) * (in_size / out_size) - 0.5
        src = np.maximum(src, 0.0)
    i0 = np.minimum(np.floor(src).astype(np.int64), in_size - 1)
    i1 = np.minimum(i0 + 1, in_size - 1)
    lam = src - i0
    M = np.zeros((out_size, in_size), np.float32)
    M[np.arange(out_size), i0] += (1.0 - lam)
    M[np.arange(out_size), i1] += lam
    return jnp.asarray(M)


def bilinear_resize(x, out_hw, align_corners):
    """x: (B,H,W,C) NHWC -> (B,out_h,out_w,C).  Small-matrix glue (tiny here)."""
    B, H, W, C = x.shape
    Rh = _interp_matrix(out_hw[0], H, align_corners)
    Rw = _interp_matrix(out_hw[1], W, align_corners)
    y = jnp.einsum('oh,bhwc->bowc', Rh, x)
    y = jnp.einsum('ow,bhwc->bhoc', Rw, y)
    return y


def patchify(x, k):
    """Non-overlapping kxk patches, stride k -> rows (B*oh*ow, k*k*C)."""
    B, H, W, C = x.shape
    oh, ow = H // k, W // k
    p = x.reshape(B, oh, k, ow, k, C).transpose(0, 1, 3, 2, 4, 5)
    return p.reshape(B * oh * ow, k * k * C), (oh, ow)


# ============================ parameters =====================================
def init_params(key):
    ks = iter(jax.random.split(key, 32))

    def w_init(shape, fan_in):
        # weights stored bf16 once at init (cast-once; halves DMA bytes)
        return (jax.random.normal(next(ks), shape, jnp.float32)
                * np.sqrt(2.0 / fan_in)).astype(jnp.bfloat16)

    p = {}
    # synthetic DINOv2 multi-scale stub
    p['patch_w'] = w_init((PATCH_SZ * PATCH_SZ * 3, EMB_SIZE),
                          PATCH_SZ * PATCH_SZ * 3)
    p['patch_b'] = jnp.zeros((EMB_SIZE,), jnp.float32)
    p['blk_ln_g'] = [jnp.ones((EMB_SIZE,), jnp.float32) for _ in range(NUM_LAYERS)]
    p['blk_ln_b'] = [jnp.zeros((EMB_SIZE,), jnp.float32) for _ in range(NUM_LAYERS)]
    p['fc1_w'] = [w_init((EMB_SIZE, MLP_HIDDEN), EMB_SIZE) for _ in range(NUM_LAYERS)]
    p['fc1_b'] = [jnp.zeros((MLP_HIDDEN,), jnp.float32) for _ in range(NUM_LAYERS)]
    p['fc2_w'] = [w_init((MLP_HIDDEN, EMB_SIZE), MLP_HIDDEN) for _ in range(NUM_LAYERS)]
    p['fc2_b'] = [jnp.zeros((EMB_SIZE,), jnp.float32) for _ in range(NUM_LAYERS)]
    p['norm_g'] = jnp.ones((EMB_SIZE,), jnp.float32)     # shared final LN (norm=True)
    p['norm_b'] = jnp.zeros((EMB_SIZE,), jnp.float32)
    # Baseline decoder: Conv1x1(CAT->CAT) + GELU + Conv1x1(CAT->NUM_CLASSES)
    p['dec1_w'] = w_init((CAT_DIM, CAT_DIM), CAT_DIM)
    p['dec1_b'] = jnp.zeros((CAT_DIM,), jnp.float32)
    w2 = (jax.random.normal(next(ks), (CAT_DIM, NUM_CLASSES), jnp.float32)
          * np.sqrt(1.0 / CAT_DIM))
    b2 = jax.random.normal(next(ks), (NUM_CLASSES,), jnp.float32) * 0.01
    # classifier N=19 pre-padded to 128 lanes ONCE at init (lane-dense stores)
    p['dec2_w'] = jnp.pad(w2, ((0, 0), (0, LANE - NUM_CLASSES))).astype(jnp.bfloat16)
    p['dec2_b'] = jnp.pad(b2, ((0, LANE - NUM_CLASSES),))
    return p


# ============================ forward pieces =================================
def dinov2_stub_intermediate_layers(x_nhwc, p):
    """Synthetic DINOv2NetMultiScale.forward(norm=True): list of (B, N, D)."""
    # TODO(synk): pretrained DINOv2 attention blocks replaced by deterministic
    # pre-norm residual MLP blocks (patch-token-only interface preserved).
    B = x_nhwc.shape[0]
    cols, (ph, pw) = patchify(x_nhwc, PATCH_SZ)                  # (B*N, 14*14*3)
    cur = fused_matmul(cols, p['patch_w'], p['patch_b'])         # patch embed
    outs = []
    for i in range(NUM_LAYERS):
        h = layer_norm(cur, p['blk_ln_g'][i], p['blk_ln_b'][i])
        h = fused_matmul(h, p['fc1_w'][i], p['fc1_b'][i], act='gelu')
        cur = cur + fused_matmul(h, p['fc2_w'][i], p['fc2_b'][i])   # residual
        normed = layer_norm(cur, p['norm_g'], p['norm_b'])          # norm=True
        outs.append(normed.reshape(B, ph * pw, EMB_SIZE))
    return outs, (ph, pw)


def dinov2_baseline_forward(x_nchw, p):
    x = jnp.transpose(x_nchw, (0, 2, 3, 1)).astype(jnp.float32)  # NCHW -> NHWC
    B, H, W, _ = x.shape

    # --- DINOv2 multi-scale embedding path -----------------------------------
    emb_list, (ph, pw) = dinov2_stub_intermediate_layers(x, p)
    emb = jnp.concatenate(emb_list, axis=-1)                     # (B, N, 2*D)
    emb = emb.reshape(B, ph, pw, CAT_DIM)                        # b (h w) c -> b h w c
    emb = bilinear_resize(
        emb, (ph * FEATURE_RESIZE_FACTOR, pw * FEATURE_RESIZE_FACTOR),
        align_corners=False).astype(jnp.float32)

    # --- decoder (1x1 conv + GELU fused, then 1x1 conv to classes) -----------
    eh, ew = emb.shape[1], emb.shape[2]
    hdec = fused_matmul(emb.reshape(B * eh * ew, CAT_DIM),
                        p['dec1_w'], p['dec1_b'], act='gelu')
    logits_embshape = fused_matmul(hdec, p['dec2_w'], p['dec2_b'],
                                   out_n=NUM_CLASSES, out_dtype=jnp.float32)
    logits_embshape = logits_embshape.reshape(B, eh, ew, NUM_CLASSES)

    logits = bilinear_resize(logits_embshape, (H, W), align_corners=False)
    return {'logits': logits,                       # b xh xw c
            'emb': emb,                             # b ph pw c
            'logits_embshape': logits_embshape}     # b ph pw c


# ================================= main ======================================
if __name__ == "__main__":
    key = jax.random.PRNGKey(0)
    kx, kp = jax.random.split(key)
    B, H, W = 2, 56, 56            # small: 4x4 = 16 DINOv2 patches
    x = jax.random.normal(kx, (B, 3, H, W), jnp.float32)   # PyTorch NCHW input
    params = init_params(kp)

    run = jax.jit(dinov2_baseline_forward)
    out = run(x, params)
    jax.block_until_ready(out)
    res = SimpleNamespace(**out)

    eh = (H // PATCH_SZ) * FEATURE_RESIZE_FACTOR
    ew = (W // PATCH_SZ) * FEATURE_RESIZE_FACTOR
    assert res.logits.shape == (B, H, W, NUM_CLASSES)
    assert res.emb.shape == (B, eh, ew, CAT_DIM)
    assert res.logits_embshape.shape == (B, eh, ew, NUM_CLASSES)
    assert all(bool(jnp.isfinite(v).all())
               for v in (res.logits, res.emb, res.logits_embshape))
    print("KERNEL_OK")
</pallas_src>

<mosaic_0001>
module attributes {stable_mosaic.version = 11 : i64} {
  func.func @_mm_single_kernel(%arg0: i32, %arg1: memref<32x588xbf16, #tpu.memory_space<vmem>>, %arg2: memref<588x128xbf16, #tpu.memory_space<vmem>>, %arg3: memref<1x128xf32, #tpu.memory_space<vmem>>, %arg4: memref<32x128xbf16, #tpu.memory_space<vmem>>) attributes {dimension_semantics = [#tpu.dimension_semantics<parallel>], iteration_bounds = array<i64: 1>, scalar_prefetch = 0 : i64, scratch_operands = 0 : i64, tpu.core_type = #tpu.core_type<tc>, window_params = [{transform_indices = @transform_0, window_bounds = array<i64: 32, 588>}, {pipeline_mode = #tpu.pipeline_mode<synchronous>, transform_indices = @transform_1, window_bounds = array<i64: 588, 128>}, {pipeline_mode = #tpu.pipeline_mode<synchronous>, transform_indices = @transform_2, window_bounds = array<i64: 1, 128>}, {transform_indices = @transform_3, window_bounds = array<i64: 32, 128>}]} {
    %c0 = arith.constant 0 : index
    %c0_0 = arith.constant 0 : index
    %0 = vector.load %arg1[%c0, %c0_0] : memref<32x588xbf16, #tpu.memory_space<vmem>>, vector<32x588xbf16>
    %c0_1 = arith.constant 0 : index
    %c0_2 = arith.constant 0 : index
    %1 = vector.load %arg2[%c0_1, %c0_2] : memref<588x128xbf16, #tpu.memory_space<vmem>>, vector<588x128xbf16>
    %cst = arith.constant dense<0.000000e+00> : vector<32x128xf32>
    %2 = tpu.matmul %0, %1, %cst {dimension_numbers = #tpu.dot_dimension_numbers<[1], [0], [0], [1], [0, 0, 1, 1], [], []>} : vector<32x588xbf16>, vector<588x128xbf16>, vector<32x128xf32> -> vector<32x128xf32>
    %c0_3 = arith.constant 0 : index
    %c0_4 = arith.constant 0 : index
    %3 = vector.load %arg3[%c0_3, %c0_4] : memref<1x128xf32, #tpu.memory_space<vmem>>, vector<1x128xf32>
    %4 = vector.broadcast %3 : vector<1x128xf32> to vector<32x128xf32>
    %5 = arith.addf %2, %4 : vector<32x128xf32>
    %6 = arith.truncf %5 : vector<32x128xf32> to vector<32x128xbf16>
    %c0_5 = arith.constant 0 : index
    %c0_6 = arith.constant 0 : index
    %7 = vector.load %arg4[%c0_5, %c0_6] : memref<32x128xbf16, #tpu.memory_space<vmem>>, vector<32x128xbf16>
    tpu.vector_store %arg4[%c0_5, %c0_6], %6 {strides = array<i32>} : memref<32x128xbf16, #tpu.memory_space<vmem>>, vector<32x128xbf16>,
    return
  }
  func.func @transform_0(%arg0: i32) -> (i32, i32) {
    %c0_i32 = arith.constant 0 : i32
    %c0_i32_0 = arith.constant 0 : i32
    return %arg0, %c0_i32 : i32, i32
  }
  func.func @transform_1(%arg0: i32) -> (i32, i32) {
    %c0_i32 = arith.constant 0 : i32
    %c0_i32_0 = arith.constant 0 : i32
    %c0_i32_1 = arith.constant 0 : i32
    return %c0_i32, %c0_i32_0 : i32, i32
  }
  func.func @transform_2(%arg0: i32) -> (i32, i32) {
    %c0_i32 = arith.constant 0 : i32
    %c0_i32_0 = arith.constant 0 : i32
    %c0_i32_1 = arith.constant 0 : i32
    return %c0_i32, %c0_i32_0 : i32, i32
  }
  func.func @transform_3(%arg0: i32) -> (i32, i32) {
    %c0_i32 = arith.constant 0 : i32
    %c0_i32_0 = arith.constant 0 : i32
    return %arg0, %c0_i32 : i32, i32
  }
}

module attributes {stable_mosaic.version = 11 : i64} {
  func.func @_ln_kernel(%arg0: i32, %arg1: memref<32x128xbf16, #tpu.memory_space<vmem>>, %arg2: memref<1x128xf32, #tpu.memory_space<vmem>>, %arg3: memref<1x128xf32, #tpu.memory_space<vmem>>, %arg4: memref<32x128xbf16, #tpu.memory_space<vmem>>) attributes {dimension_semantics = [#tpu.dimension_semantics<parallel>], iteration_bounds = array<i64: 1>, scalar_prefetch = 0 : i64, scratch_operands = 0 : i64, tpu.core_type = #tpu.core_type<tc>, window_params = [{transform_indices = @transform_0, window_bounds = array<i64: 32, 128>}, {pipeline_mode = #tpu.pipeline_mode<synchronous>, transform_indices = @transform_1, window_bounds = array<i64: 1, 128>}, {pipeline_mode = #tpu.pipeline_mode<synchronous>, transform_indices = @transform_2, window_bounds = array<i64: 1, 128>}, {transform_indices = @transform_3, window_bounds = array<i64: 32, 128>}]} {
    %c0 = arith.constant 0 : index
    %c0_0 = arith.constant 0 : index
    %0 = vector.load %arg1[%c0, %c0_0] : memref<32x128xbf16, #tpu.memory_space<vmem>>, vector<32x128xbf16>
    %1 = arith.extf %0 : vector<32x128xbf16> to vector<32x128xf32>
    %cst = arith.constant dense<0.000000e+00> : vector<32xf32>
    %2 = vector.multi_reduction <add>, %1, %cst [1] : vector<32x128xf32> to vector<32xf32>
    %3 = vector.shape_cast %2 : vector<32xf32> to vector<32x1xf32>
    %cst_1 = arith.constant 1.280000e+02 : f32
    %4 = vector.broadcast %cst_1 : f32 to vector<32x1xf32>
    %5 = arith.divf %3, %4 : vector<32x1xf32>
    %6 = vector.broadcast %5 : vector<32x1xf32> to vector<32x128xf32>
    %7 = arith.subf %1, %6 : vector<32x128xf32>
    %8 = arith.mulf %7, %7 : vector<32x128xf32>
    %cst_2 = arith.constant dense<0.000000e+00> : vector<32xf32>
    %9 = vector.multi_reduction <add>, %8, %cst_2 [1] : vector<32x128xf32> to vector<32xf32>
    %10 = vector.shape_cast %9 : vector<32xf32> to vector<32x1xf32>
    %cst_3 = arith.constant 1.280000e+02 : f32
    %11 = vector.broadcast %cst_3 : f32 to vector<32x1xf32>
    %12 = arith.divf %10, %11 : vector<32x1xf32>
    %cst_4 = arith.constant 9.99999997E-7 : f32
    %13 = vector.broadcast %cst_4 : f32 to vector<32x1xf32>
    %14 = arith.addf %12, %13 : vector<32x1xf32>
    %15 = math.rsqrt %14 : vector<32x1xf32>
    %16 = vector.broadcast %15 : vector<32x1xf32> to vector<32x128xf32>
    %17 = arith.mulf %7, %16 : vector<32x128xf32>
    %c0_5 = arith.constant 0 : index
    %c0_6 = arith.constant 0 : index
    %18 = vector.load %arg2[%c0_5, %c0_6] : memref<1x128xf32, #tpu.memory_space<vmem>>, vector<1x128xf32>
    %19 = vector.broadcast %18 : vector<1x128xf32> to vector<32x128xf32>
    %20 = arith.mulf %17, %19 : vector<32x128xf32>
    %c0_7 = arith.constant 0 : index
    %c0_8 = arith.constant 0 : index
    %21 = vector.load %arg3[%c0_7, %c0_8] : memref<1x128xf32, #tpu.memory_space<vmem>>, vector<1x128xf32>
    %22 = vector.broadcast %21 : vector<1x128xf32> to vector<32x128xf32>
    %23 = arith.addf %20, %22 : vector<32x128xf32>
    %24 = arith.truncf %23 : vector<32x128xf32> to vector<32x128xbf16>
    %c0_9 = arith.constant 0 : index
    %c0_10 = arith.constant 0 : index
    %25 = vector.load %arg4[%c0_9, %c0_10] : memref<32x128xbf16, #tpu.memory_space<vmem>>, vector<32x128xbf16>
    tpu.vector_store %arg4[%c0_9, %c0_10], %24 {strides = array<i32>} : memref<32x128xbf16, #tpu.memory_space<vmem>>, vector<32x128xbf16>,
    return
  }
  func.func @transform_0(%arg0: i32) -> (i32, i32) {
    %c0_i32 = arith.constant 0 : i32
    %c0_i32_0 = arith.constant 0 : i32
    return %arg0, %c0_i32 : i32, i32
  }
  func.func @transform_1(%arg0: i32) -> (i32, i32) {
    %c0_i32 = arith.constant 0 : i32
    %c0_i32_0 = arith.constant 0 : i32
    %c0_i32_1 = arith.constant 0 : i32
    return %c0_i32, %c0_i32_0 : i32, i32
  }
  func.func @transform_2(%arg0: i32) -> (i32, i32) {
    %c0_i32 = arith.constant 0 : i32
    %c0_i32_0 = arith.constant 0 : i32
    %c0_i32_1 = arith.constant 0 : i32
    return %c0_i32, %c0_i32_0 : i32, i32
  }
  func.func @transform_3(%arg0: i32) -> (i32, i32) {
    %c0_i32 = arith.constant 0 : i32
    %c0_i32_0 = arith.constant 0 : i32
    return %arg0, %c0_i32 : i32, i32
  }
}

module attributes {stable_mosaic.version = 11 : i64} {
  func.func @_mm_single_kernel(%arg0: i32, %arg1: memref<32x128xbf16, #tpu.memory_space<vmem>>, %arg2: memref<128x512xbf16, #tpu.memory_space<vmem>>, %arg3: memref<1x512xf32, #tpu.memory_space<vmem>>, %arg4: memref<32x512xbf16, #tpu.memory_space<vmem>>) attributes {dimension_semantics = [#tpu.dimension_semantics<parallel>], iteration_bounds = array<i64: 1>, scalar_prefetch = 0 : i64, scratch_operands = 0 : i64, tpu.core_type = #tpu.core_type<tc>, window_params = [{transform_indices = @transform_0, window_bounds = array<i64: 32, 128>}, {pipeline_mode = #tpu.pipeline_mode<synchronous>, transform_indices = @transform_1, window_bounds = array<i64: 128, 512>}, {pipeline_mode = #tpu.pipeline_mode<synchronous>, transform_indices = @transform_2, window_bounds = array<i64: 1, 512>}, {transform_indices = @transform_3, window_bounds = array<i64: 32, 512>}]} {
    %c0 = arith.constant 0 : index
    %c0_0 = arith.constant 0 : index
    %0 = vector.load %arg1[%c0, %c0_0] : memref<32x128xbf16, #tpu.memory_space<vmem>>, vector<32x128xbf16>
    %c0_1 = arith.constant 0 : index
    %c0_2 = arith.constant 0 : index
    %1 = vector.load %arg2[%c0_1, %c0_2] : memref<128x512xbf16, #tpu.memory_space<vmem>>, vector<128x512xbf16>
    %cst = arith.constant dense<0.000000e+00> : vector<32x512xf32>
    %2 = tpu.matmul %0, %1, %cst {dimension_numbers = #tpu.dot_dimension_numbers<[1], [0], [0], [1], [0, 0, 1, 1], [], []>} : vector<32x128xbf16>, vector<128x512xbf16>, vector<32x512xf32> -> vector<32x512xf32>
    %c0_3 = arith.constant 0 : index
    %c0_4 = arith.constant 0 : index
    %3 = vector.load %arg3[%c0_3, %c0_4] : memref<1x512xf32, #tpu.memory_space<vmem>>, vector<1x512xf32>
    %4 = vector.broadcast %3 : vector<1x512xf32> to vector<32x512xf32>
    %5 = arith.addf %2, %4 : vector<32x512xf32>
    %cst_5 = arith.constant 5.000000e-01 : f32
    %6 = vector.broadcast %cst_5 : f32 to vector<32x512xf32>
    %7 = arith.mulf %6, %5 : vector<32x512xf32>
    %cst_6 = arith.constant 4.471500e-02 : f32
    %8 = vector.broadcast %cst_6 : f32 to vector<32x512xf32>
    %9 = arith.mulf %8, %5 : vector<32x512xf32>
    %10 = arith.mulf %9, %5 : vector<32x512xf32>
    %11 = arith.mulf %10, %5 : vector<32x512xf32>
    %12 = arith.addf %5, %11 : vector<32x512xf32>
    %cst_7 = arith.constant 0.797884583 : f32
    %13 = vector.broadcast %cst_7 : f32 to vector<32x512xf32>
    %14 = arith.mulf %13, %12 : vector<32x512xf32>
    %15 = math.tanh %14 : vector<32x512xf32>
    %cst_8 = arith.constant 1.000000e+00 : f32
    %16 = vector.broadcast %cst_8 : f32 to vector<32x512xf32>
    %17 = arith.addf %16, %15 : vector<32x512xf32>
    %18 = arith.mulf %7, %17 : vector<32x512xf32>
    %19 = arith.truncf %18 : vector<32x512xf32> to vector<32x512xbf16>
    %c0_9 = arith.constant 0 : index
    %c0_10 = arith.constant 0 : index
    %20 = vector.load %arg4[%c0_9, %c0_10] : memref<32x512xbf16, #tpu.memory_space<vmem>>, vector<32x512xbf16>
    tpu.vector_store %arg4[%c0_9, %c0_10], %19 {strides = array<i32>} : memref<32x512xbf16, #tpu.memory_space<vmem>>, vector<32x512xbf16>,
    return
  }
  func.func @transform_0(%arg0: i32) -> (i32, i32) {
    %c0_i32 = arith.constant 0 : i32
    %c0_i32_0 = arith.constant 0 : i32
    return %arg0, %c0_i32 : i32, i32
  }
  func.func @transform_1(%arg0: i32) -> (i32, i32) {
    %c0_i32 = arith.constant 0 : i32
    %c0_i32_0 = arith.constant 0 : i32
    %c0_i32_1 = arith.constant 0 : i32
    return %c0_i32, %c0_i32_0 : i32, i32
  }
  func.func @transform_2(%arg0: i32) -> (i32, i32) {
    %c0_i32 = arith.constant 0 : i32
    %c0_i32_0 = arith.constant 0 : i32
    %c0_i32_1 = arith.constant 0 : i32
    return %c0_i32, %c0_i32_0 : i32, i32
  }
  func.func @transform_3(%arg0: i32) -> (i32, i32) {
    %c0_i32 = arith.constant 0 : i32
    %c0_i32_0 = arith.constant 0 : i32
    return %arg0, %c0_i32 : i32, i32
  }
}

module attributes {stable_mosaic.version = 11 : i64} {
  func.func @_mm_single_kernel(%arg0: i32, %arg1: memref<32x512xbf16, #tpu.memory_space<vmem>>, %arg2: memref<512x128xbf16, #tpu.memory_space<vmem>>, %arg3: memref<1x128xf32, #tpu.memory_space<vmem>>, %arg4: memref<32x128xbf16, #tpu.memory_space<vmem>>) attributes {dimension_semantics = [#tpu.dimension_semantics<parallel>], iteration_bounds = array<i64: 1>, scalar_prefetch = 0 : i64, scratch_operands = 0 : i64, tpu.core_type = #tpu.core_type<tc>, window_params = [{transform_indices = @transform_0, window_bounds = array<i64: 32, 512>}, {pipeline_mode = #tpu.pipeline_mode<synchronous>, transform_indices = @transform_1, window_bounds = array<i64: 512, 128>}, {pipeline_mode = #tpu.pipeline_mode<synchronous>, transform_indices = @transform_2, window_bounds = array<i64: 1, 128>}, {transform_indices = @transform_3, window_bounds = array<i64: 32, 128>}]} {
    %c0 = arith.constant 0 : index
    %c0_0 = arith.constant 0 : index
    %0 = vector.load %arg1[%c0, %c0_0] : memref<32x512xbf16, #tpu.memory_space<vmem>>, vector<32x512xbf16>
    %c0_1 = arith.constant 0 : index
    %c0_2 = arith.constant 0 : index
    %1 = vector.load %arg2[%c0_1, %c0_2] : memref<512x128xbf16, #tpu.memory_space<vmem>>, vector<512x128xbf16>
    %cst = arith.constant dense<0.000000e+00> : vector<32x128xf32>
    %2 = tpu.matmul %0, %1, %cst {dimension_numbers = #tpu.dot_dimension_numbers<[1], [0], [0], [1], [0, 0, 1, 1], [], []>} : vector<32x512xbf16>, vector<512x128xbf16>, vector<32x128xf32> -> vector<32x128xf32>
    %c0_3 = arith.constant 0 : index
    %c0_4 = arith.constant 0 : index
    %3 = vector.load %arg3[%c0_3, %c0_4] : memref<1x128xf32, #tpu.memory_space<vmem>>, vector<1x128xf32>
    %4 = vector.broadcast %3 : vector<1x128xf32> to vector<32x128xf32>
    %5 = arith.addf %2, %4 : vector<32x128xf32>
    %6 = arith.truncf %5 : vector<32x128xf32> to vector<32x128xbf16>
    %c0_5 = arith.constant 0 : index
    %c0_6 = arith.constant 0 : index
    %7 = vector.load %arg4[%c0_5, %c0_6] : memref<32x128xbf16, #tpu.memory_space<vmem>>, vector<32x128xbf16>
    tpu.vector_store %arg4[%c0_5, %c0_6], %6 {strides = array<i32>} : memref<32x128xbf16, #tpu.memory_space<vmem>>, vector<32x128xbf16>,
    return
  }
  func.func @transform_0(%arg0: i32) -> (i32, i32) {
    %c0_i32 = arith.constant 0 : i32
    %c0_i32_0 = arith.constant 0 : i32
    return %arg0, %c0_i32 : i32, i32
  }
  func.func @transform_1(%arg0: i32) -> (i32, i32) {
    %c0_i32 = arith.constant 0 : i32
    %c0_i32_0 = arith.constant 0 : i32
    %c0_i32_1 = arith.constant 0 : i32
    return %c0_i32, %c0_i32_0 : i32, i32
  }
  func.func @transform_2(%arg0: i32) -> (i32, i32) {
    %c0_i32 = arith.constant 0 : i32
    %c0_i32_0 = arith.constant 0 : i32
    %c0_i32_1 = arith.constant 0 : i32
    return %c0_i32, %c0_i32_0 : i32, i32
  }
  func.func @transform_3(%arg0: i32) -> (i32, i32) {
    %c0_i32 = arith.constant 0 : i32
    %c0_i32_0 = arith.constant 0 : i32
    return %arg0, %c0_i32 : i32, i32
  }
}

module attributes {stable_mosaic.version = 11 : i64} {
  func.func @_mm_single_kernel(%arg0: i32, %arg1: memref<256x256xbf16, #tpu.memory_space<vmem>>, %arg2: memref<256x256xbf16, #tpu.memory_space<vmem>>, %arg3: memref<1x256xf32, #tpu.memory_space<vmem>>, %arg4: memref<256x256xbf16, #tpu.memory_space<vmem>>) attributes {dimension_semantics = [#tpu.dimension_semantics<parallel>], iteration_bounds = array<i64: 2>, scalar_prefetch = 0 : i64, scratch_operands = 0 : i64, tpu.core_type = #tpu.core_type<tc>, window_params = [{transform_indices = @transform_0, window_bounds = array<i64: 256, 256>}, {pipeline_mode = #tpu.pipeline_mode<synchronous>, transform_indices = @transform_1, window_bounds = array<i64: 256, 256>}, {pipeline_mode = #tpu.pipeline_mode<synchronous>, transform_indices = @transform_2, window_bounds = array<i64: 1, 256>}, {transform_indices = @transform_3, window_bounds = array<i64: 256, 256>}]} {
    %c0 = arith.constant 0 : index
    %c0_0 = arith.constant 0 : index
    %0 = vector.load %arg1[%c0, %c0_0] : memref<256x256xbf16, #tpu.memory_space<vmem>>, vector<256x256xbf16>
    %c0_1 = arith.constant 0 : index
    %c0_2 = arith.constant 0 : index
    %1 = vector.load %arg2[%c0_1, %c0_2] : memref<256x256xbf16, #tpu.memory_space<vmem>>, vector<256x256xbf16>
    %cst = arith.constant dense<0.000000e+00> : vector<256x256xf32>
    %2 = tpu.matmul %0, %1, %cst {dimension_numbers = #tpu.dot_dimension_numbers<[1], [0], [0], [1], [0, 0, 1, 1], [], []>} : vector<256x256xbf16>, vector<256x256xbf16>, vector<256x256xf32> -> vector<256x256xf32>
    %c0_3 = arith.constant 0 : index
    %c0_4 = arith.constant 0 : index
    %3 = vector.load %arg3[%c0_3, %c0_4] : memref<1x256xf32, #tpu.memory_space<vmem>>, vector<1x256xf32>
    %4 = vector.broadcast %3 : vector<1x256xf32> to vector<256x256xf32>
    %5 = arith.addf %2, %4 : vector<256x256xf32>
    %cst_5 = arith.constant 5.000000e-01 : f32
    %6 = vector.broadcast %cst_5 : f32 to vector<256x256xf32>
    %7 = arith.mulf %6, %5 : vector<256x256xf32>
    %cst_6 = arith.constant 4.471500e-02 : f32
    %8 = vector.broadcast %cst_6 : f32 to vector<256x256xf32>
    %9 = arith.mulf %8, %5 : vector<256x256xf32>
    %10 = arith.mulf %9, %5 : vector<256x256xf32>
    %11 = arith.mulf %10, %5 : vector<256x256xf32>
    %12 = arith.addf %5, %11 : vector<256x256xf32>
    %cst_7 = arith.constant 0.797884583 : f32
    %13 = vector.broadcast %cst_7 : f32 to vector<256x256xf32>
    %14 = arith.mulf %13, %12 : vector<256x256xf32>
    %15 = math.tanh %14 : vector<256x256xf32>
    %cst_8 = arith.constant 1.000000e+00 : f32
    %16 = vector.broadcast %cst_8 : f32 to vector<256x256xf32>
    %17 = arith.addf %16, %15 : vector<256x256xf32>
    %18 = arith.mulf %7, %17 : vector<256x256xf32>
    %19 = arith.truncf %18 : vector<256x256xf32> to vector<256x256xbf16>
    %c0_9 = arith.constant 0 : index
    %c0_10 = arith.constant 0 : index
    %20 = vector.load %arg4[%c0_9, %c0_10] : memref<256x256xbf16, #tpu.memory_space<vmem>>, vector<256x256xbf16>
    tpu.vector_store %arg4[%c0_9, %c0_10], %19 {strides = array<i32>} : memref<256x256xbf16, #tpu.memory_space<vmem>>, vector<256x256xbf16>,
    return
  }
  func.func @transform_0(%arg0: i32) -> (i32, i32) {
    %c0_i32 = arith.constant 0 : i32
    %c0_i32_0 = arith.constant 0 : i32
    return %arg0, %c0_i32 : i32, i32
  }
  func.func @transform_1(%arg0: i32) -> (i32, i32) {
    %c0_i32 = arith.constant 0 : i32
    %c0_i32_0 = arith.constant 0 : i32
    %c0_i32_1 = arith.constant 0 : i32
    return %c0_i32, %c0_i32_0 : i32, i32
  }
  func.func @transform_2(%arg0: i32) -> (i32, i32) {
    %c0_i32 = arith.constant 0 : i32
    %c0_i32_0 = arith.constant 0 : i32
    %c0_i32_1 = arith.constant 0 : i32
    return %c0_i32, %c0_i32_0 : i32, i32
  }
  func.func @transform_3(%arg0: i32) -> (i32, i32) {
    %c0_i32 = arith.constant 0 : i32
    %c0_i32_0 = arith.constant 0 : i32
    return %arg0, %c0_i32 : i32, i32
  }
}

module attributes {stable_mosaic.version = 11 : i64} {
  func.func @_mm_single_kernel(%arg0: i32, %arg1: memref<256x256xbf16, #tpu.memory_space<vmem>>, %arg2: memref<256x128xbf16, #tpu.memory_space<vmem>>, %arg3: memref<1x128xf32, #tpu.memory_space<vmem>>, %arg4: memref<256x128xf32, #tpu.memory_space<vmem>>) attributes {dimension_semantics = [#tpu.dimension_semantics<parallel>], iteration_bounds = array<i64: 2>, scalar_prefetch = 0 : i64, scratch_operands = 0 : i64, tpu.core_type = #tpu.core_type<tc>, window_params = [{transform_indices = @transform_0, window_bounds = array<i64: 256, 256>}, {pipeline_mode = #tpu.pipeline_mode<synchronous>, transform_indices = @transform_1, window_bounds = array<i64: 256, 128>}, {pipeline_mode = #tpu.pipeline_mode<synchronous>, transform_indices = @transform_2, window_bounds = array<i64: 1, 128>}, {transform_indices = @transform_3, window_bounds = array<i64: 256, 128>}]} {
    %c0 = arith.constant 0 : index
    %c0_0 = arith.constant 0 : index
    %0 = vector.load %arg1[%c0, %c0_0] : memref<256x256xbf16, #tpu.memory_space<vmem>>, vector<256x256xbf16>
    %c0_1 = arith.constant 0 : index
    %c0_2 = arith.constant 0 : index
    %1 = vector.load %arg2[%c0_1, %c0_2] : memref<256x128xbf16, #tpu.memory_space<vmem>>, vector<256x128xbf16>
    %cst = arith.constant dense<0.000000e+00> : vector<256x128xf32>
    %2 = tpu.matmul %0, %1, %cst {dimension_numbers = #tpu.dot_dimension_numbers<[1], [0], [0], [1], [0, 0, 1, 1], [], []>} : vector<256x256xbf16>, vector<256x128xbf16>, vector<256x128xf32> -> vector<256x128xf32>
    %c0_3 = arith.constant 0 : index
    %c0_4 = arith.constant 0 : index
    %3 = vector.load %arg3[%c0_3, %c0_4] : memref<1x128xf32, #tpu.memory_space<vmem>>, vector<1x128xf32>
    %4 = vector.broadcast %3 : vector<1x128xf32> to vector<256x128xf32>
    %5 = arith.addf %2, %4 : vector<256x128xf32>
    %c0_5 = arith.constant 0 : index
    %c0_6 = arith.constant 0 : index
    %6 = vector.load %arg4[%c0_5, %c0_6] : memref<256x128xf32, #tpu.memory_space<vmem>>, vector<256x128xf32>
    tpu.vector_store %arg4[%c0_5, %c0_6], %5 {strides = array<i32>} : memref<256x128xf32, #tpu.memory_space<vmem>>, vector<256x128xf32>,
    return
  }
  func.func @transform_0(%arg0: i32) -> (i32, i32) {
    %c0_i32 = arith.constant 0 : i32
    %c0_i32_0 = arith.constant 0 : i32
    return %arg0, %c0_i32 : i32, i32
  }
  func.func @transform_1(%arg0: i32) -> (i32, i32) {
    %c0_i32 = arith.constant 0 : i32
    %c0_i32_0 = arith.constant 0 : i32
    %c0_i32_1 = arith.constant 0 : i32
    return %c0_i32, %c0_i32_0 : i32, i32
  }
  func.func @transform_2(%arg0: i32) -> (i32, i32) {
    %c0_i32 = arith.constant 0 : i32
    %c0_i32_0 = arith.constant 0 : i32
    %c0_i32_1 = arith.constant 0 : i32
    return %c0_i32, %c0_i32_0 : i32, i32
  }
  func.func @transform_3(%arg0: i32) -> (i32, i32) {
    %c0_i32 = arith.constant 0 : i32
    %c0_i32_0 = arith.constant 0 : i32
    return %arg0, %c0_i32 : i32, i32
  }
}

</mosaic_0001>

<bundles_post_ra>
// kernel: dinov2_baseline_forward.12
= control target key start
LH: loop header
LB: loop body
LE: loop exit
PB: predicated region body
PF: predicated region fallthrough
CT: control target
= control target key end

     0   :  { %s189_s0 = inlined_call_operand.vmem [shape: bf16[32,128], index: 0, kind: input, shape index: {}]   ;;  %s190_s1 = inlined_call_operand.vmem [shape: f32[1,128], index: 1, kind: input, shape index: {}]   ;;  %s191_s2 = inlined_call_operand.vmem [shape: f32[1,128], index: 2, kind: input, shape index: {}]   ;;  %s192_s3 = inlined_call_operand.vmem [shape: bf16[32,128], index: 3, kind: output, shape index: {}]  }
   0x1   :  { %v124_v0 = vld [vmem:[%s189_s0] sm:$0xff]   ;;  %v141_v1 = vld [vmem:[%s189_s0 + $0x8] sm:$0xff]  }
   0x2   :  { %v125_v2 = vunpack.c.l.bf16 %v124_v0  ;;  %v129_v3 = vunpack.c.l.bf16 %v141_v1  ;;  %v126_v4 = vunpack.c.h.bf16 %v124_v0  ;;  %v130_v5 = vunpack.c.h.bf16 %v141_v1  ;;  %v113_v36 = vld [vmem:[%s190_s1] ss:$0 sm:$0xff] }
   0x3   :  { %v114_v41 = vld [vmem:[%s191_s2] ss:$0 sm:$0xff] }
   0x4   :  { %22 = vadd.xlane.f32.xlu0 %v125_v2  ;;  %26 = vadd.xlane.f32.xlu1 %v129_v3 }
   0x8   :  { %24 = vadd.xlane.f32.xlu0 %v126_v4  ;;  %28 = vadd.xlane.f32.xlu1 %v130_v5 }
  0x8d   :  { %v23_v6 = vpop.xlane.xlu0 %22  ;;  %v27_v7 = vpop.xlane.xlu1 %26 }
  0x8e   :  { %v31_v8 = vmul.f32 0.0078125, %v23_v6  ;;  %v33_v9 = vmul.f32 0.0078125, %v27_v7 }
  0x90   :  { %v35_v10 = vsub.f32 %v125_v2, %v31_v8  ;;  %v37_v11 = vsub.f32 %v129_v3, %v33_v9 }
  0x91   :  { %v25_v12 = vpop.xlane.xlu0 %24  ;;  %v29_v13 = vpop.xlane.xlu1 %28 }
  0x92   :  { %v32_v14 = vmul.f32 0.0078125, %v25_v12  ;;  %v39_v15 = vmul.f32 %v35_v10, %v35_v10  ;;  %v34_v16 = vmul.f32 0.0078125, %v29_v13  ;;  %v41_v19 = vmul.f32 %v37_v11, %v37_v11 }
  0x94   :  { %v36_v17 = vsub.f32 %v126_v4, %v32_v14  ;;  %43 = vadd.xlane.f32.xlu0 %v39_v15  ;;  %v38_v18 = vsub.f32 %v130_v5, %v34_v16 }
  0x96   :  { %v40_v20 = vmul.f32 %v36_v17, %v36_v17  ;;  %v42_v21 = vmul.f32 %v38_v18, %v38_v18 }
  0x98   :  { %47 = vadd.xlane.f32.xlu0 %v41_v19  ;;  %45 = vadd.xlane.f32.xlu1 %v40_v20 }
  0x9c   :  { %49 = vadd.xlane.f32.xlu1 %v42_v21 }
 0x11d   :  { %v44_v22 = vpop.xlane.xlu0 %43 }
 0x11e   :  { %v51_v23 = vmul.f32 0.0078125, %v44_v22 }
 0x120   :  { %v55_v24 = vadd.f32 1e-06, %v51_v23 }
 0x121   :  { %v46_v25 = vpop.xlane.xlu1 %45  ;;  %v48_v26 = vpop.xlane.xlu0 %47 }
 0x122   :  { %143 = vrsqrt.f32 %v55_v24  ;;  %v52_v27 = vmul.f32 0.0078125, %v46_v25  ;;  %v53_v28 = vmul.f32 0.0078125, %v48_v26 }
 0x124   :  { %v56_v29 = vadd.f32 1e-06, %v52_v27  ;;  %v57_v30 = vadd.f32 1e-06, %v53_v28 }
 0x125   :  { %v50_v31 = vpop.xlane.xlu1 %49 }
 0x126   :  { %145 = vrsqrt.f32 %v56_v29  ;;  %v54_v32 = vmul.f32 0.0078125, %v50_v31 }
 0x127   :  { %147 = vrsqrt.f32 %v57_v30 }
 0x128   :  { %v58_v33 = vadd.f32 1e-06, %v54_v32 }
 0x12a   :  { %149 = vrsqrt.f32 %v58_v33 }
 0x12f   :  { %v144_v34 = vpop.eup %143 }
 0x130   :  { %v63_v35 = vmul.f32 %v144_v34, %v35_v10 }
 0x132   :  { %v74_v39 = vmul.f32 %v113_v36, %v63_v35 }
 0x133   :  { %v146_v37 = vpop.eup %145 }
 0x134   :  { %v148_v38 = vpop.eup %147  ;;  %v64_v40 = vmul.f32 %v146_v37, %v36_v17  ;;  %v85_v45 = vadd.f32 %v114_v41, %v74_v39 }
 0x135   :  { %v65_v42 = vmul.f32 %v148_v38, %v37_v11 }
 0x136   :  { %v75_v43 = vmul.f32 %v113_v36, %v64_v40 }
 0x137   :  { %v150_v44 = vpop.eup %149  ;;  %v76_v47 = vmul.f32 %v113_v36, %v65_v42 }
 0x138   :  { %v86_v46 = vadd.f32 %v114_v41, %v75_v43  ;;  %v66_v48 = vmul.f32 %v150_v44, %v38_v18 }
 0x139   :  { %v87_v51 = vadd.f32 %v114_v41, %v76_v47 }
 0x13a   :  { %v134_v49 = vpack.c.bf16 %v86_v46, %v85_v45  ;;  %v77_v50 = vmul.f32 %v113_v36, %v66_v48 }
 0x13c   :  { %135 = vst [vmem:[%s192_s3] sm:$0xff] %v134_v49   ;;  %v88_v52 = vadd.f32 %v114_v41, %v77_v50 }
 0x13e   :  { %v139_v53 = vpack.c.bf16 %v88_v52, %v87_v51 }
 0x140   :  { %142 = vst [vmem:[%s192_s3 + $0x8] sm:$0xff] %v139_v53  }

// kernel: dinov2_baseline_forward.11
= control target key start
LH: loop header
LB: loop body
LE: loop exit
PB: predicated region body
PF: predicated region fallthrough
CT: control target
= control target key end

     0   :  { %vm386_vm0 = vcmask 1045504   ;;  %vm379_vm1 = vcmask 621568   ;;  %s929_s1 = inlined_call_operand.vmem [shape: bf16[588,128], index: 1, kind: input, shape index: {}]   ;;  %s930_s0 = inlined_call_operand.vmem [shape: bf16[32,588], index: 0, kind: input, shape index: {}]   ;;  %s931_s2 = inlined_call_operand.vmem [shape: f32[1,128], index: 2, kind: input, shape index: {}]   ;;  %s932_s3 = inlined_call_operand.vmem [shape: bf16[32,128], index: 3, kind: output, shape index: {}]  }
   0x1   :  { %v708_v0 = vld [vmem:[%s929_s1 + $0x78] sm:$0xff]   ;;  %v712_v4 = vld [vmem:[%s929_s1 + $0x70] sm:$0xff]   ;;  %v716_v8 = vld [vmem:[%s929_s1 + $0x68] sm:$0xff]  }
   0x2   :  { %v709_v1 = vld [vmem:[%s929_s1 + $0x38] sm:$0xff]   ;;  %630 = vmatprep.subr.bf16.mxu0 %v708_v0  ;;  %v713_v5 = vld [vmem:[%s929_s1 + $0x30] sm:$0xff]   ;;  %v717_v9 = vld [vmem:[%s929_s1 + $0x28] sm:$0xff]  }
   0x3   :  { %v710_v2 = vld [vmem:[%s929_s1 + $0xf8] sm:$0xff]   ;;  %631 = vmatpush3.bf16.msra.mxu0 %v709_v1  ;;  %v714_v6 = vld [vmem:[%s929_s1 + $0xf0] sm:$0xff]   ;;  %v718_v10 = vld [vmem:[%s929_s1 + $0xe8] sm:$0xff]  }
   0x4   :  { %v711_v3 = vld [vmem:[%s929_s1 + $0xb8] sm:$0xff]   ;;  %658 = vmatprep.subr.bf16.mxu1 %v710_v2  ;;  %632 = vmatprep.subr.bf16.mxu0 %v712_v4  ;;  %v715_v7 = vld [vmem:[%s929_s1 + $0xb0] sm:$0xff]   ;;  %v719_v11 = vld [vmem:[%s929_s1 + $0xa8] sm:$0xff]  }
   0x5   :  { %659 = vmatpush3.bf16.msra.mxu1 %v711_v3  ;;  %v720_v12 = vld [vmem:[%s929_s1 + $0x60] sm:$0xff]   ;;  %v724_v16 = vld [vmem:[%s929_s1 + $0x58] sm:$0xff]   ;;  %v728_v20 = vld [vmem:[%s929_s1 + $0x50] sm:$0xff]  }
   0x6   :  { %660 = vmatprep.subr.bf16.mxu1 %v714_v6  ;;  %v721_v13 = vld [vmem:[%s929_s1 + $0x20] sm:$0xff]   ;;  %v725_v17 = vld [vmem:[%s929_s1 + $0x18] sm:$0xff]   ;;  %v729_v21 = vld [vmem:[%s929_s1 + $0x10] sm:$0xff]  }
   0x7   :  { %633 = vmatpush3.bf16.msra.mxu0 %v713_v5  ;;  %v722_v14 = vld [vmem:[%s929_s1 + $0xe0] sm:$0xff]   ;;  %v726_v18 = vld [vmem:[%s929_s1 + $0xd8] sm:$0xff]   ;;  %v730_v22 = vld [vmem:[%s929_s1 + $0xd0] sm:$0xff]  }
   0x8   :  { %634 = vmatprep.subr.bf16.mxu0 %v716_v8  ;;  %v723_v15 = vld [vmem:[%s929_s1 + $0xa0] sm:$0xff]   ;;  %v727_v19 = vld [vmem:[%s929_s1 + $0x98] sm:$0xff]   ;;  %v731_v23 = vld [vmem:[%s929_s1 + $0x90] sm:$0xff]  }
   0x9   :  { %661 = vmatpush3.bf16.msra.mxu1 %v715_v7  ;;  %v732_v24 = vld [vmem:[%s929_s1 + $0x48] sm:$0xff]   ;;  %v736_v28 = vld [vmem:[%s929_s1 + $0x40] sm:$0xff]   ;;  %v747_v38 = vld [vmem:[%s929_s1 + $0x118] sm:$0xff]  }
   0xa   :  { %662 = vmatprep.subr.bf16.mxu1 %v718_v10  ;;  %v733_v25 = vld [vmem:[%s929_s1 + $0x8] sm:$0xff]   ;;  %v737_v29 = vld [vmem:[%s929_s1] sm:$0xff]   ;;  %v751_v41 = vld [vmem:[%s929_s1 + $0x110] sm:$0xff]  }
   0xb   :  { %635 = vmatpush3.bf16.msra.mxu0 %v717_v9  ;;  %v734_v26 = vld [vmem:[%s929_s1 + $0xc8] sm:$0xff]   ;;  %v738_v30 = vld [vmem:[%s929_s1 + $0xc0] sm:$0xff]  }
   0xc   :  { %636 = vmatprep.subr.bf16.mxu0 %v720_v12  ;;  %v735_v27 = vld [vmem:[%s929_s1 + $0x88] sm:$0xff]   ;;  %v739_v31 = vld [vmem:[%s930_s0] ss:$20 sps:$4 sm:$0xff]   ;;  %v741_v32 = vld [vmem:[%s930_s0 + $0x4] ss:$20 sps:$4 sm:$0xff]  }
   0xd   :  { %663 = vmatpush3.bf16.msra.mxu1 %v719_v11  ;;  %v742_v33 = vld [vmem:[%s929_s1 + $0x80] sm:$0xff]   ;;  %422 = vmatprep.mubr.bf16.mxu0 %v741_v32  ;;  %v744_v35 = vld [vmem:[%s930_s0 + $0x8] ss:$20 sps:$4 sm:$0xff]   ;;  %v758_v47 = vld [vmem:[%s930_s0 + $0x38] ss:$20 sps:$4 sm:$0xff]  }
   0xe   :  { %664 = vmatprep.subr.bf16.mxu1 %v722_v14  ;;  %v743_v34 = vld [vmem:[%s929_s1 + $0x120] sm:$0x3f]   ;;  %v750_v40 = vld [vmem:[%s930_s0 + $0x28] ss:$20 sps:$4 sm:$0xff]  }
   0xf   :  { %637 = vmatpush3.bf16.msra.mxu0 %v721_v13  ;;  %v746_v36 = vld [vmem:[%s930_s0 + $0xc] ss:$20 sps:$4 sm:$0xff]   ;;  %v388_v37 = vsel %vm386_vm0, %v743_v34, 0  ;;  %v752_v42 = vld [vmem:[%s930_s0 + $0x34] ss:$20 sps:$4 sm:$0xff]  }
  0x10   :  { %638 = vmatprep.subr.bf16.mxu0 %v724_v16  ;;  %471 = vmatprep.mubr.bf16.mxu1 %v746_v36  ;;  %v748_v39 = vld [vmem:[%s930_s0 + $0x2c] ss:$20 sps:$4 sm:$0xff]   ;;  %v754_v43 = vld [vmem:[%s930_s0 + $0x30] ss:$20 sps:$4 sm:$0xff]  }
  0x11   :  { %665 = vmatpush3.bf16.msra.mxu1 %v723_v15  ;;  %v755_v44 = vld [vmem:[%s929_s1 + $0x108] sm:$0xff]   ;;  %v757_v45 = vld [vmem:[%s930_s0 + $0x10] ss:$20 sps:$4 sm:$0xff]   ;;  %v561_v4 = vld [vmem:[%s931_s2] ss:$0 sm:$0xff] }
  0x12   :  { %666 = vmatprep.subr.bf16.mxu1 %v726_v18  ;;  %v756_v46 = vld [vmem:[%s929_s1 + $0x100] sm:$0xff]  }
  0x13   :  { %639 = vmatpush3.bf16.msra.mxu0 %v725_v17 }
  0x14   :  { %640 = vmatprep.subr.bf16.mxu0 %v728_v20 }
  0x15   :  { %667 = vmatpush3.bf16.msra.mxu1 %v727_v19 }
  0x16   :  { %668 = vmatprep.subr.bf16.mxu1 %v730_v22 }
  0x17   :  { %641 = vmatpush3.bf16.msra.mxu0 %v729_v21 }
  0x18   :  { %642 = vmatprep.subr.bf16.mxu0 %v732_v24 }
  0x19   :  { %669 = vmatpush3.bf16.msra.mxu1 %v731_v23 }
  0x1a   :  { %670 = vmatprep.subr.bf16.mxu1 %v734_v26 }
  0x1b   :  { %643 = vmatpush3.bf16.msra.mxu0 %v733_v25 }
  0x1c   :  { %644 = vmatprep.subr.bf16.mxu0 %v736_v28 }
  0x1d   :  { %671 = vmatpush3.bf16.msra.mxu1 %v735_v27 }
  0x1e   :  { %672 = vmatprep.subr.bf16.mxu1 %v738_v30 }
  0x1f   :  { %645 = vmatpush3.bf16.msra.mxu0 %v737_v29 }
  0x20   :  { %707 = vmatprep.subr.msk.bf16.mxu0 %vm386_vm0, %v743_v34 }
  0x21   :  { %673 = vmatpush3.bf16.msra.mxu1 %v742_v33 }
  0x22   :  { %423 = vmatmul.mubr.bf16.vlgmr.msra.gmra.mxu0 %v739_v31 }
  0x23   :  { %694 = vmatpush3.bf16.msra.mxu0 %v388_v37  ;;  %430 = vmatprep.mubr.bf16.mxu0 %v748_v39 }
  0x24   :  { %472 = vmatmul.mubr.bf16.vlgmr.msra.gmra.mxu1 %v744_v35  ;;  %695 = vmatprep.subr.bf16.mxu0 %v747_v38 }
  0x25   :  { %479 = vmatprep.mubr.bf16.mxu1 %v752_v42 }
  0x27   :  { %696 = vmatpush3.bf16.msra.mxu0 %v747_v38 }
  0x28   :  { %697 = vmatprep.subr.bf16.mxu0 %v751_v41 }
  0x2a   :  { %431 = vmatmul.mubr.bf16.gmra.mxu0 %v750_v40 }
  0x2b   :  { %698 = vmatpush3.bf16.msra.mxu0 %v751_v41  ;;  %703 = vmatprep.mubr.msk.bf16.mxu0 %vm379_vm1, %v757_v45 }
  0x2c   :  { %480 = vmatmul.mubr.bf16.gmra.mxu1 %v754_v43  ;;  %699 = vmatprep.subr.bf16.mxu0 %v755_v44 }
  0x2f   :  { %700 = vmatpush3.bf16.msra.mxu0 %v755_v44 }
  0x30   :  { %701 = vmatprep.subr.bf16.mxu0 %v756_v46 }
  0x33   :  { %702 = vmatpush3.bf16.msra.mxu0 %v756_v46 }
  0x36   :  { %704 = vmatmul.mubr.msk.bf16.vlgmr.msra.gmra.mxu0 %vm379_vm1, %v758_v47 }
  0xe2   :  { %v646_v48 = vpop.f32.mrf.mxu0 }
  0xe4   :  { %v647_v49 = vpop.f32.mrf.mxu0  ;;  %v674_v50 = vpop.f32.mrf.mxu1 }
  0xe5   :  { %v648_v2 = vadd.f32 %v647_v49, %v646_v48 }
  0xe6   :  { %v649_v51 = vpop.f32.mrf.mxu0  ;;  %v675_v52 = vpop.f32.mrf.mxu1 }
  0xe7   :  { %v425_v10 = vadd.f32 %v648_v2, %v561_v4  ;;  %v676_v11 = vadd.f32 %v675_v52, %v674_v50 }
  0xe8   :  { %v650_v53 = vpop.f32.mrf.mxu0  ;;  %v677_v54 = vpop.f32.mrf.mxu1 }
  0xe9   :  { %v651_v3 = vadd.f32 %v650_v53, %v649_v51  ;;  %v474_v19 = vadd.f32 %v676_v11, %v425_v10 }
  0xea   :  { %v652_v55 = vpop.f32.mrf.mxu0  ;;  %v678_v56 = vpop.f32.mrf.mxu1 }
  0xeb   :  { %v428_v12 = vadd.f32 %v651_v3, %v561_v4  ;;  %v679_v13 = vadd.f32 %v678_v56, %v677_v54 }
  0xec   :  { %v653_v57 = vpop.f32.mrf.mxu0  ;;  %v680_v58 = vpop.f32.mrf.mxu1 }
  0xed   :  { %v654_v63 = vadd.f32 %v653_v57, %v652_v55  ;;  %v477_v21 = vadd.f32 %v679_v13, %v428_v12 }
  0xee   :  { %v655_v59 = vpop.f32.mrf.mxu0  ;;  %v681_v60 = vpop.f32.mrf.mxu1 }
  0xef   :  { %v433_v5 = vadd.f32 %v654_v63, %v561_v4  ;;  %v682_v6 = vadd.f32 %v681_v60, %v680_v58 }
  0xf0   :  { %v656_v61 = vpop.f32.mrf.mxu0  ;;  %v683_v62 = vpop.f32.mrf.mxu1 }
  0xf1   :  { %v657_v0 = vadd.f32 %v656_v61, %v655_v59  ;;  %v482_v15 = vadd.f32 %v682_v6, %v433_v5 }
  0xf2   :  { %v684_v1 = vpop.f32.mrf.mxu1 }
  0xf3   :  { %v436_v7 = vadd.f32 %v657_v0, %v561_v4  ;;  %v685_v8 = vadd.f32 %v684_v1, %v683_v62 }
  0xf5   :  { %v485_v16 = vadd.f32 %v685_v8, %v436_v7 }
  0xf6   :  { %v705_v9 = vpop.f32.mrf.mxu0 }
  0xf7   :  { %v531_v18 = vadd.f32 %v705_v9, %v482_v15 }
  0xf8   :  { %v522_v14 = vpop.f32.mrf.mxu0 }
  0xf9   :  { %v523_v23 = vadd.f32 %v522_v14, %v474_v19 }
  0xfa   :  { %v706_v17 = vpop.f32.mrf.mxu0 }
  0xfb   :  { %v534_v20 = vadd.f32 %v706_v17, %v485_v16 }
  0xfc   :  { %v525_v22 = vpop.f32.mrf.mxu0 }
  0xfd   :  { %v627_v24 = vpack.c.bf16 %v534_v20, %v531_v18  ;;  %v526_v25 = vadd.f32 %v525_v22, %v477_v21 }
  0xff   :  { %629 = vst [vmem:[%s932_s3 + $0x8] sm:$0xff] %v627_v24   ;;  %v622_v26 = vpack.c.bf16 %v526_v25, %v523_v23 }
 0x101   :  { %623 = vst [vmem:[%s932_s3] sm:$0xff] %v622_v26  }

// kernel: dinov2_baseline_forward.13
= control target key start
LH: loop header
LB: loop body
LE: loop exit
PB: predicated region body
PF: predicated region fallthrough
CT: control target
= control target key end

     0   :  { %v688_v1 = vmov 0   ;;  %v53_v35 = vlaneseq  ;;  %s978_s1 = inlined_call_operand.vmem [shape: bf16[128,512], index: 1, kind: input, shape index: {}]   ;;  %s979_s0 = inlined_call_operand.vmem [shape: bf16[32,128], index: 0, kind: input, shape index: {}]   ;;  %s980_s2 = inlined_call_operand.vmem [shape: f32[1,512], index: 2, kind: input, shape index: {}]   ;;  %s981_s3 = inlined_call_operand.vmem [shape: bf16[32,512], index: 3, kind: output, shape index: {}]  }
   0x1   :  { %v606_v0 = vld [vmem:[%s978_s1 + $0xe4] ss:$16 sps:$4 sm:$0xff]   ;;  %277 = vmatprep.mubr.bf16.mxu0 %v688_v1  ;;  %330 = vmatprep.mubr.bf16.mxu1 %v688_v1  ;;  %v608_v2 = vld [vmem:[%s978_s1 + $0xec] ss:$16 sps:$4 sm:$0xff]   ;;  %v610_v3 = vld [vmem:[%s978_s1 + $0xe0] ss:$16 sps:$4 sm:$0xff]  }
   0x2   :  { %245 = vmatprep.subr.bf16.mxu0 %v606_v0  ;;  %v611_v4 = vld [vmem:[%s978_s1 + $0xe8] ss:$16 sps:$4 sm:$0xff]   ;;  %298 = vmatprep.subr.bf16.mxu1 %v608_v2  ;;  %v612_v5 = vld [vmem:[%s978_s1 + $0xc4] ss:$16 sps:$4 sm:$0xff]   ;;  %v614_v6 = vld [vmem:[%s978_s1 + $0xcc] ss:$16 sps:$4 sm:$0xff]  }
   0x3   :  { %246 = vmatpush1.bf16.msra.mxu0 %v610_v3  ;;  %299 = vmatpush1.bf16.msra.mxu1 %v611_v4  ;;  %v616_v7 = vld [vmem:[%s978_s1 + $0xc0] ss:$16 sps:$4 sm:$0xff]   ;;  %v617_v8 = vld [vmem:[%s978_s1 + $0xc8] ss:$16 sps:$4 sm:$0xff]   ;;  %v618_v9 = vld [vmem:[%s978_s1 + $0xa4] ss:$16 sps:$4 sm:$0xff]  }
   0x4   :  { %247 = vmatprep.subr.bf16.mxu0 %v612_v5  ;;  %300 = vmatprep.subr.bf16.mxu1 %v614_v6  ;;  %v620_v10 = vld [vmem:[%s978_s1 + $0xac] ss:$16 sps:$4 sm:$0xff]   ;;  %v622_v11 = vld [vmem:[%s978_s1 + $0xa0] ss:$16 sps:$4 sm:$0xff]   ;;  %v623_v12 = vld [vmem:[%s978_s1 + $0xa8] ss:$16 sps:$4 sm:$0xff]  }
   0x5   :  { %v624_v13 = vld [vmem:[%s978_s1 + $0x84] ss:$16 sps:$4 sm:$0xff]   ;;  %v626_v14 = vld [vmem:[%s978_s1 + $0x8c] ss:$16 sps:$4 sm:$0xff]   ;;  %v628_v15 = vld [vmem:[%s978_s1 + $0x80] ss:$16 sps:$4 sm:$0xff]  }
   0x6   :  { %v629_v16 = vld [vmem:[%s978_s1 + $0x88] ss:$16 sps:$4 sm:$0xff]   ;;  %v630_v17 = vld [vmem:[%s978_s1 + $0x64] ss:$16 sps:$4 sm:$0xff]   ;;  %v632_v18 = vld [vmem:[%s978_s1 + $0x6c] ss:$16 sps:$4 sm:$0xff]  }
   0x7   :  { %248 = vmatpush1.bf16.msra.mxu0 %v616_v7  ;;  %301 = vmatpush1.bf16.msra.mxu1 %v617_v8  ;;  %v634_v19 = vld [vmem:[%s978_s1 + $0x60] ss:$16 sps:$4 sm:$0xff]   ;;  %v635_v20 = vld [vmem:[%s978_s1 + $0x68] ss:$16 sps:$4 sm:$0xff]   ;;  %v636_v21 = vld [vmem:[%s978_s1 + $0x44] ss:$16 sps:$4 sm:$0xff]  }
   0x8   :  { %249 = vmatprep.subr.bf16.mxu0 %v618_v9  ;;  %302 = vmatprep.subr.bf16.mxu1 %v620_v10  ;;  %v638_v22 = vld [vmem:[%s978_s1 + $0x4c] ss:$16 sps:$4 sm:$0xff]   ;;  %v640_v23 = vld [vmem:[%s978_s1 + $0x40] ss:$16 sps:$4 sm:$0xff]   ;;  %v641_v24 = vld [vmem:[%s978_s1 + $0x48] ss:$16 sps:$4 sm:$0xff]  }
   0x9   :  { %v642_v25 = vld [vmem:[%s978_s1 + $0x24] ss:$16 sps:$4 sm:$0xff]   ;;  %v644_v26 = vld [vmem:[%s978_s1 + $0x2c] ss:$16 sps:$4 sm:$0xff]   ;;  %v646_v27 = vld [vmem:[%s978_s1 + $0x20] ss:$16 sps:$4 sm:$0xff]  }
   0xa   :  { %v647_v28 = vld [vmem:[%s978_s1 + $0x28] ss:$16 sps:$4 sm:$0xff]   ;;  %v648_v29 = vld [vmem:[%s978_s1 + $0x4] ss:$16 sps:$4 sm:$0xff]   ;;  %v650_v30 = vld [vmem:[%s978_s1 + $0xc] ss:$16 sps:$4 sm:$0xff]  }
   0xb   :  { %250 = vmatpush1.bf16.msra.mxu0 %v622_v11  ;;  %303 = vmatpush1.bf16.msra.mxu1 %v623_v12  ;;  %v652_v31 = vld [vmem:[%s978_s1] ss:$16 sps:$4 sm:$0xff]   ;;  %v653_v32 = vld [vmem:[%s978_s1 + $0x8] ss:$16 sps:$4 sm:$0xff]   ;;  %v54_v36 = vshrl.u32 %v53_v35, 7 }
   0xc   :  { %251 = vmatprep.subr.bf16.mxu0 %v624_v13  ;;  %304 = vmatprep.subr.bf16.mxu1 %v626_v14  ;;  %v654_v33 = vld [vmem:[%s979_s0] sm:$0xff]   ;;  %v655_v34 = vld [vmem:[%s979_s0 + $0x8] sm:$0xff]  }
   0xd   :  { %v55_v37 = vsub.s32 0, %v54_v36  ;;  %v63_v38 = vsub.s32 2, %v54_v36  ;;  %v51_v39 = vld [vmem:[%s980_s2] sm:$0xf]  ;;  %v59_v40 = vsub.s32 1, %v54_v36  ;;  %v67_v41 = vsub.s32 3, %v54_v36 }
   0xf   :  { %252 = vmatpush1.bf16.msra.mxu0 %v628_v15  ;;  %305 = vmatpush1.bf16.msra.mxu1 %v629_v16  ;;  %v818_v42 = vrot.slane %v51_v39, %v55_v37  ;;  %v820_v43 = vrot.slane %v51_v39, %v63_v38  ;;  %v822_v46 = vrot.slane %v51_v39, %v59_v40 }
  0x10   :  { %253 = vmatprep.subr.bf16.mxu0 %v630_v17  ;;  %306 = vmatprep.subr.bf16.mxu1 %v632_v18  ;;  %v824_v47 = vrot.slane %v51_v39, %v67_v41 }
  0x13   :  { %254 = vmatpush1.bf16.msra.mxu0 %v634_v19  ;;  %307 = vmatpush1.bf16.msra.mxu1 %v635_v20 }
  0x14   :  { %255 = vmatprep.subr.bf16.mxu0 %v636_v21  ;;  %308 = vmatprep.subr.bf16.mxu1 %v638_v22 }
  0x17   :  { %256 = vmatpush1.bf16.msra.mxu0 %v640_v23  ;;  %309 = vmatpush1.bf16.msra.mxu1 %v641_v24 }
  0x18   :  { %257 = vmatprep.subr.bf16.mxu0 %v642_v25  ;;  %310 = vmatprep.subr.bf16.mxu1 %v644_v26 }
  0x1b   :  { %258 = vmatpush1.bf16.msra.mxu0 %v646_v27  ;;  %311 = vmatpush1.bf16.msra.mxu1 %v647_v28 }
  0x1c   :  { %259 = vmatprep.subr.bf16.mxu0 %v648_v29  ;;  %312 = vmatprep.subr.bf16.mxu1 %v650_v30 }
  0x1f   :  { %260 = vmatpush1.bf16.msra.mxu0 %v652_v31  ;;  %313 = vmatpush1.bf16.msra.mxu1 %v653_v32 }
  0x22   :  { %278 = vmatmul.mubr.bf16.vlgmr.msra.gmra.mxu0 %v654_v33  ;;  %331 = vmatmul.mubr.bf16.vlgmr.msra.gmra.mxu1 %v654_v33 }
  0x23   :  { %287 = vmatprep.mubr.bf16.mxu0 %v688_v1  ;;  %340 = vmatprep.mubr.bf16.mxu1 %v688_v1 }
  0x2a   :  { %288 = vmatmul.mubr.bf16.gmra.mxu0 %v655_v34  ;;  %341 = vmatmul.mubr.bf16.gmra.mxu1 %v655_v34 }
  0xe2   :  { %v279_v44 = vpop.f32.mrf.mxu0  ;;  %v332_v45 = vpop.f32.mrf.mxu1 }
  0xe3   :  { %v827_v48 = vadd.f32 %v279_v44, %v818_v42  ;;  %v830_v49 = vadd.f32 %v332_v45, %v820_v43 }
  0xe4   :  { %v281_v50 = vpop.f32.mrf.mxu0  ;;  %v334_v51 = vpop.f32.mrf.mxu1 }
  0xe5   :  { %v367_v52 = vmul.f32 0.044715, %v827_v48  ;;  %v369_v53 = vmul.f32 0.044715, %v830_v49  ;;  %v835_v54 = vadd.f32 %v281_v50, %v822_v46  ;;  %v838_v55 = vadd.f32 %v334_v51, %v824_v47 }
  0xe6   :  { %v283_v56 = vpop.f32.mrf.mxu0  ;;  %v336_v57 = vpop.f32.mrf.mxu1 }
  0xe7   :  { %v383_v58 = vmul.f32 %v367_v52, %v827_v48  ;;  %v385_v59 = vmul.f32 %v369_v53, %v830_v49  ;;  %v843_v60 = vadd.f32 %v283_v56, %v818_v42  ;;  %v846_v61 = vadd.f32 %v336_v57, %v820_v43 }
  0xe8   :  { %v368_v62 = vmul.f32 0.044715, %v835_v54  ;;  %v370_v63 = vmul.f32 0.044715, %v838_v55  ;;  %v285_v0 = vpop.f32.mrf.mxu0  ;;  %v338_v1 = vpop.f32.mrf.mxu1 }
  0xe9   :  { %v399_v2 = vmul.f32 %v383_v58, %v827_v48  ;;  %v401_v3 = vmul.f32 %v385_v59, %v830_v49  ;;  %v371_v4 = vmul.f32 0.044715, %v843_v60  ;;  %v373_v7 = vmul.f32 0.044715, %v846_v61 }
  0xea   :  { %v384_v5 = vmul.f32 %v368_v62, %v835_v54  ;;  %v386_v6 = vmul.f32 %v370_v63, %v838_v55  ;;  %v860_v11 = vadd.f32 %v285_v0, %v822_v46  ;;  %v289_v12 = vpop.f32.mrf.mxu0  ;;  %v866_v16 = vadd.f32 %v338_v1, %v824_v47  ;;  %v342_v17 = vpop.f32.mrf.mxu1 }
  0xeb   :  { %v415_v8 = vadd.f32 %v399_v2, %v827_v48  ;;  %v417_v9 = vadd.f32 %v401_v3, %v830_v49  ;;  %v387_v10 = vmul.f32 %v371_v4, %v843_v60  ;;  %v389_v15 = vmul.f32 %v373_v7, %v846_v61 }
  0xec   :  { %v400_v13 = vmul.f32 %v384_v5, %v835_v54  ;;  %v402_v14 = vmul.f32 %v386_v6, %v838_v55  ;;  %v372_v24 = vmul.f32 0.044715, %v860_v11  ;;  %v374_v26 = vmul.f32 0.044715, %v866_v16  ;;  %v291_v27 = vpop.f32.mrf.mxu0  ;;  %v344_v31 = vpop.f32.mrf.mxu1 }
  0xed   :  { %v431_v18 = vmul.f32 0.7978846, %v415_v8  ;;  %v433_v19 = vmul.f32 0.7978846, %v417_v9  ;;  %v403_v20 = vmul.f32 %v387_v10, %v843_v60  ;;  %v405_v23 = vmul.f32 %v389_v15, %v846_v61 }
  0xee   :  { %v416_v21 = vadd.f32 %v400_v13, %v835_v54  ;;  %v418_v22 = vadd.f32 %v402_v14, %v838_v55  ;;  %v388_v33 = vmul.f32 %v372_v24, %v860_v11  ;;  %v390_v34 = vmul.f32 %v374_v26, %v866_v16  ;;  %v293_v45 = vpop.f32.mrf.mxu0  ;;  %v346_v50 = vpop.f32.mrf.mxu1 }
  0xef   :  { %656 = vtanh.f32 %v431_v18  ;;  %v419_v25 = vadd.f32 %v403_v20, %v843_v60  ;;  %v421_v30 = vadd.f32 %v405_v23, %v846_v61  ;;  %v879_v35 = vadd.f32 %v289_v12, %v818_v42 }
  0xf0   :  { %658 = vtanh.f32 %v433_v19  ;;  %v432_v28 = vmul.f32 0.7978846, %v416_v21  ;;  %v434_v29 = vmul.f32 0.7978846, %v418_v22  ;;  %v882_v37 = vadd.f32 %v342_v17, %v820_v43  ;;  %v295_v10 = vpop.f32.mrf.mxu0 }
  0xf1   :  { %v435_v32 = vmul.f32 0.7978846, %v419_v25  ;;  %v437_v36 = vmul.f32 0.7978846, %v421_v30  ;;  %v885_v38 = vadd.f32 %v291_v27, %v822_v46  ;;  %v404_v39 = vmul.f32 %v388_v33, %v860_v11 }
  0xf2   :  { %660 = vtanh.f32 %v432_v28  ;;  %v406_v40 = vmul.f32 %v390_v34, %v866_v16  ;;  %v375_v41 = vmul.f32 0.044715, %v879_v35  ;;  %v377_v44 = vmul.f32 0.044715, %v882_v37 }
  0xf3   :  { %662 = vtanh.f32 %v434_v29  ;;  %v420_v51 = vadd.f32 %v404_v39, %v860_v11  ;;  %v376_v57 = vmul.f32 0.044715, %v885_v38  ;;  %v897_v58 = vadd.f32 %v344_v31, %v824_v47 }
  0xf4   :  { %664 = vtanh.f32 %v435_v32  ;;  %v422_v52 = vadd.f32 %v406_v40, %v866_v16  ;;  %v391_v53 = vmul.f32 %v375_v41, %v879_v35  ;;  %v393_v56 = vmul.f32 %v377_v44, %v882_v37 }
  0xf5   :  { %666 = vtanh.f32 %v437_v36  ;;  %v436_v59 = vmul.f32 0.7978846, %v420_v51  ;;  %v900_v63 = vadd.f32 %v293_v45, %v818_v42  ;;  %v903_v0 = vadd.f32 %v346_v50, %v820_v43 }
  0xf6   :  { %v438_v62 = vmul.f32 0.7978846, %v422_v52  ;;  %v407_v1 = vmul.f32 %v391_v53, %v879_v35  ;;  %v409_v2 = vmul.f32 %v393_v56, %v882_v37  ;;  %v392_v3 = vmul.f32 %v376_v57, %v885_v38 }
  0xf7   :  { %668 = vtanh.f32 %v436_v59  ;;  %v378_v4 = vmul.f32 0.044715, %v897_v58  ;;  %v379_v5 = vmul.f32 0.044715, %v900_v63  ;;  %v381_v9 = vmul.f32 0.044715, %v903_v0 }
  0xf8   :  { %670 = vtanh.f32 %v438_v62  ;;  %v423_v6 = vadd.f32 %v407_v1, %v879_v35  ;;  %v425_v42 = vadd.f32 %v409_v2, %v882_v37  ;;  %v408_v7 = vmul.f32 %v392_v3, %v885_v38 }
  0xf9   :  { %v394_v43 = vmul.f32 %v378_v4, %v897_v58  ;;  %v395_v8 = vmul.f32 %v379_v5, %v900_v63  ;;  %v351_v13 = vmul.f32 0.5, %v827_v48  ;;  %v353_v19 = vmul.f32 0.5, %v830_v49  ;;  %v348_v48 = vpop.f32.mrf.mxu1 }
  0xfa   :  { %v439_v14 = vmul.f32 0.7978846, %v423_v6  ;;  %v441_v15 = vmul.f32 0.7978846, %v425_v42  ;;  %v424_v17 = vadd.f32 %v408_v7, %v885_v38  ;;  %v397_v22 = vmul.f32 %v381_v9, %v903_v0 }
  0xfb   :  { %v410_v20 = vmul.f32 %v394_v43, %v897_v58  ;;  %v411_v21 = vmul.f32 %v395_v8, %v900_v63  ;;  %v923_v25 = vadd.f32 %v295_v10, %v822_v46  ;;  %v352_v28 = vmul.f32 0.5, %v835_v54 }
  0xfc   :  { %v657_v12 = vpop.eup %656  ;;  %672 = vtanh.f32 %v439_v14  ;;  %v440_v24 = vmul.f32 0.7978846, %v424_v17  ;;  %v354_v31 = vmul.f32 0.5, %v838_v55  ;;  %v413_v32 = vmul.f32 %v397_v22, %v903_v0 }
  0xfd   :  { %v659_v18 = vpop.eup %658  ;;  %v463_v23 = vadd.f32 1.0, %v657_v12  ;;  %674 = vtanh.f32 %v441_v15  ;;  %v426_v49 = vadd.f32 %v410_v20, %v897_v58  ;;  %v427_v46 = vadd.f32 %v411_v21, %v900_v63 }
  0xfe   :  { %v465_v27 = vadd.f32 1.0, %v659_v18  ;;  %676 = vtanh.f32 %v440_v24  ;;  %v931_v39 = vadd.f32 %v348_v48, %v824_v47  ;;  %v380_v44 = vmul.f32 0.044715, %v923_v25 }
  0xff   :  { %v661_v26 = vpop.eup %660  ;;  %v442_v36 = vmul.f32 0.7978846, %v426_v49  ;;  %v479_v54 = vmul.f32 %v463_v23, %v351_v13  ;;  %v429_v55 = vadd.f32 %v413_v32, %v903_v0  ;;  %v443_v56 = vmul.f32 0.7978846, %v427_v46 }
 0x100   :  { %v663_v29 = vpop.eup %662  ;;  %v464_v30 = vadd.f32 1.0, %v661_v26  ;;  %v481_v45 = vmul.f32 %v465_v27, %v353_v19  ;;  %v396_v57 = vmul.f32 %v380_v44, %v923_v25  ;;  %v382_v59 = vmul.f32 0.044715, %v931_v39 }
 0x101   :  { %v665_v33 = vpop.eup %664  ;;  %v466_v34 = vadd.f32 1.0, %v663_v29  ;;  %678 = vtanh.f32 %v442_v36  ;;  %v355_v62 = vmul.f32 0.5, %v843_v60  ;;  %v356_v2 = vmul.f32 0.5, %v860_v11 }
 0x102   :  { %v667_v40 = vpop.eup %666  ;;  %v480_v41 = vmul.f32 %v464_v30, %v352_v28  ;;  %v467_v52 = vadd.f32 1.0, %v665_v33  ;;  %v445_v5 = vmul.f32 0.7978846, %v429_v55  ;;  %v412_v6 = vmul.f32 %v396_v57, %v923_v25 }
 0x103   :  { %v482_v50 = vmul.f32 %v466_v34, %v354_v31  ;;  %v469_v1 = vadd.f32 1.0, %v667_v40  ;;  %v398_v42 = vmul.f32 %v382_v59, %v931_v39  ;;  %v357_v43 = vmul.f32 0.5, %v846_v61 }
 0x104   :  { %v597_v51 = vpack.c.bf16 %v480_v41, %v479_v54  ;;  %v669_v47 = vpop.eup %668  ;;  %v483_v7 = vmul.f32 %v467_v52, %v355_v62  ;;  %v358_v8 = vmul.f32 0.5, %v866_v16  ;;  %680 = vtanh.f32 %v443_v56 }
 0x105   :  { %v598_v53 = vpack.c.bf16 %v482_v50, %v481_v45  ;;  %v671_v3 = vpop.eup %670  ;;  %v468_v4 = vadd.f32 1.0, %v669_v47  ;;  %v428_v11 = vadd.f32 %v412_v6, %v923_v25  ;;  %v414_v10 = vmul.f32 %v398_v42, %v931_v39 }
 0x106   :  { %543 = vst [vmem:[%s981_s3] sm:$0xff] %v597_v51  ;;  %v470_v60 = vadd.f32 1.0, %v671_v3  ;;  %v485_v12 = vmul.f32 %v469_v1, %v357_v43  ;;  %682 = vtanh.f32 %v445_v5  ;;  %v359_v22 = vmul.f32 0.5, %v879_v35 }
 0x107   :  { %544 = vst [vmem:[%s981_s3 + $0x8] sm:$0xff] %v598_v53  ;;  %v484_v9 = vmul.f32 %v468_v4, %v356_v2  ;;  %v444_v17 = vmul.f32 0.7978846, %v428_v11  ;;  %v430_v18 = vadd.f32 %v414_v10, %v931_v39  ;;  %v360_v23 = vmul.f32 0.5, %v885_v38 }
 0x108   :  { %v486_v13 = vmul.f32 %v470_v60, %v358_v8  ;;  %v361_v49 = vmul.f32 0.5, %v882_v37  ;;  %v362_v29 = vmul.f32 0.5, %v897_v58  ;;  %v363_v37 = vmul.f32 0.5, %v900_v63 }
 0x109   :  { %v673_v14 = vpop.eup %672  ;;  %v599_v15 = vpack.c.bf16 %v484_v9, %v483_v7  ;;  %684 = vtanh.f32 %v444_v17  ;;  %v446_v16 = vmul.f32 0.7978846, %v430_v18  ;;  %v364_v40 = vmul.f32 0.5, %v923_v25 }
 0x10a   :  { %v675_v19 = vpop.eup %674  ;;  %v600_v20 = vpack.c.bf16 %v486_v13, %v485_v12  ;;  %v471_v61 = vadd.f32 1.0, %v673_v14  ;;  %v365_v44 = vmul.f32 0.5, %v903_v0  ;;  %v366_v55 = vmul.f32 0.5, %v931_v39 }
 0x10b   :  { %v677_v21 = vpop.eup %676  ;;  %545 = vst [vmem:[%s981_s3 + $0x10] sm:$0xff] %v599_v15  ;;  %v473_v48 = vadd.f32 1.0, %v675_v19  ;;  %686 = vtanh.f32 %v446_v16 }
 0x10c   :  { %546 = vst [vmem:[%s981_s3 + $0x18] sm:$0xff] %v600_v20  ;;  %v472_v24 = vadd.f32 1.0, %v677_v21  ;;  %v487_v27 = vmul.f32 %v471_v61, %v359_v22 }
 0x10d   :  { %v489_v32 = vmul.f32 %v473_v48, %v361_v49 }
 0x10e   :  { %v679_v26 = vpop.eup %678  ;;  %v488_v28 = vmul.f32 %v472_v24, %v360_v23 }
 0x10f   :  { %v474_v30 = vadd.f32 1.0, %v679_v26 }
 0x110   :  { %v601_v31 = vpack.c.bf16 %v488_v28, %v487_v27 }
 0x111   :  { %v490_v33 = vmul.f32 %v474_v30, %v362_v29  ;;  %v681_v38 = vpop.eup %680 }
 0x112   :  { %547 = vst [vmem:[%s981_s3 + $0x20] sm:$0xff] %v601_v31  ;;  %v475_v36 = vadd.f32 1.0, %v681_v38 }
 0x113   :  { %v602_v35 = vpack.c.bf16 %v490_v33, %v489_v32  ;;  %v683_v34 = vpop.eup %682 }
 0x114   :  { %v477_v58 = vadd.f32 1.0, %v683_v34  ;;  %v491_v45 = vmul.f32 %v475_v36, %v363_v37 }
 0x115   :  { %548 = vst [vmem:[%s981_s3 + $0x28] sm:$0xff] %v602_v35 }
 0x116   :  { %v685_v46 = vpop.eup %684  ;;  %v493_v52 = vmul.f32 %v477_v58, %v365_v44 }
 0x117   :  { %v476_v54 = vadd.f32 1.0, %v685_v46 }
 0x118   :  { %v687_v41 = vpop.eup %686 }
 0x119   :  { %v492_v50 = vmul.f32 %v476_v54, %v364_v40  ;;  %v478_v51 = vadd.f32 1.0, %v687_v41 }
 0x11b   :  { %v603_v53 = vpack.c.bf16 %v492_v50, %v491_v45  ;;  %v494_v56 = vmul.f32 %v478_v51, %v366_v55 }
 0x11d   :  { %549 = vst [vmem:[%s981_s3 + $0x30] sm:$0xff] %v603_v53  ;;  %v604_v63 = vpack.c.bf16 %v494_v56, %v493_v52 }
 0x11f   :  { %550 = vst [vmem:[%s981_s3 + $0x38] sm:$0xff] %v604_v63 }

// kernel: dinov2_baseline_forward.14
= control target key start
LH: loop header
LB: loop body
LE: loop exit
PB: predicated region body
PF: predicated region fallthrough
CT: control target
= control target key end

     0   :  { %s757_s1 = inlined_call_operand.vmem [shape: bf16[512,128], index: 1, kind: input, shape index: {}]   ;;  %s758_s0 = inlined_call_operand.vmem [shape: bf16[32,512], index: 0, kind: input, shape index: {}]   ;;  %s759_s2 = inlined_call_operand.vmem [shape: f32[1,128], index: 2, kind: input, shape index: {}]   ;;  %s760_s3 = inlined_call_operand.vmem [shape: bf16[32,128], index: 3, kind: output, shape index: {}]  }
   0x1   :  { %v564_v0 = vld [vmem:[%s757_s1 + $0x78] sm:$0xff]   ;;  %v568_v4 = vld [vmem:[%s757_s1 + $0x70] sm:$0xff]   ;;  %v572_v8 = vld [vmem:[%s757_s1 + $0x68] sm:$0xff]  }
   0x2   :  { %v565_v1 = vld [vmem:[%s757_s1 + $0xf8] sm:$0xff]   ;;  %508 = vmatprep.subr.bf16.mxu0 %v564_v0  ;;  %v569_v5 = vld [vmem:[%s757_s1 + $0xf0] sm:$0xff]   ;;  %v573_v9 = vld [vmem:[%s757_s1 + $0xe8] sm:$0xff]  }
   0x3   :  { %v566_v2 = vld [vmem:[%s757_s1 + $0x38] sm:$0xff]   ;;  %536 = vmatprep.subr.bf16.mxu1 %v565_v1  ;;  %v570_v6 = vld [vmem:[%s757_s1 + $0x30] sm:$0xff]   ;;  %v574_v10 = vld [vmem:[%s757_s1 + $0x28] sm:$0xff]  }
   0x4   :  { %v567_v3 = vld [vmem:[%s757_s1 + $0xb8] sm:$0xff]   ;;  %509 = vmatpush3.bf16.msra.mxu0 %v566_v2  ;;  %v571_v7 = vld [vmem:[%s757_s1 + $0xb0] sm:$0xff]   ;;  %v575_v11 = vld [vmem:[%s757_s1 + $0xa8] sm:$0xff]  }
   0x5   :  { %537 = vmatpush3.bf16.msra.mxu1 %v567_v3  ;;  %510 = vmatprep.subr.bf16.mxu0 %v568_v4  ;;  %v576_v12 = vld [vmem:[%s757_s1 + $0x60] sm:$0xff]   ;;  %v580_v16 = vld [vmem:[%s757_s1 + $0x58] sm:$0xff]   ;;  %v584_v20 = vld [vmem:[%s757_s1 + $0x50] sm:$0xff]  }
   0x6   :  { %538 = vmatprep.subr.bf16.mxu1 %v569_v5  ;;  %v577_v13 = vld [vmem:[%s757_s1 + $0xe0] sm:$0xff]   ;;  %v581_v17 = vld [vmem:[%s757_s1 + $0xd8] sm:$0xff]   ;;  %v585_v21 = vld [vmem:[%s757_s1 + $0xd0] sm:$0xff]  }
   0x7   :  { %v578_v14 = vld [vmem:[%s757_s1 + $0x20] sm:$0xff]   ;;  %v582_v18 = vld [vmem:[%s757_s1 + $0x18] sm:$0xff]   ;;  %v586_v22 = vld [vmem:[%s757_s1 + $0x10] sm:$0xff]  }
   0x8   :  { %511 = vmatpush3.bf16.msra.mxu0 %v570_v6  ;;  %v579_v15 = vld [vmem:[%s757_s1 + $0xa0] sm:$0xff]   ;;  %v583_v19 = vld [vmem:[%s757_s1 + $0x98] sm:$0xff]   ;;  %v587_v23 = vld [vmem:[%s757_s1 + $0x90] sm:$0xff]  }
   0x9   :  { %539 = vmatpush3.bf16.msra.mxu1 %v571_v7  ;;  %512 = vmatprep.subr.bf16.mxu0 %v572_v8  ;;  %v588_v24 = vld [vmem:[%s757_s1 + $0x48] sm:$0xff]   ;;  %v592_v28 = vld [vmem:[%s757_s1 + $0x40] sm:$0xff]  }
   0xa   :  { %540 = vmatprep.subr.bf16.mxu1 %v573_v9  ;;  %v589_v25 = vld [vmem:[%s757_s1 + $0xc8] sm:$0xff]   ;;  %v593_v29 = vld [vmem:[%s757_s1 + $0xc0] sm:$0xff]  }
   0xb   :  { %v590_v26 = vld [vmem:[%s757_s1 + $0x8] sm:$0xff]   ;;  %v594_v30 = vld [vmem:[%s757_s1] sm:$0xff]  }
   0xc   :  { %513 = vmatpush3.bf16.msra.mxu0 %v574_v10  ;;  %v591_v27 = vld [vmem:[%s757_s1 + $0x88] sm:$0xff]   ;;  %v595_v31 = vld [vmem:[%s757_s1 + $0x80] sm:$0xff]  }
   0xd   :  { %541 = vmatpush3.bf16.msra.mxu1 %v575_v11  ;;  %514 = vmatprep.subr.bf16.mxu0 %v576_v12  ;;  %v596_v32 = vld [vmem:[%s758_s0] ss:$16 sps:$4 sm:$0xff]   ;;  %v598_v33 = vld [vmem:[%s758_s0 + $0x4] ss:$16 sps:$4 sm:$0xff]   ;;  %v599_v34 = vld [vmem:[%s758_s0 + $0x8] ss:$16 sps:$4 sm:$0xff]  }
   0xe   :  { %542 = vmatprep.subr.bf16.mxu1 %v577_v13  ;;  %v601_v35 = vld [vmem:[%s758_s0 + $0xc] ss:$16 sps:$4 sm:$0xff]   ;;  %358 = vmatprep.mubr.bf16.mxu0 %v598_v33  ;;  %v602_v36 = vld [vmem:[%s758_s0 + $0x24] ss:$16 sps:$4 sm:$0xff]   ;;  %v606_v38 = vld [vmem:[%s758_s0 + $0x20] ss:$16 sps:$4 sm:$0xff]  }
   0xf   :  { %407 = vmatprep.mubr.bf16.mxu1 %v601_v35  ;;  %v604_v37 = vld [vmem:[%s758_s0 + $0x2c] ss:$16 sps:$4 sm:$0xff]   ;;  %v607_v39 = vld [vmem:[%s758_s0 + $0x28] ss:$16 sps:$4 sm:$0xff]   ;;  %v448_v45 = vld [vmem:[%s759_s2] ss:$0 sm:$0xff] }
  0x10   :  { %515 = vmatpush3.bf16.msra.mxu0 %v578_v14 }
  0x11   :  { %543 = vmatpush3.bf16.msra.mxu1 %v579_v15  ;;  %516 = vmatprep.subr.bf16.mxu0 %v580_v16 }
  0x12   :  { %544 = vmatprep.subr.bf16.mxu1 %v581_v17 }
  0x14   :  { %517 = vmatpush3.bf16.msra.mxu0 %v582_v18 }
  0x15   :  { %545 = vmatpush3.bf16.msra.mxu1 %v583_v19  ;;  %518 = vmatprep.subr.bf16.mxu0 %v584_v20 }
  0x16   :  { %546 = vmatprep.subr.bf16.mxu1 %v585_v21 }
  0x18   :  { %519 = vmatpush3.bf16.msra.mxu0 %v586_v22 }
  0x19   :  { %547 = vmatpush3.bf16.msra.mxu1 %v587_v23  ;;  %520 = vmatprep.subr.bf16.mxu0 %v588_v24 }
  0x1a   :  { %548 = vmatprep.subr.bf16.mxu1 %v589_v25 }
  0x1c   :  { %521 = vmatpush3.bf16.msra.mxu0 %v590_v26 }
  0x1d   :  { %549 = vmatpush3.bf16.msra.mxu1 %v591_v27  ;;  %522 = vmatprep.subr.bf16.mxu0 %v592_v28 }
  0x1e   :  { %550 = vmatprep.subr.bf16.mxu1 %v593_v29 }
  0x20   :  { %523 = vmatpush3.bf16.msra.mxu0 %v594_v30 }
  0x21   :  { %551 = vmatpush3.bf16.msra.mxu1 %v595_v31 }
  0x23   :  { %359 = vmatmul.mubr.bf16.vlgmr.msra.gmra.mxu0 %v596_v32 }
  0x24   :  { %408 = vmatmul.mubr.bf16.vlgmr.msra.gmra.mxu1 %v599_v34  ;;  %366 = vmatprep.mubr.bf16.mxu0 %v602_v36 }
  0x25   :  { %415 = vmatprep.mubr.bf16.mxu1 %v604_v37 }
  0x2b   :  { %367 = vmatmul.mubr.bf16.gmra.mxu0 %v606_v38 }
  0x2c   :  { %416 = vmatmul.mubr.bf16.gmra.mxu1 %v607_v39 }
  0xe3   :  { %v524_v40 = vpop.f32.mrf.mxu0 }
  0xe4   :  { %v552_v41 = vpop.f32.mrf.mxu1 }
  0xe5   :  { %v525_v42 = vpop.f32.mrf.mxu0 }
  0xe6   :  { %v526_v43 = vadd.f32 %v525_v42, %v524_v40  ;;  %v553_v44 = vpop.f32.mrf.mxu1 }
  0xe7   :  { %v527_v46 = vpop.f32.mrf.mxu0  ;;  %v554_v53 = vadd.f32 %v553_v44, %v552_v41 }
  0xe8   :  { %v555_v47 = vpop.f32.mrf.mxu1  ;;  %v361_v49 = vadd.f32 %v526_v43, %v448_v45 }
  0xe9   :  { %v528_v48 = vpop.f32.mrf.mxu0 }
  0xea   :  { %v529_v50 = vadd.f32 %v528_v48, %v527_v46  ;;  %v556_v51 = vpop.f32.mrf.mxu1  ;;  %v410_v58 = vadd.f32 %v554_v53, %v361_v49 }
  0xeb   :  { %v530_v52 = vpop.f32.mrf.mxu0  ;;  %v557_v55 = vadd.f32 %v556_v51, %v555_v47 }
  0xec   :  { %v364_v54 = vadd.f32 %v529_v50, %v448_v45  ;;  %v558_v56 = vpop.f32.mrf.mxu1 }
  0xed   :  { %v531_v57 = vpop.f32.mrf.mxu0 }
  0xee   :  { %v413_v59 = vadd.f32 %v557_v55, %v364_v54  ;;  %v532_v60 = vadd.f32 %v531_v57, %v530_v52  ;;  %v559_v61 = vpop.f32.mrf.mxu1 }
  0xef   :  { %v533_v62 = vpop.f32.mrf.mxu0  ;;  %v560_v5 = vadd.f32 %v559_v61, %v558_v56 }
  0xf0   :  { %v500_v63 = vpack.c.bf16 %v413_v59, %v410_v58  ;;  %v561_v0 = vpop.f32.mrf.mxu1  ;;  %v369_v2 = vadd.f32 %v532_v60, %v448_v45 }
  0xf1   :  { %v534_v1 = vpop.f32.mrf.mxu0 }
  0xf2   :  { %501 = vst [vmem:[%s760_s3] sm:$0xff] %v500_v63   ;;  %v535_v3 = vadd.f32 %v534_v1, %v533_v62  ;;  %v562_v4 = vpop.f32.mrf.mxu1  ;;  %v418_v8 = vadd.f32 %v560_v5, %v369_v2 }
  0xf3   :  { %v563_v7 = vadd.f32 %v562_v4, %v561_v0 }
  0xf4   :  { %v372_v6 = vadd.f32 %v535_v3, %v448_v45 }
  0xf6   :  { %v421_v9 = vadd.f32 %v563_v7, %v372_v6 }
  0xf8   :  { %v505_v10 = vpack.c.bf16 %v421_v9, %v418_v8 }
  0xfa   :  { %507 = vst [vmem:[%s760_s3 + $0x8] sm:$0xff] %v505_v10  }

// kernel: dinov2_baseline_forward.20
= control target key start
LH: loop header
LB: loop body
LE: loop exit
PB: predicated region body
PF: predicated region fallthrough
CT: control target
= control target key end

     0   :  { %s2061_s12 = smov 0   ;;  %s2775_s0 = inlined_call_operand.vmem [shape: bf16[512,256], index: 0, kind: input, shape index: {}]   ;;  %s2776_s1 = inlined_call_operand.vmem [shape: bf16[256,256], index: 1, kind: input, shape index: {}]   ;;  %s2777_s2 = inlined_call_operand.vmem [shape: f32[1,256], index: 2, kind: input, shape index: {}]   ;;  %s2778_s3 = inlined_call_operand.vmem [shape: bf16[512,256], index: 3, kind: output, shape index: {}]  }
   0x1 LB: > { %s1626_s13 = sadd.s32 4294967295, %s2039_s12   ;;  %p1630_p0 = scmp.ge.s32.totalorder %s2039_s12, 1  ;;  %s2039_s12 = sphi %s2061_s12, %s13_s12  }
   0x2   : > { %p139_p1 = scmp.lt.s32.totalorder %s2039_s12, 3 }
   0x4   : > { %p140_p2 = pnand %p1630_p0, %p139_p1 }
   0x5   : > { %s1631_s24 = sshll.u32 (!%p140_p2), %s1626_s13, 5 }
   0x6   : > { %143 = sbr.rel (%p140_p2) target bundleno = 458 (0x1ca), region = 32  ;;  %p166_p3 = scmp.lt.s32.totalorder (!%p140_p2), %s1631_s24, 63 }
   0xb   : > { %v1809_v0 = vld [vmem:[%s2776_s1 + $0x74] ss:$8 sps:$4 sm:$0xff]   ;;  %v1811_v1 = vld [vmem:[%s2776_s1 + $0x70] ss:$8 sps:$4 sm:$0xff]   ;;  %v1812_v2 = vld [vmem:[%s2776_s1 + $0x64] ss:$8 sps:$4 sm:$0xff]  }
   0xc   : > { %575 = vmatprep.subr.bf16.mxu0 %v1809_v0  ;;  %1769 = vmatprep.subr.bf16.mxu1 %v1809_v0  ;;  %v1814_v3 = vld [vmem:[%s2776_s1 + $0x60] ss:$8 sps:$4 sm:$0xff]   ;;  %v1815_v4 = vld [vmem:[%s2776_s1 + $0x54] ss:$8 sps:$4 sm:$0xff]   ;;  %v1817_v5 = vld [vmem:[%s2776_s1 + $0x50] ss:$8 sps:$4 sm:$0xff]   ;;  %v245_v0 = vlaneseq }
   0xd   : > { %576 = vmatpush1.bf16.msra.mxu0 %v1811_v1  ;;  %1785 = vmatpush1.bf16.msra.mxu1 %v1811_v1  ;;  %v1818_v6 = vld [vmem:[%s2776_s1 + $0x44] ss:$8 sps:$4 sm:$0xff]   ;;  %v1820_v7 = vld [vmem:[%s2776_s1 + $0x40] ss:$8 sps:$4 sm:$0xff]   ;;  %v1821_v8 = vld [vmem:[%s2776_s1 + $0x34] ss:$8 sps:$4 sm:$0xff]  }
   0xe   : > { %577 = vmatprep.subr.bf16.mxu0 %v1812_v2  ;;  %1770 = vmatprep.subr.bf16.mxu1 %v1812_v2  ;;  %s2780_s24 = smov (!%p166_p3, %s1631_s24), 63  ;;  %v1823_v9 = vld [vmem:[%s2776_s1 + $0x30] ss:$8 sps:$4 sm:$0xff]   ;;  %v1824_v10 = vld [vmem:[%s2776_s1 + $0x24] ss:$8 sps:$4 sm:$0xff]   ;;  %v246_v1 = vshrl.u32 %v245_v0, 7 }
   0xf   : > { %s1735_s10 = sshll.u32 %s2780_s24, 3  ;;  %v1826_v11 = vld [vmem:[%s2776_s1 + $0x20] ss:$8 sps:$4 sm:$0xff]   ;;  %v1827_v12 = vld [vmem:[%s2776_s1 + $0x14] ss:$8 sps:$4 sm:$0xff]  }
  0x10   : > { %s2113_s16 = scalar_lea.vmem %s2775_s0, %s1735_s10  ;;  %v1829_v14 = vld [vmem:[%s2776_s1 + $0x10] ss:$8 sps:$4 sm:$0xff]   ;;  %v1830_v16 = vld [vmem:[%s2776_s1 + $0x4] ss:$8 sps:$4 sm:$0xff]   ;;  %v1832_v17 = vld [vmem:[%s2776_s1] ss:$8 sps:$4 sm:$0xff]   ;;  %s2334_s13 = scalar_lea.vmem %s2778_s3, %s1735_s10 }
  0x11   : > { %578 = vmatpush1.bf16.msra.mxu0 %v1814_v3  ;;  %1786 = vmatpush1.bf16.msra.mxu1 %v1814_v3  ;;  %v1859_v13 = vld [vmem:[%s2113_s16 + $0x4] ss:$8 sps:$4 sm:$0xff]   ;;  %v1833_v18 = vld [vmem:[%s2776_s1 + $0xf4] ss:$8 sps:$4 sm:$0xff]   ;;  %v1835_v19 = vld [vmem:[%s2776_s1 + $0xf0] ss:$8 sps:$4 sm:$0xff]  }
  0x12   : > { %579 = vmatprep.subr.bf16.mxu0 %v1815_v4  ;;  %1771 = vmatprep.subr.bf16.mxu1 %v1815_v4  ;;  %v1862_v15 = vld [vmem:[%s2113_s16 + $0x84] ss:$8 sps:$4 sm:$0xff]   ;;  %v1838_v21 = vld [vmem:[%s2776_s1 + $0xe0] ss:$8 sps:$4 sm:$0xff]   ;;  %v1839_v22 = vld [vmem:[%s2776_s1 + $0xd4] ss:$8 sps:$4 sm:$0xff]  }
  0x13   : > { %607 = vmatprep.mubr.bf16.mxu0 %v1859_v13  ;;  %687 = vmatprep.mubr.bf16.mxu1 %v1862_v15  ;;  %v1836_v20 = vld [vmem:[%s2776_s1 + $0xe4] ss:$8 sps:$4 sm:$0xff]   ;;  %v1841_v23 = vld [vmem:[%s2776_s1 + $0xd0] ss:$8 sps:$4 sm:$0xff]   ;;  %v1844_v25 = vld [vmem:[%s2776_s1 + $0xc0] ss:$8 sps:$4 sm:$0xff]  }
  0x14   : > { %v1842_v24 = vld [vmem:[%s2776_s1 + $0xc4] ss:$8 sps:$4 sm:$0xff]   ;;  %v1845_v26 = vld [vmem:[%s2776_s1 + $0xb4] ss:$8 sps:$4 sm:$0xff]   ;;  %v1847_v27 = vld [vmem:[%s2776_s1 + $0xb0] ss:$8 sps:$4 sm:$0xff]  }
  0x15   : > { %580 = vmatpush1.bf16.msra.mxu0 %v1817_v5  ;;  %1787 = vmatpush1.bf16.msra.mxu1 %v1817_v5  ;;  %v1848_v28 = vld [vmem:[%s2776_s1 + $0xa4] ss:$8 sps:$4 sm:$0xff]   ;;  %v1850_v29 = vld [vmem:[%s2776_s1 + $0xa0] ss:$8 sps:$4 sm:$0xff]   ;;  %v1851_v30 = vld [vmem:[%s2776_s1 + $0x94] ss:$8 sps:$4 sm:$0xff]  }
  0x16   : > { %581 = vmatprep.subr.bf16.mxu0 %v1818_v6  ;;  %1772 = vmatprep.subr.bf16.mxu1 %v1818_v6  ;;  %v1853_v31 = vld [vmem:[%s2776_s1 + $0x90] ss:$8 sps:$4 sm:$0xff]   ;;  %v1854_v32 = vld [vmem:[%s2776_s1 + $0x84] ss:$8 sps:$4 sm:$0xff]   ;;  %v1856_v33 = vld [vmem:[%s2776_s1 + $0x80] ss:$8 sps:$4 sm:$0xff]  }
  0x17   : > { %v1857_v34 = vld [vmem:[%s2113_s16] ss:$8 sps:$4 sm:$0xff]   ;;  %v1863_v36 = vld [vmem:[%s2113_s16 + $0x14] ss:$8 sps:$4 sm:$0xff]   ;;  %v1867_v38 = vld [vmem:[%s2113_s16 + $0x10] ss:$8 sps:$4 sm:$0xff]  }
  0x18   : > { %v1860_v35 = vld [vmem:[%s2113_s16 + $0x80] ss:$8 sps:$4 sm:$0xff]   ;;  %v1865_v37 = vld [vmem:[%s2113_s16 + $0x94] ss:$8 sps:$4 sm:$0xff]   ;;  %v1868_v39 = vld [vmem:[%s2113_s16 + $0x90] ss:$8 sps:$4 sm:$0xff]  }
  0x19   : > { %582 = vmatpush1.bf16.msra.mxu0 %v1820_v7  ;;  %1788 = vmatpush1.bf16.msra.mxu1 %v1820_v7  ;;  %v1869_v40 = vld [vmem:[%s2113_s16 + $0x24] ss:$8 sps:$4 sm:$0xff]   ;;  %v1873_v42 = vld [vmem:[%s2113_s16 + $0x20] ss:$8 sps:$4 sm:$0xff]   ;;  %v1875_v44 = vld [vmem:[%s2113_s16 + $0x34] ss:$8 sps:$4 sm:$0xff]  }
  0x1a   : > { %583 = vmatprep.subr.bf16.mxu0 %v1821_v8  ;;  %1773 = vmatprep.subr.bf16.mxu1 %v1821_v8  ;;  %v1871_v41 = vld [vmem:[%s2113_s16 + $0xa4] ss:$8 sps:$4 sm:$0xff]   ;;  %v1874_v43 = vld [vmem:[%s2113_s16 + $0xa0] ss:$8 sps:$4 sm:$0xff]   ;;  %v1877_v45 = vld [vmem:[%s2113_s16 + $0xb4] ss:$8 sps:$4 sm:$0xff]  }
  0x1b   : > { %v1879_v46 = vld [vmem:[%s2113_s16 + $0x30] ss:$8 sps:$4 sm:$0xff]   ;;  %v1881_v48 = vld [vmem:[%s2113_s16 + $0x44] ss:$8 sps:$4 sm:$0xff]   ;;  %v1885_v50 = vld [vmem:[%s2113_s16 + $0x40] ss:$8 sps:$4 sm:$0xff]  }
  0x1c   : > { %v1880_v47 = vld [vmem:[%s2113_s16 + $0xb0] ss:$8 sps:$4 sm:$0xff]   ;;  %v1883_v49 = vld [vmem:[%s2113_s16 + $0xc4] ss:$8 sps:$4 sm:$0xff]   ;;  %v1886_v51 = vld [vmem:[%s2113_s16 + $0xc0] ss:$8 sps:$4 sm:$0xff]  }
  0x1d   : > { %584 = vmatpush1.bf16.msra.mxu0 %v1823_v9  ;;  %1789 = vmatpush1.bf16.msra.mxu1 %v1823_v9  ;;  %v1887_v52 = vld [vmem:[%s2113_s16 + $0x54] ss:$8 sps:$4 sm:$0xff]   ;;  %v1891_v54 = vld [vmem:[%s2113_s16 + $0x50] ss:$8 sps:$4 sm:$0xff]   ;;  %v1893_v56 = vld [vmem:[%s2113_s16 + $0x64] ss:$8 sps:$4 sm:$0xff]  }
  0x1e   : > { %585 = vmatprep.subr.bf16.mxu0 %v1824_v10  ;;  %1774 = vmatprep.subr.bf16.mxu1 %v1824_v10  ;;  %v1889_v53 = vld [vmem:[%s2113_s16 + $0xd4] ss:$8 sps:$4 sm:$0xff]   ;;  %v1892_v55 = vld [vmem:[%s2113_s16 + $0xd0] ss:$8 sps:$4 sm:$0xff]   ;;  %v1895_v57 = vld [vmem:[%s2113_s16 + $0xe4] ss:$8 sps:$4 sm:$0xff]  }
  0x1f   : > { %v1897_v58 = vld [vmem:[%s2113_s16 + $0x60] ss:$8 sps:$4 sm:$0xff]   ;;  %v1899_v60 = vld [vmem:[%s2113_s16 + $0x74] ss:$8 sps:$4 sm:$0xff]   ;;  %v1903_v62 = vld [vmem:[%s2113_s16 + $0x70] ss:$8 sps:$4 sm:$0xff]  }
  0x20   : > { %v1898_v59 = vld [vmem:[%s2113_s16 + $0xe0] ss:$8 sps:$4 sm:$0xff]   ;;  %v1901_v61 = vld [vmem:[%s2113_s16 + $0xf4] ss:$8 sps:$4 sm:$0xff]   ;;  %v1904_v63 = vld [vmem:[%s2113_s16 + $0xf0] ss:$8 sps:$4 sm:$0xff]  }
  0x21   : > { %586 = vmatpush1.bf16.msra.mxu0 %v1826_v11  ;;  %1790 = vmatpush1.bf16.msra.mxu1 %v1826_v11  ;;  %v247_v2 = vsub.s32 0, %v246_v1  ;;  %v243_v3 = vld [vmem:[%s2777_s2] sm:$0x3]  ;;  %v251_v4 = vsub.s32 1, %v246_v1 }
  0x22   : > { %587 = vmatprep.subr.bf16.mxu0 %v1827_v12  ;;  %1775 = vmatprep.subr.bf16.mxu1 %v1827_v12 }
  0x23   : > { %v2210_v5 = vrot.slane %v243_v3, %v247_v2  ;;  %v2212_v8 = vrot.slane %v243_v3, %v251_v4 }
  0x25   : > { %588 = vmatpush1.bf16.msra.mxu0 %v1829_v14  ;;  %1791 = vmatpush1.bf16.msra.mxu1 %v1829_v14 }
  0x26   : > { %589 = vmatprep.subr.bf16.mxu0 %v1830_v16  ;;  %1776 = vmatprep.subr.bf16.mxu1 %v1830_v16 }
  0x29   : > { %590 = vmatpush1.bf16.msra.mxu0 %v1832_v17  ;;  %1792 = vmatpush1.bf16.msra.mxu1 %v1832_v17 }
  0x2a   : > { %591 = vmatprep.subr.bf16.mxu0 %v1833_v18  ;;  %1777 = vmatprep.subr.bf16.mxu1 %v1833_v18 }
  0x2d   : > { %592 = vmatpush2.bf16.msra.mxu0 %v1835_v19  ;;  %1793 = vmatpush2.bf16.msra.mxu1 %v1835_v19 }
  0x2e   : > { %593 = vmatprep.subr.bf16.mxu0 %v1836_v20  ;;  %1778 = vmatprep.subr.bf16.mxu1 %v1836_v20 }
  0x31   : > { %594 = vmatpush2.bf16.msra.mxu0 %v1838_v21  ;;  %1794 = vmatpush2.bf16.msra.mxu1 %v1838_v21 }
  0x32   : > { %595 = vmatprep.subr.bf16.mxu0 %v1839_v22  ;;  %1779 = vmatprep.subr.bf16.mxu1 %v1839_v22 }
  0x35   : > { %596 = vmatpush2.bf16.msra.mxu0 %v1841_v23  ;;  %1795 = vmatpush2.bf16.msra.mxu1 %v1841_v23 }
  0x36   : > { %597 = vmatprep.subr.bf16.mxu0 %v1842_v24  ;;  %1780 = vmatprep.subr.bf16.mxu1 %v1842_v24 }
  0x39   : > { %598 = vmatpush2.bf16.msra.mxu0 %v1844_v25  ;;  %1796 = vmatpush2.bf16.msra.mxu1 %v1844_v25 }
  0x3a   : > { %599 = vmatprep.subr.bf16.mxu0 %v1845_v26  ;;  %1781 = vmatprep.subr.bf16.mxu1 %v1845_v26 }
  0x3d   : > { %600 = vmatpush2.bf16.msra.mxu0 %v1847_v27  ;;  %1797 = vmatpush2.bf16.msra.mxu1 %v1847_v27 }
  0x3e   : > { %601 = vmatprep.subr.bf16.mxu0 %v1848_v28  ;;  %1782 = vmatprep.subr.bf16.mxu1 %v1848_v28 }
  0x41   : > { %602 = vmatpush2.bf16.msra.mxu0 %v1850_v29  ;;  %1798 = vmatpush2.bf16.msra.mxu1 %v1850_v29 }
  0x42   : > { %603 = vmatprep.subr.bf16.mxu0 %v1851_v30  ;;  %1783 = vmatprep.subr.bf16.mxu1 %v1851_v30 }
  0x45   : > { %604 = vmatpush2.bf16.msra.mxu0 %v1853_v31  ;;  %1799 = vmatpush2.bf16.msra.mxu1 %v1853_v31 }
  0x46   : > { %605 = vmatprep.subr.bf16.mxu0 %v1854_v32  ;;  %1784 = vmatprep.subr.bf16.mxu1 %v1854_v32 }
  0x49   : > { %606 = vmatpush2.bf16.msra.mxu0 %v1856_v33  ;;  %1800 = vmatpush2.bf16.msra.mxu1 %v1856_v33 }
  0x4c   : > { %608 = vmatmul.mubr.bf16.vlgmr.msra.gmra.mxu0 %v1857_v34  ;;  %688 = vmatmul.mubr.bf16.vlgmr.msra.gmra.mxu1 %v1860_v35 }
  0x4d   : > { %617 = vmatprep.mubr.bf16.mxu0 %v1863_v36  ;;  %697 = vmatprep.mubr.bf16.mxu1 %v1865_v37 }
  0x54   : > { %618 = vmatmul.mubr.bf16.gmra.mxu0 %v1867_v38  ;;  %698 = vmatmul.mubr.bf16.gmra.mxu1 %v1868_v39 }
  0x55   : > { %627 = vmatprep.mubr.bf16.mxu0 %v1869_v40  ;;  %707 = vmatprep.mubr.bf16.mxu1 %v1871_v41 }
  0x5c   : > { %628 = vmatmul.mubr.bf16.gmra.mxu0 %v1873_v42  ;;  %708 = vmatmul.mubr.bf16.gmra.mxu1 %v1874_v43 }
  0x5d   : > { %637 = vmatprep.mubr.bf16.mxu0 %v1875_v44  ;;  %717 = vmatprep.mubr.bf16.mxu1 %v1877_v45 }
  0x64   : > { %638 = vmatmul.mubr.bf16.gmra.mxu0 %v1879_v46  ;;  %718 = vmatmul.mubr.bf16.gmra.mxu1 %v1880_v47 }
  0x65   : > { %647 = vmatprep.mubr.bf16.mxu0 %v1881_v48  ;;  %727 = vmatprep.mubr.bf16.mxu1 %v1883_v49 }
  0x6c   : > { %648 = vmatmul.mubr.bf16.gmra.mxu0 %v1885_v50  ;;  %728 = vmatmul.mubr.bf16.gmra.mxu1 %v1886_v51 }
  0x6d   : > { %657 = vmatprep.mubr.bf16.mxu0 %v1887_v52  ;;  %737 = vmatprep.mubr.bf16.mxu1 %v1889_v53 }
  0x74   : > { %658 = vmatmul.mubr.bf16.gmra.mxu0 %v1891_v54  ;;  %738 = vmatmul.mubr.bf16.gmra.mxu1 %v1892_v55 }
  0x75   : > { %667 = vmatprep.mubr.bf16.mxu0 %v1893_v56  ;;  %747 = vmatprep.mubr.bf16.mxu1 %v1895_v57 }
  0x7c   : > { %668 = vmatmul.mubr.bf16.gmra.mxu0 %v1897_v58  ;;  %748 = vmatmul.mubr.bf16.gmra.mxu1 %v1898_v59 }
  0x7d   : > { %677 = vmatprep.mubr.bf16.mxu0 %v1899_v60  ;;  %757 = vmatprep.mubr.bf16.mxu1 %v1901_v61 }
  0x84   : > { %678 = vmatmul.mubr.bf16.gmra.mxu0 %v1903_v62  ;;  %758 = vmatmul.mubr.bf16.gmra.mxu1 %v1904_v63 }
 0x10c   : > { %v609_v6 = vpop.f32.mrf.mxu0  ;;  %v689_v7 = vpop.f32.mrf.mxu1 }
 0x10d   : > { %v610_v9 = vadd.f32 %v609_v6, %v2210_v5  ;;  %v2216_v10 = vadd.f32 %v689_v7, %v2210_v5 }
 0x10e   : > { %v611_v11 = vpop.f32.mrf.mxu0  ;;  %v691_v12 = vpop.f32.mrf.mxu1 }
 0x10f   : > { %v832_v13 = vmul.f32 0.044715, %v610_v9  ;;  %v864_v14 = vmul.f32 0.044715, %v2216_v10  ;;  %v2220_v15 = vadd.f32 %v611_v11, %v2212_v8  ;;  %v2223_v16 = vadd.f32 %v691_v12, %v2212_v8 }
 0x110   : > { %v613_v17 = vpop.f32.mrf.mxu0  ;;  %v693_v18 = vpop.f32.mrf.mxu1  ;;  %v2271_v2 = vmul.f32 0.5, %v610_v9  ;;  %v2276_v11 = vmul.f32 0.5, %v2216_v10 }
 0x111   : > { %v896_v19 = vmul.f32 %v832_v13, %v610_v9  ;;  %v928_v20 = vmul.f32 %v864_v14, %v2216_v10  ;;  %v2227_v21 = vadd.f32 %v613_v17, %v2210_v5  ;;  %v2230_v22 = vadd.f32 %v693_v18, %v2210_v5 }
 0x112   : > { %v833_v23 = vmul.f32 0.044715, %v2220_v15  ;;  %v865_v24 = vmul.f32 0.044715, %v2223_v16  ;;  %v615_v25 = vpop.f32.mrf.mxu0  ;;  %v695_v26 = vpop.f32.mrf.mxu1 }
 0x113   : > { %v960_v27 = vmul.f32 %v896_v19, %v610_v9  ;;  %v992_v28 = vmul.f32 %v928_v20, %v2216_v10  ;;  %v834_v29 = vmul.f32 0.044715, %v2227_v21  ;;  %v866_v32 = vmul.f32 0.044715, %v2230_v22 }
 0x114   : > { %v897_v30 = vmul.f32 %v833_v23, %v2220_v15  ;;  %v929_v31 = vmul.f32 %v865_v24, %v2223_v16  ;;  %v2242_v36 = vadd.f32 %v615_v25, %v2212_v8  ;;  %v619_v37 = vpop.f32.mrf.mxu0  ;;  %v2248_v41 = vadd.f32 %v695_v26, %v2212_v8  ;;  %v699_v42 = vpop.f32.mrf.mxu1 }
 0x115   : > { %v1024_v33 = vadd.f32 %v960_v27, %v610_v9  ;;  %v1056_v34 = vadd.f32 %v992_v28, %v2216_v10  ;;  %v898_v35 = vmul.f32 %v834_v29, %v2227_v21  ;;  %v930_v40 = vmul.f32 %v866_v32, %v2230_v22 }
 0x116   : > { %v961_v38 = vmul.f32 %v897_v30, %v2220_v15  ;;  %v993_v39 = vmul.f32 %v929_v31, %v2223_v16  ;;  %v835_v49 = vmul.f32 0.044715, %v2242_v36  ;;  %v867_v51 = vmul.f32 0.044715, %v2248_v41  ;;  %v621_v52 = vpop.f32.mrf.mxu0  ;;  %v701_v56 = vpop.f32.mrf.mxu1 }
 0x117   : > { %v1088_v43 = vmul.f32 0.7978846, %v1024_v33  ;;  %v1120_v44 = vmul.f32 0.7978846, %v1056_v34  ;;  %v962_v45 = vmul.f32 %v898_v35, %v2227_v21  ;;  %v994_v48 = vmul.f32 %v930_v40, %v2230_v22 }
 0x118   : > { %v1025_v46 = vadd.f32 %v961_v38, %v2220_v15  ;;  %v1057_v47 = vadd.f32 %v993_v39, %v2223_v16  ;;  %v899_v58 = vmul.f32 %v835_v49, %v2242_v36  ;;  %v931_v59 = vmul.f32 %v867_v51, %v2248_v41  ;;  %v623_v6 = vpop.f32.mrf.mxu0  ;;  %v703_v7 = vpop.f32.mrf.mxu1 }
 0x119   : > { %1905 = vtanh.f32 %v1088_v43  ;;  %v1026_v50 = vadd.f32 %v962_v45, %v2227_v21  ;;  %v1058_v55 = vadd.f32 %v994_v48, %v2230_v22  ;;  %v2261_v60 = vadd.f32 %v619_v37, %v2210_v5 }
 0x11a   : > { %1907 = vtanh.f32 %v1120_v44  ;;  %v1089_v53 = vmul.f32 0.7978846, %v1025_v46  ;;  %v1121_v54 = vmul.f32 0.7978846, %v1057_v47  ;;  %v2264_v62 = vadd.f32 %v699_v42, %v2210_v5  ;;  %v625_v37 = vpop.f32.mrf.mxu0 }
 0x11b   : > { %v1090_v57 = vmul.f32 0.7978846, %v1026_v50  ;;  %v1122_v61 = vmul.f32 0.7978846, %v1058_v55  ;;  %v2267_v63 = vadd.f32 %v621_v52, %v2212_v8  ;;  %v963_v0 = vmul.f32 %v899_v58, %v2242_v36 }
 0x11c   : > { %1909 = vtanh.f32 %v1089_v53  ;;  %v995_v1 = vmul.f32 %v931_v59, %v2248_v41  ;;  %v836_v3 = vmul.f32 0.044715, %v2261_v60  ;;  %v868_v4 = vmul.f32 0.044715, %v2264_v62 }
 0x11d   : > { %1911 = vtanh.f32 %v1121_v54  ;;  %v1027_v12 = vadd.f32 %v963_v0, %v2242_v36  ;;  %v837_v17 = vmul.f32 0.044715, %v2267_v63  ;;  %v2284_v18 = vadd.f32 %v701_v56, %v2212_v8  ;;  %v629_v54 = vpop.f32.mrf.mxu0 }
 0x11e   : > { %1913 = vtanh.f32 %v1090_v57  ;;  %v1059_v13 = vadd.f32 %v995_v1, %v2248_v41  ;;  %v900_v14 = vmul.f32 %v836_v3, %v2261_v60  ;;  %v932_v9 = vmul.f32 %v868_v4, %v2264_v62 }
 0x11f   : > { %1915 = vtanh.f32 %v1122_v61  ;;  %v1091_v19 = vmul.f32 0.7978846, %v1027_v12  ;;  %v2287_v23 = vadd.f32 %v623_v6, %v2210_v5  ;;  %v2290_v10 = vadd.f32 %v703_v7, %v2210_v5 }
 0x120   : > { %v1123_v20 = vmul.f32 0.7978846, %v1059_v13  ;;  %v769_v24 = vmul.f32 0.5, %v2220_v15  ;;  %v964_v25 = vmul.f32 %v900_v14, %v2261_v60  ;;  %v996_v26 = vmul.f32 %v932_v9, %v2264_v62 }
 0x121   : > { %v901_v27 = vmul.f32 %v837_v17, %v2267_v63  ;;  %v801_v28 = vmul.f32 0.5, %v2223_v16  ;;  %1917 = vtanh.f32 %v1091_v19  ;;  %v869_v29 = vmul.f32 0.044715, %v2284_v18  ;;  %v631_v19 = vpop.f32.mrf.mxu0 }
 0x122   : > { %v838_v30 = vmul.f32 0.044715, %v2287_v23  ;;  %1919 = vtanh.f32 %v1123_v20  ;;  %v1028_v31 = vadd.f32 %v964_v25, %v2261_v60  ;;  %v1060_v32 = vadd.f32 %v996_v26, %v2264_v62 }
 0x123   : > { %v965_v15 = vmul.f32 %v901_v27, %v2267_v63  ;;  %v2303_v33 = vmul.f32 0.5, %v2227_v21  ;;  %v933_v34 = vmul.f32 %v869_v29, %v2284_v18  ;;  %v870_v16 = vmul.f32 0.044715, %v2290_v10 }
 0x124   : > { %v902_v35 = vmul.f32 %v838_v30, %v2287_v23  ;;  %v2309_v39 = vmul.f32 0.5, %v2230_v22  ;;  %v1092_v40 = vmul.f32 0.7978846, %v1028_v31  ;;  %v1124_v42 = vmul.f32 0.7978846, %v1060_v32  ;;  %v705_v22 = vpop.f32.mrf.mxu1 }
 0x125   : > { %v1029_v43 = vadd.f32 %v965_v15, %v2267_v63  ;;  %v771_v45 = vmul.f32 0.5, %v2242_v36  ;;  %v997_v21 = vmul.f32 %v933_v34, %v2284_v18  ;;  %v934_v47 = vmul.f32 %v870_v16, %v2290_v10 }
 0x126   : > { %v1906_v38 = vpop.eup %1905  ;;  %v966_v46 = vmul.f32 %v902_v35, %v2287_v23  ;;  %1921 = vtanh.f32 %v1092_v40  ;;  %v2317_v50 = vadd.f32 %v625_v37, %v2212_v8  ;;  %v803_v57 = vmul.f32 0.5, %v2248_v41  ;;  %v709_v17 = vpop.f32.mrf.mxu1 }
 0x127   : > { %v1908_v44 = vpop.eup %1907  ;;  %v1216_v48 = vadd.f32 1.0, %v1906_v38  ;;  %v1093_v49 = vmul.f32 0.7978846, %v1029_v43  ;;  %1923 = vtanh.f32 %v1124_v42  ;;  %v1061_v53 = vadd.f32 %v997_v21, %v2284_v18 }
 0x128   : > { %v1248_v52 = vadd.f32 1.0, %v1908_v44  ;;  %v1030_v36 = vadd.f32 %v966_v46, %v2287_v23  ;;  %v998_v58 = vmul.f32 %v934_v47, %v2290_v10  ;;  %v2324_v3 = vadd.f32 %v705_v22, %v2212_v8  ;;  %v711_v16 = vpop.f32.mrf.mxu1 }
 0x129   : > { %v1910_v51 = vpop.eup %1909  ;;  %1925 = vtanh.f32 %v1093_v49  ;;  %v1125_v0 = vmul.f32 0.7978846, %v1061_v53  ;;  %v1280_v6 = vmul.f32 %v1216_v48, %v2271_v2  ;;  %v839_v13 = vmul.f32 0.044715, %v2317_v50 }
 0x12a   : > { %v1912_v55 = vpop.eup %1911  ;;  %v1217_v56 = vadd.f32 1.0, %v1910_v51  ;;  %v1094_v1 = vmul.f32 0.7978846, %v1030_v36  ;;  %v1062_v12 = vadd.f32 %v998_v58, %v2290_v10  ;;  %v1312_v41 = vmul.f32 %v1248_v52, %v2276_v11 }
 0x12b   : > { %v1914_v59 = vpop.eup %1913  ;;  %v1249_v61 = vadd.f32 1.0, %v1912_v55  ;;  %1927 = vtanh.f32 %v1125_v0  ;;  %v772_v26 = vmul.f32 0.5, %v2261_v60  ;;  %v903_v27 = vmul.f32 %v839_v13, %v2317_v50  ;;  %v713_v0 = vpop.f32.mrf.mxu1 }
 0x12c   : > { %v1916_v4 = vpop.eup %1915  ;;  %v1281_v7 = vmul.f32 %v1217_v56, %v769_v24  ;;  %v1218_v9 = vadd.f32 1.0, %v1914_v59  ;;  %1929 = vtanh.f32 %v1094_v1  ;;  %v1126_v24 = vmul.f32 0.7978846, %v1062_v12  ;;  %v633_v56 = vpop.f32.mrf.mxu0 }
 0x12d   : > { %v1313_v14 = vmul.f32 %v1249_v61, %v801_v28  ;;  %v1250_v20 = vadd.f32 1.0, %v1916_v4  ;;  %v871_v29 = vmul.f32 0.044715, %v2324_v3  ;;  %v2342_v11 = vadd.f32 %v629_v54, %v2210_v5 }
 0x12e   : > { %v1737_v2 = vpack.c.bf16 %v1281_v7, %v1280_v6  ;;  %v1918_v30 = vpop.eup %1917  ;;  %1931 = vtanh.f32 %v1126_v24  ;;  %v2345_v28 = vadd.f32 %v709_v17, %v2210_v5  ;;  %v2348_v31 = vadd.f32 %v631_v19, %v2212_v8 }
 0x12f   : > { %v1753_v25 = vpack.c.bf16 %v1313_v14, %v1312_v41  ;;  %v1920_v32 = vpop.eup %1919  ;;  %v1219_v15 = vadd.f32 1.0, %v1918_v30  ;;  %v804_v60 = vmul.f32 0.5, %v2264_v62  ;;  %v967_v34 = vmul.f32 %v903_v27, %v2317_v50  ;;  %v715_v27 = vpop.f32.mrf.mxu1 }
 0x130   : > { %1536 = vst [vmem:[%s2334_s13] sm:$0xff] %v1737_v2  ;;  %v935_v35 = vmul.f32 %v871_v29, %v2324_v3  ;;  %v1282_v37 = vmul.f32 %v1218_v9, %v2303_v33  ;;  %v1314_v38 = vmul.f32 %v1250_v20, %v2309_v39  ;;  %v1251_v40 = vadd.f32 1.0, %v1920_v32  ;;  %v635_v2 = vpop.f32.mrf.mxu0 }
 0x131   : > { %1552 = vst [vmem:[%s2334_s13 + $0x80] sm:$0xff] %v1753_v25  ;;  %v840_v42 = vmul.f32 0.044715, %v2342_v11  ;;  %v1283_v43 = vmul.f32 %v1219_v15, %v771_v45  ;;  %v1031_v44 = vadd.f32 %v967_v34, %v2317_v50  ;;  %v872_v46 = vmul.f32 0.044715, %v2345_v28 }
 0x132   : > { %v999_v21 = vmul.f32 %v935_v35, %v2324_v3  ;;  %v1315_v62 = vmul.f32 %v1251_v40, %v803_v57  ;;  %v841_v48 = vmul.f32 0.044715, %v2348_v31  ;;  %v2363_v33 = vadd.f32 %v711_v16, %v2212_v8 }
 0x133   : > { %v904_v47 = vmul.f32 %v840_v42, %v2342_v11  ;;  %v1922_v39 = vpop.eup %1921  ;;  %v1738_v49 = vpack.c.bf16 %v1283_v43, %v1282_v37  ;;  %v1095_v22 = vmul.f32 0.7978846, %v1031_v44  ;;  %v936_v51 = vmul.f32 %v872_v46, %v2345_v28  ;;  %v639_v43 = vpop.f32.mrf.mxu0 }
 0x134   : > { %v1063_v45 = vadd.f32 %v999_v21, %v2324_v3  ;;  %v1924_v52 = vpop.eup %1923  ;;  %v1754_v53 = vpack.c.bf16 %v1315_v62, %v1314_v38  ;;  %v1220_v36 = vadd.f32 1.0, %v1922_v39  ;;  %v905_v55 = vmul.f32 %v841_v48, %v2348_v31  ;;  %v719_v21 = vpop.f32.mrf.mxu1 }
 0x135   : > { %v968_v54 = vmul.f32 %v904_v47, %v2342_v11  ;;  %1537 = vst [vmem:[%s2334_s13 + $0x8] sm:$0xff] %v1738_v49  ;;  %v773_v58 = vmul.f32 0.5, %v2267_v63  ;;  %1933 = vtanh.f32 %v1095_v22  ;;  %v1000_v61 = vmul.f32 %v936_v51, %v2345_v28 }
 0x136   : > { %v1926_v57 = vpop.eup %1925  ;;  %v1127_v59 = vmul.f32 0.7978846, %v1063_v45  ;;  %1553 = vst [vmem:[%s2334_s13 + $0x88] sm:$0xff] %v1754_v53  ;;  %v805_v4 = vmul.f32 0.5, %v2284_v18  ;;  %v969_v7 = vmul.f32 %v905_v55, %v2348_v31  ;;  %v1284_v12 = vmul.f32 %v1220_v36, %v772_v26 }
 0x137   : > { %v1221_v1 = vadd.f32 1.0, %v1926_v57  ;;  %v1032_v6 = vadd.f32 %v968_v54, %v2342_v11  ;;  %v1252_v13 = vadd.f32 1.0, %v1924_v52  ;;  %v1064_v41 = vadd.f32 %v1000_v61, %v2345_v28 }
 0x138   : > { %1935 = vtanh.f32 %v1127_v59  ;;  %v1928_v14 = vpop.eup %1927  ;;  %v1033_v17 = vadd.f32 %v969_v7, %v2348_v31  ;;  %v873_v19 = vmul.f32 0.044715, %v2363_v33  ;;  %v2380_v25 = vadd.f32 %v633_v56, %v2210_v5  ;;  %v641_v59 = vpop.f32.mrf.mxu0 }
 0x139   : > { %v1285_v63 = vmul.f32 %v1221_v1, %v773_v58  ;;  %v1096_v9 = vmul.f32 0.7978846, %v1032_v6  ;;  %v1930_v20 = vpop.eup %1929  ;;  %v1253_v18 = vadd.f32 1.0, %v1928_v14  ;;  %v1128_v24 = vmul.f32 0.7978846, %v1064_v41 }
 0x13a   : > { %v2383_v26 = vadd.f32 %v713_v0, %v2210_v5  ;;  %v774_v30 = vmul.f32 0.5, %v2287_v23  ;;  %v1097_v32 = vmul.f32 0.7978846, %v1033_v17  ;;  %v1316_v34 = vmul.f32 %v1252_v13, %v804_v60 }
 0x13b   : > { %v1739_v29 = vpack.c.bf16 %v1285_v63, %v1284_v12  ;;  %1937 = vtanh.f32 %v1096_v9  ;;  %v1932_v15 = vpop.eup %1931  ;;  %v1317_v35 = vmul.f32 %v1253_v18, %v805_v4  ;;  %v806_v16 = vmul.f32 0.5, %v2290_v10  ;;  %v643_v18 = vpop.f32.mrf.mxu0 }
 0x13c   : > { %v937_v37 = vmul.f32 %v873_v19, %v2363_v33  ;;  %v1222_v38 = vadd.f32 1.0, %v1930_v20  ;;  %v775_v40 = vmul.f32 0.5, %v2317_v50  ;;  %1939 = vtanh.f32 %v1097_v32  ;;  %v721_v20 = vpop.f32.mrf.mxu1 }
 0x13d   : > { %1538 = vst [vmem:[%s2334_s13 + $0x10] sm:$0xff] %v1739_v29  ;;  %v842_v42 = vmul.f32 0.044715, %v2380_v25  ;;  %v1755_v44 = vpack.c.bf16 %v1317_v35, %v1316_v34  ;;  %1941 = vtanh.f32 %v1128_v24  ;;  %v874_v60 = vmul.f32 0.044715, %v2383_v26 }
 0x13e   : > { %v1001_v23 = vmul.f32 %v937_v37, %v2363_v33  ;;  %v1254_v46 = vadd.f32 1.0, %v1932_v15  ;;  %v2395_v62 = vadd.f32 %v635_v2, %v2212_v8  ;;  %v2398_v47 = vadd.f32 %v715_v27, %v2212_v8 }
 0x13f   : > { %v906_v10 = vmul.f32 %v842_v42, %v2380_v25  ;;  %1554 = vst [vmem:[%s2334_s13 + $0x90] sm:$0xff] %v1755_v44  ;;  %v807_v50 = vmul.f32 0.5, %v2324_v3  ;;  %v938_v39 = vmul.f32 %v874_v60, %v2383_v26  ;;  %v2405_v49 = vadd.f32 %v639_v43, %v2210_v5 }
 0x140   : > { %v1065_v48 = vadd.f32 %v1001_v23, %v2363_v33  ;;  %v776_v22 = vmul.f32 0.5, %v2342_v11  ;;  %v843_v51 = vmul.f32 0.044715, %v2395_v62  ;;  %v2411_v52 = vadd.f32 %v719_v21, %v2210_v5  ;;  %v723_v21 = vpop.f32.mrf.mxu1 }
 0x141   : > { %v970_v45 = vmul.f32 %v906_v10, %v2380_v25  ;;  %v1286_v53 = vmul.f32 %v1222_v38, %v774_v30  ;;  %v1002_v3 = vmul.f32 %v938_v39, %v2383_v26  ;;  %v875_v54 = vmul.f32 0.044715, %v2398_v47 }
 0x142   : > { %v1129_v36 = vmul.f32 0.7978846, %v1065_v48  ;;  %v1934_v55 = vpop.eup %1933  ;;  %v1318_v56 = vmul.f32 %v1254_v46, %v806_v16  ;;  %v907_v58 = vmul.f32 %v843_v51, %v2395_v62  ;;  %v844_v11 = vmul.f32 0.044715, %v2405_v49  ;;  %v645_v46 = vpop.f32.mrf.mxu0 }
 0x143   : > { %v1034_v57 = vadd.f32 %v970_v45, %v2380_v25  ;;  %v1223_v61 = vadd.f32 1.0, %v1934_v55  ;;  %v1066_v0 = vadd.f32 %v1002_v3, %v2383_v26  ;;  %v939_v1 = vmul.f32 %v875_v54, %v2398_v47 }
 0x144   : > { %1943 = vtanh.f32 %v1129_v36  ;;  %v971_v7 = vmul.f32 %v907_v58, %v2395_v62  ;;  %v908_v12 = vmul.f32 %v844_v11, %v2405_v49  ;;  %v876_v13 = vmul.f32 0.044715, %v2411_v52 }
 0x145   : > { %v1936_v4 = vpop.eup %1935  ;;  %v1098_v6 = vmul.f32 0.7978846, %v1034_v57  ;;  %v1287_v41 = vmul.f32 %v1223_v61, %v775_v40  ;;  %v1130_v63 = vmul.f32 0.7978846, %v1066_v0  ;;  %v1003_v9 = vmul.f32 %v939_v1, %v2398_v47  ;;  %v725_v1 = vpop.f32.mrf.mxu1 }
 0x146   : > { %v1255_v14 = vadd.f32 1.0, %v1936_v4  ;;  %v1035_v17 = vadd.f32 %v971_v7, %v2395_v62  ;;  %v972_v19 = vmul.f32 %v908_v12, %v2405_v49  ;;  %v940_v2 = vmul.f32 %v876_v13, %v2411_v52  ;;  %v649_v7 = vpop.f32.mrf.mxu0 }
 0x147   : > { %1945 = vtanh.f32 %v1098_v6  ;;  %v1740_v27 = vpack.c.bf16 %v1287_v41, %v1286_v53  ;;  %v1067_v30 = vadd.f32 %v1003_v9, %v2398_v47  ;;  %v808_v38 = vmul.f32 0.5, %v2345_v28 }
 0x148   : > { %v1938_v24 = vpop.eup %1937  ;;  %v1319_v29 = vmul.f32 %v1255_v14, %v807_v50  ;;  %1947 = vtanh.f32 %v1130_v63  ;;  %v1099_v15 = vmul.f32 0.7978846, %v1035_v17  ;;  %v1036_v34 = vadd.f32 %v972_v19, %v2405_v49 }
 0x149   : > { %v1224_v32 = vadd.f32 1.0, %v1938_v24  ;;  %v1004_v35 = vmul.f32 %v940_v2, %v2411_v52  ;;  %v1940_v16 = vpop.eup %1939  ;;  %1539 = vst [vmem:[%s2334_s13 + $0x18] sm:$0xff] %v1740_v27  ;;  %v1131_v40 = vmul.f32 0.7978846, %v1067_v30  ;;  %v2433_v42 = vadd.f32 %v641_v59, %v2212_v8 }
 0x14a   : > { %v1756_v37 = vpack.c.bf16 %v1319_v29, %v1318_v56  ;;  %v1942_v43 = vpop.eup %1941  ;;  %v777_v44 = vmul.f32 0.5, %v2348_v31  ;;  %v1225_v23 = vadd.f32 1.0, %v1940_v16  ;;  %v809_v60 = vmul.f32 0.5, %v2363_v33 }
 0x14b   : > { %1949 = vtanh.f32 %v1099_v15  ;;  %v2439_v10 = vmul.f32 0.5, %v2380_v25  ;;  %v1100_v50 = vmul.f32 0.7978846, %v1036_v34  ;;  %v1068_v28 = vadd.f32 %v1004_v35, %v2411_v52  ;;  %v729_v15 = vpop.f32.mrf.mxu1 }
 0x14c   : > { %1555 = vst [vmem:[%s2334_s13 + $0x98] sm:$0xff] %v1756_v37  ;;  %1951 = vtanh.f32 %v1131_v40  ;;  %v1288_v48 = vmul.f32 %v1224_v32, %v776_v22  ;;  %v1289_v39 = vmul.f32 %v1225_v23, %v777_v44  ;;  %v845_v45 = vmul.f32 0.044715, %v2433_v42 }
 0x14d   : > { %v2444_v31 = vadd.f32 %v721_v20, %v2212_v8  ;;  %v1256_v33 = vadd.f32 1.0, %v1942_v43  ;;  %v2447_v51 = vadd.f32 %v643_v18, %v2210_v5  ;;  %v2450_v53 = vadd.f32 %v723_v21, %v2210_v5 }
 0x14e   : > { %v2453_v25 = vadd.f32 %v645_v46, %v2212_v8  ;;  %v1741_v36 = vpack.c.bf16 %v1289_v39, %v1288_v48  ;;  %v1132_v3 = vmul.f32 0.7978846, %v1068_v28  ;;  %v909_v22 = vmul.f32 %v845_v45, %v2433_v42  ;;  %v731_v45 = vpop.f32.mrf.mxu1 }
 0x14f   : > { %v877_v54 = vmul.f32 0.044715, %v2444_v31  ;;  %v810_v55 = vmul.f32 0.5, %v2383_v26  ;;  %v779_v56 = vmul.f32 0.5, %v2395_v62  ;;  %1953 = vtanh.f32 %v1100_v50  ;;  %v651_v50 = vpop.f32.mrf.mxu0 }
 0x150   : > { %v846_v57 = vmul.f32 0.044715, %v2447_v51  ;;  %1540 = vst [vmem:[%s2334_s13 + $0x20] sm:$0xff] %v1741_v36  ;;  %v811_v11 = vmul.f32 0.5, %v2398_v47  ;;  %v973_v59 = vmul.f32 %v909_v22, %v2433_v42  ;;  %v878_v0 = vmul.f32 0.044715, %v2450_v53 }
 0x151   : > { %v1944_v58 = vpop.eup %1943  ;;  %v941_v61 = vmul.f32 %v877_v54, %v2444_v31  ;;  %v1320_v4 = vmul.f32 %v1256_v33, %v808_v38  ;;  %v847_v62 = vmul.f32 0.044715, %v2453_v25  ;;  %1955 = vtanh.f32 %v1132_v3 }
 0x152   : > { %v1257_v6 = vadd.f32 1.0, %v1944_v58  ;;  %v910_v26 = vmul.f32 %v846_v57, %v2447_v51  ;;  %v1037_v12 = vadd.f32 %v973_v59, %v2433_v42  ;;  %v942_v47 = vmul.f32 %v878_v0, %v2450_v53 }
 0x153   : > { %v1005_v13 = vmul.f32 %v941_v61, %v2444_v31  ;;  %v911_v9 = vmul.f32 %v847_v62, %v2453_v25  ;;  %v2473_v17 = vadd.f32 %v725_v1, %v2212_v8  ;;  %v2478_v24 = vadd.f32 %v649_v7, %v2210_v5  ;;  %v733_v1 = vpop.f32.mrf.mxu1 }
 0x154   : > { %v1946_v41 = vpop.eup %1945  ;;  %v1321_v14 = vmul.f32 %v1257_v6, %v809_v60  ;;  %v974_v63 = vmul.f32 %v910_v26, %v2447_v51  ;;  %v1101_v2 = vmul.f32 0.7978846, %v1037_v12  ;;  %v1006_v18 = vmul.f32 %v942_v47, %v2450_v53 }
 0x155   : > { %v1948_v19 = vpop.eup %1947  ;;  %v1069_v20 = vadd.f32 %v1005_v13, %v2444_v31  ;;  %v1226_v29 = vadd.f32 1.0, %v1946_v41  ;;  %v975_v32 = vmul.f32 %v911_v9, %v2453_v25  ;;  %v780_v38 = vmul.f32 0.5, %v2405_v49 }
 0x156   : > { %v1757_v27 = vpack.c.bf16 %v1321_v14, %v1320_v4  ;;  %v1038_v30 = vadd.f32 %v974_v63, %v2447_v51  ;;  %v1258_v34 = vadd.f32 1.0, %v1948_v19  ;;  %1957 = vtanh.f32 %v1101_v2 }
 0x157   : > { %v1133_v35 = vmul.f32 0.7978846, %v1069_v20  ;;  %v1070_v16 = vadd.f32 %v1006_v18, %v2450_v53  ;;  %v1039_v43 = vadd.f32 %v975_v32, %v2453_v25  ;;  %v879_v44 = vmul.f32 0.044715, %v2473_v17 }
 0x158   : > { %v1950_v37 = vpop.eup %1949  ;;  %1556 = vst [vmem:[%s2334_s13 + $0xa0] sm:$0xff] %v1757_v27  ;;  %v1102_v40 = vmul.f32 0.7978846, %v1038_v30  ;;  %v2488_v21 = vmul.f32 0.5, %v2411_v52  ;;  %v1290_v49 = vmul.f32 %v1226_v29, %v2439_v10  ;;  %v1322_v33 = vmul.f32 %v1258_v34, %v810_v55  ;;  %v653_v55 = vpop.f32.mrf.mxu0 }
 0x159   : > { %v1952_v23 = vpop.eup %1951  ;;  %v1227_v60 = vadd.f32 1.0, %v1950_v37  ;;  %1959 = vtanh.f32 %v1133_v35  ;;  %v1134_v46 = vmul.f32 0.7978846, %v1070_v16  ;;  %v1103_v48 = vmul.f32 0.7978846, %v1039_v43 }
 0x15a   : > { %v1259_v28 = vadd.f32 1.0, %v1952_v23  ;;  %1961 = vtanh.f32 %v1102_v40  ;;  %v943_v39 = vmul.f32 %v879_v44, %v2473_v17  ;;  %v848_v3 = vmul.f32 0.044715, %v2478_v24  ;;  %v655_v29 = vpop.f32.mrf.mxu0  ;;  %v735_v23 = vpop.f32.mrf.mxu1 }
 0x15b   : > { %v1291_v36 = vmul.f32 %v1227_v60, %v779_v56  ;;  %1963 = vtanh.f32 %v1103_v48  ;;  %v2495_v54 = vadd.f32 %v729_v15, %v2210_v5  ;;  %v2499_v10 = vadd.f32 %v651_v50, %v2212_v8 }
 0x15c   : > { %v1323_v22 = vmul.f32 %v1259_v28, %v811_v11  ;;  %v1007_v52 = vmul.f32 %v943_v39, %v2473_v17  ;;  %v1954_v57 = vpop.eup %1953  ;;  %1965 = vtanh.f32 %v1134_v46  ;;  %v912_v59 = vmul.f32 %v848_v3, %v2478_v24 }
 0x15d   : > { %v1742_v58 = vpack.c.bf16 %v1291_v36, %v1290_v49  ;;  %v781_v61 = vmul.f32 0.5, %v2433_v42  ;;  %v813_v11 = vmul.f32 0.5, %v2444_v31  ;;  %v782_v4 = vmul.f32 0.5, %v2447_v51 }
 0x15e   : > { %v1758_v56 = vpack.c.bf16 %v1323_v22, %v1322_v33  ;;  %v1071_v0 = vadd.f32 %v1007_v52, %v2473_v17  ;;  %v976_v6 = vmul.f32 %v912_v59, %v2478_v24  ;;  %v880_v26 = vmul.f32 0.044715, %v2495_v54  ;;  %v1956_v7 = vpop.eup %1955 }
 0x15f   : > { %1541 = vst [vmem:[%s2334_s13 + $0x28] sm:$0xff] %v1742_v58  ;;  %v849_v62 = vmul.f32 0.044715, %v2499_v10  ;;  %v1228_v12 = vadd.f32 1.0, %v1954_v57  ;;  %v2511_v42 = vadd.f32 %v731_v45, %v2212_v8  ;;  %v2514_v31 = vadd.f32 %v653_v55, %v2210_v5 }
 0x160   : > { %1557 = vst [vmem:[%s2334_s13 + $0xa8] sm:$0xff] %v1758_v56  ;;  %v1135_v13 = vmul.f32 0.7978846, %v1071_v0  ;;  %v1040_v47 = vadd.f32 %v976_v6, %v2478_v24  ;;  %v944_v51 = vmul.f32 %v880_v26, %v2495_v54  ;;  %v2520_v14 = vadd.f32 %v733_v1, %v2210_v5  ;;  %v659_v56 = vpop.f32.mrf.mxu0 }
 0x161   : > { %v913_v41 = vmul.f32 %v849_v62, %v2499_v10  ;;  %v2523_v63 = vmul.f32 0.5, %v2450_v53  ;;  %v783_v9 = vmul.f32 0.5, %v2453_v25  ;;  %v881_v19 = vmul.f32 0.044715, %v2511_v42 }
 0x162   : > { %1967 = vtanh.f32 %v1135_v13  ;;  %v1104_v2 = vmul.f32 0.7978846, %v1040_v47  ;;  %v1008_v20 = vmul.f32 %v944_v51, %v2495_v54  ;;  %v850_v27 = vmul.f32 0.044715, %v2514_v31 }
 0x163   : > { %v977_v18 = vmul.f32 %v913_v41, %v2499_v10  ;;  %v1958_v30 = vpop.eup %1957  ;;  %v1292_v32 = vmul.f32 %v1228_v12, %v780_v38  ;;  %v1260_v15 = vadd.f32 1.0, %v1956_v7  ;;  %v945_v34 = vmul.f32 %v881_v19, %v2511_v42 }
 0x164   : > { %v882_v53 = vmul.f32 0.044715, %v2520_v14  ;;  %v1229_v35 = vadd.f32 1.0, %v1958_v30  ;;  %1969 = vtanh.f32 %v1104_v2  ;;  %v1072_v25 = vadd.f32 %v1008_v20, %v2495_v54 }
 0x165   : > { %v1041_v16 = vadd.f32 %v977_v18, %v2499_v10  ;;  %v1009_v40 = vmul.f32 %v945_v34, %v2511_v42  ;;  %v914_v43 = vmul.f32 %v850_v27, %v2514_v31  ;;  %v2538_v38 = vadd.f32 %v655_v29, %v2212_v8 }
 0x166   : > { %v1960_v37 = vpop.eup %1959  ;;  %v946_v44 = vmul.f32 %v882_v53, %v2520_v14  ;;  %v1293_v46 = vmul.f32 %v1229_v35, %v781_v61  ;;  %v1136_v28 = vmul.f32 0.7978846, %v1072_v25  ;;  %v1324_v3 = vmul.f32 %v1260_v15, %v2488_v21  ;;  %v739_v61 = vpop.f32.mrf.mxu1 }
 0x167   : > { %v1962_v60 = vpop.eup %1961  ;;  %v1261_v50 = vadd.f32 1.0, %v1960_v37  ;;  %v1105_v48 = vmul.f32 0.7978846, %v1041_v16  ;;  %v1073_v45 = vadd.f32 %v1009_v40, %v2511_v42  ;;  %v978_v49 = vmul.f32 %v914_v43, %v2514_v31 }
 0x168   : > { %v1230_v39 = vadd.f32 1.0, %v1962_v60  ;;  %v1010_v33 = vmul.f32 %v946_v44, %v2520_v14  ;;  %v1964_v36 = vpop.eup %1963  ;;  %v1743_v22 = vpack.c.bf16 %v1293_v46, %v1292_v32  ;;  %1971 = vtanh.f32 %v1136_v28  ;;  %v741_v27 = vpop.f32.mrf.mxu1 }
 0x169   : > { %v1325_v52 = vmul.f32 %v1261_v50, %v813_v11  ;;  %v1966_v57 = vpop.eup %1965  ;;  %v1231_v58 = vadd.f32 1.0, %v1964_v36  ;;  %v815_v59 = vmul.f32 0.5, %v2473_v17  ;;  %1973 = vtanh.f32 %v1105_v48 }
 0x16a   : > { %v1137_v55 = vmul.f32 0.7978846, %v1073_v45  ;;  %1542 = vst [vmem:[%s2334_s13 + $0x30] sm:$0xff] %v1743_v22  ;;  %v1294_v1 = vmul.f32 %v1230_v39, %v782_v4  ;;  %v1042_v6 = vadd.f32 %v978_v49, %v2514_v31  ;;  %v1074_v26 = vadd.f32 %v1010_v33, %v2520_v14  ;;  %v743_v22 = vpop.f32.mrf.mxu1 }
 0x16b   : > { %v1759_v0 = vpack.c.bf16 %v1325_v52, %v1324_v3  ;;  %v1295_v21 = vmul.f32 %v1231_v58, %v783_v9  ;;  %v851_v11 = vmul.f32 0.044715, %v2538_v38  ;;  %v2550_v62 = vadd.f32 %v735_v23, %v2212_v8  ;;  %v661_v9 = vpop.f32.mrf.mxu0 }
 0x16c   : > { %1975 = vtanh.f32 %v1137_v55  ;;  %v1262_v17 = vadd.f32 1.0, %v1966_v57  ;;  %v1106_v7 = vmul.f32 0.7978846, %v1042_v6  ;;  %v2554_v12 = vadd.f32 %v659_v56, %v2210_v5 }
 0x16d   : > { %1558 = vst [vmem:[%s2334_s13 + $0xb0] sm:$0xff] %v1759_v0  ;;  %v2557_v4 = vadd.f32 %v739_v61, %v2210_v5  ;;  %v1744_v13 = vpack.c.bf16 %v1295_v21, %v1294_v1  ;;  %v784_v47 = vmul.f32 0.5, %v2478_v24  ;;  %v915_v51 = vmul.f32 %v851_v11, %v2538_v38  ;;  %v663_v40 = vpop.f32.mrf.mxu0 }
 0x16e   : > { %v883_v41 = vmul.f32 0.044715, %v2550_v62  ;;  %v816_v2 = vmul.f32 0.5, %v2495_v54  ;;  %1977 = vtanh.f32 %v1106_v7  ;;  %v1138_v20 = vmul.f32 0.7978846, %v1074_v26 }
 0x16f   : > { %v1968_v19 = vpop.eup %1967  ;;  %v852_v18 = vmul.f32 0.044715, %v2554_v12  ;;  %1543 = vst [vmem:[%s2334_s13 + $0x38] sm:$0xff] %v1744_v13  ;;  %v785_v30 = vmul.f32 0.5, %v2499_v10  ;;  %v979_v32 = vmul.f32 %v915_v51, %v2538_v38  ;;  %v1326_v15 = vmul.f32 %v1262_v17, %v2523_v63  ;;  %v665_v0 = vpop.f32.mrf.mxu0 }
 0x170   : > { %v1263_v29 = vadd.f32 1.0, %v1968_v19  ;;  %v947_v24 = vmul.f32 %v883_v41, %v2550_v62  ;;  %v884_v53 = vmul.f32 0.044715, %v2557_v4  ;;  %v2572_v54 = vadd.f32 %v661_v9, %v2212_v8 }
 0x171   : > { %v916_v34 = vmul.f32 %v852_v18, %v2554_v12  ;;  %v1970_v35 = vpop.eup %1969  ;;  %v1043_v16 = vadd.f32 %v979_v32, %v2538_v38  ;;  %v2577_v10 = vadd.f32 %v741_v27, %v2212_v8  ;;  %1979 = vtanh.f32 %v1138_v20 }
 0x172   : > { %v1327_v25 = vmul.f32 %v1263_v29, %v815_v59  ;;  %v1011_v37 = vmul.f32 %v947_v24, %v2550_v62  ;;  %v1232_v43 = vadd.f32 1.0, %v1970_v35  ;;  %v948_v44 = vmul.f32 %v884_v53, %v2557_v4  ;;  %v669_v24 = vpop.f32.mrf.mxu0 }
 0x173   : > { %v980_v63 = vmul.f32 %v916_v34, %v2554_v12  ;;  %v1107_v60 = vmul.f32 0.7978846, %v1043_v16  ;;  %v853_v50 = vmul.f32 0.044715, %v2572_v54  ;;  %v817_v28 = vmul.f32 0.5, %v2511_v42 }
 0x174   : > { %v1760_v23 = vpack.c.bf16 %v1327_v25, %v1326_v15  ;;  %v1075_v46 = vadd.f32 %v1011_v37, %v2550_v62  ;;  %v1012_v39 = vmul.f32 %v948_v44, %v2557_v4  ;;  %v2587_v45 = vadd.f32 %v663_v40, %v2210_v5 }
 0x175   : > { %v1044_v48 = vadd.f32 %v980_v63, %v2554_v12  ;;  %v1972_v49 = vpop.eup %1971  ;;  %1981 = vtanh.f32 %v1107_v60  ;;  %v917_v36 = vmul.f32 %v853_v50, %v2572_v54  ;;  %v885_v3 = vmul.f32 0.044715, %v2577_v10 }
 0x176   : > { %1559 = vst [vmem:[%s2334_s13 + $0xb8] sm:$0xff] %v1760_v23  ;;  %v1139_v33 = vmul.f32 0.7978846, %v1075_v46  ;;  %v1974_v52 = vpop.eup %1973  ;;  %v1296_v57 = vmul.f32 %v1232_v43, %v784_v47  ;;  %v1264_v58 = vadd.f32 1.0, %v1972_v49  ;;  %v1076_v59 = vadd.f32 %v1012_v39, %v2557_v4  ;;  %v745_v47 = vpop.f32.mrf.mxu1 }
 0x177   : > { %v1108_v42 = vmul.f32 0.7978846, %v1044_v48  ;;  %v1233_v55 = vadd.f32 1.0, %v1974_v52  ;;  %v981_v56 = vmul.f32 %v917_v36, %v2572_v54  ;;  %v949_v61 = vmul.f32 %v885_v3, %v2577_v10  ;;  %v671_v46 = vpop.f32.mrf.mxu0 }
 0x178   : > { %1983 = vtanh.f32 %v1139_v33  ;;  %v1328_v6 = vmul.f32 %v1264_v58, %v816_v2  ;;  %v1140_v26 = vmul.f32 0.7978846, %v1076_v59  ;;  %v854_v21 = vmul.f32 0.044715, %v2587_v45  ;;  %v749_v35 = vpop.f32.mrf.mxu1 }
 0x179   : > { %v1976_v1 = vpop.eup %1975  ;;  %1985 = vtanh.f32 %v1108_v42  ;;  %v1297_v11 = vmul.f32 %v1233_v55, %v785_v30  ;;  %v1045_v7 = vadd.f32 %v981_v56, %v2572_v54  ;;  %v1013_v13 = vmul.f32 %v949_v61, %v2577_v10 }
 0x17a   : > { %v1265_v17 = vadd.f32 1.0, %v1976_v1  ;;  %1987 = vtanh.f32 %v1140_v26  ;;  %v918_v51 = vmul.f32 %v854_v21, %v2587_v45  ;;  %v2600_v41 = vadd.f32 %v743_v22, %v2210_v5 }
 0x17b   : > { %v2603_v9 = vadd.f32 %v665_v0, %v2212_v8  ;;  %v1978_v19 = vpop.eup %1977  ;;  %v1745_v2 = vpack.c.bf16 %v1297_v11, %v1296_v57  ;;  %v1109_v18 = vmul.f32 0.7978846, %v1045_v7  ;;  %v1077_v27 = vadd.f32 %v1013_v13, %v2577_v10 }
 0x17c   : > { %v1329_v20 = vmul.f32 %v1265_v17, %v817_v28  ;;  %v786_v29 = vmul.f32 0.5, %v2514_v31  ;;  %v982_v30 = vmul.f32 %v918_v51, %v2587_v45  ;;  %v886_v32 = vmul.f32 0.044715, %v2600_v41  ;;  %v751_v51 = vpop.f32.mrf.mxu1 }
 0x17d   : > { %1544 = vst [vmem:[%s2334_s13 + $0x40] sm:$0xff] %v1745_v2  ;;  %v818_v34 = vmul.f32 0.5, %v2520_v14  ;;  %1989 = vtanh.f32 %v1109_v18  ;;  %v1141_v53 = vmul.f32 0.7978846, %v1077_v27  ;;  %v1234_v25 = vadd.f32 1.0, %v1978_v19  ;;  %v673_v27 = vpop.f32.mrf.mxu0 }
 0x17e   : > { %v1761_v15 = vpack.c.bf16 %v1329_v20, %v1328_v6  ;;  %v787_v16 = vmul.f32 0.5, %v2538_v38  ;;  %v1046_v37 = vadd.f32 %v982_v30, %v2587_v45  ;;  %v950_v40 = vmul.f32 %v886_v32, %v2600_v41  ;;  %v1980_v31 = vpop.eup %1979 }
 0x17f   : > { %v819_v43 = vmul.f32 0.5, %v2550_v62  ;;  %1991 = vtanh.f32 %v1141_v53  ;;  %v855_v63 = vmul.f32 0.044715, %v2603_v9  ;;  %v2618_v44 = vadd.f32 %v745_v47, %v2212_v8 }
 0x180   : > { %1560 = vst [vmem:[%s2334_s13 + $0xc0] sm:$0xff] %v1761_v15  ;;  %v1110_v14 = vmul.f32 0.7978846, %v1046_v37  ;;  %v1014_v23 = vmul.f32 %v950_v40, %v2600_v41  ;;  %v2622_v60 = vadd.f32 %v669_v24, %v2210_v5  ;;  %v2625_v38 = vadd.f32 %v749_v35, %v2210_v5  ;;  %v753_v40 = vpop.f32.mrf.mxu1 }
 0x181   : > { %v788_v50 = vmul.f32 0.5, %v2554_v12  ;;  %v820_v62 = vmul.f32 0.5, %v2557_v4  ;;  %v919_v28 = vmul.f32 %v855_v63, %v2603_v9  ;;  %v887_v48 = vmul.f32 0.044715, %v2618_v44 }
 0x182   : > { %v1982_v39 = vpop.eup %1981  ;;  %v1298_v49 = vmul.f32 %v1234_v25, %v786_v29  ;;  %v1266_v33 = vadd.f32 1.0, %v1980_v31  ;;  %v1078_v36 = vadd.f32 %v1014_v23, %v2600_v41  ;;  %v856_v3 = vmul.f32 0.044715, %v2622_v60  ;;  %v675_v23 = vpop.f32.mrf.mxu0 }
 0x183   : > { %v1235_v22 = vadd.f32 1.0, %v1982_v39  ;;  %v983_v52 = vmul.f32 %v919_v28, %v2603_v9  ;;  %v951_v57 = vmul.f32 %v887_v48, %v2618_v44  ;;  %v2636_v12 = vadd.f32 %v671_v46, %v2212_v8 }
 0x184   : > { %1993 = vtanh.f32 %v1110_v14  ;;  %v1142_v58 = vmul.f32 0.7978846, %v1078_v36  ;;  %v920_v42 = vmul.f32 %v856_v3, %v2622_v60  ;;  %v888_v59 = vmul.f32 0.044715, %v2625_v38 }
 0x185   : > { %v1984_v4 = vpop.eup %1983  ;;  %v1299_v56 = vmul.f32 %v1235_v22, %v787_v16  ;;  %v1047_v0 = vadd.f32 %v983_v52, %v2603_v9  ;;  %v1015_v1 = vmul.f32 %v951_v57, %v2618_v44  ;;  %v1330_v6 = vmul.f32 %v1266_v33, %v818_v34 }
 0x186   : > { %v1986_v55 = vpop.eup %1985  ;;  %v1267_v61 = vadd.f32 1.0, %v1984_v4  ;;  %1995 = vtanh.f32 %v1142_v58  ;;  %v984_v26 = vmul.f32 %v920_v42, %v2622_v60  ;;  %v952_v21 = vmul.f32 %v888_v59, %v2625_v38  ;;  %v755_v4 = vpop.f32.mrf.mxu1 }
 0x187   : > { %v1988_v11 = vpop.eup %1987  ;;  %v1746_v17 = vpack.c.bf16 %v1299_v56, %v1298_v49  ;;  %v1111_v13 = vmul.f32 0.7978846, %v1047_v0  ;;  %v1079_v47 = vadd.f32 %v1015_v1, %v2618_v44  ;;  %v1236_v19 = vadd.f32 1.0, %v1986_v55  ;;  %v679_v58 = vpop.f32.mrf.mxu0 }
 0x188   : > { %v1331_v7 = vmul.f32 %v1267_v61, %v819_v43  ;;  %v1268_v2 = vadd.f32 1.0, %v1988_v11  ;;  %v1048_v20 = vadd.f32 %v984_v26, %v2622_v60  ;;  %v1016_v18 = vmul.f32 %v952_v21, %v2625_v38 }
 0x189   : > { %1545 = vst [vmem:[%s2334_s13 + $0x48] sm:$0xff] %v1746_v17  ;;  %1997 = vtanh.f32 %v1111_v13  ;;  %v1143_v30 = vmul.f32 0.7978846, %v1079_v47  ;;  %v857_v32 = vmul.f32 0.044715, %v2636_v12  ;;  %v789_v15 = vmul.f32 0.5, %v2572_v54  ;;  %v759_v47 = vpop.f32.mrf.mxu1 }
 0x18a   : > { %v1762_v29 = vpack.c.bf16 %v1331_v7, %v1330_v6  ;;  %v1990_v24 = vpop.eup %1989  ;;  %v1112_v34 = vmul.f32 0.7978846, %v1048_v20  ;;  %v1080_v53 = vadd.f32 %v1016_v18, %v2625_v38  ;;  %v2652_v35 = vadd.f32 %v751_v51, %v2212_v8 }
 0x18b   : > { %v1237_v25 = vadd.f32 1.0, %v1990_v24  ;;  %1999 = vtanh.f32 %v1143_v30  ;;  %v921_v16 = vmul.f32 %v857_v32, %v2636_v12  ;;  %v2657_v37 = vadd.f32 %v673_v27, %v2210_v5 }
 0x18c   : > { %1561 = vst [vmem:[%s2334_s13 + $0xc8] sm:$0xff] %v1762_v29  ;;  %v1992_v31 = vpop.eup %1991  ;;  %v1300_v43 = vmul.f32 %v1236_v19, %v788_v50  ;;  %v1332_v63 = vmul.f32 %v1268_v2, %v820_v62  ;;  %v821_v54 = vmul.f32 0.5, %v2577_v10  ;;  %v889_v14 = vmul.f32 0.044715, %v2652_v35 }
 0x18d   : > { %v1301_v46 = vmul.f32 %v1237_v25, %v789_v15  ;;  %v1269_v28 = vadd.f32 1.0, %v1992_v31  ;;  %2001 = vtanh.f32 %v1112_v34  ;;  %v985_v48 = vmul.f32 %v921_v16, %v2636_v12 }
 0x18e   : > { %v1144_v39 = vmul.f32 0.7978846, %v1080_v53  ;;  %v953_v49 = vmul.f32 %v889_v14, %v2652_v35  ;;  %v858_v33 = vmul.f32 0.044715, %v2657_v37  ;;  %v2665_v36 = vadd.f32 %v753_v40, %v2210_v5  ;;  %v761_v40 = vpop.f32.mrf.mxu1 }
 0x18f   : > { %v1747_v50 = vpack.c.bf16 %v1301_v46, %v1300_v43  ;;  %v1333_v62 = vmul.f32 %v1269_v28, %v821_v54  ;;  %v1049_v10 = vadd.f32 %v985_v48, %v2636_v12  ;;  %v2669_v3 = vadd.f32 %v675_v23, %v2212_v8 }
 0x190   : > { %v790_v22 = vmul.f32 0.5, %v2587_v45  ;;  %v1017_v52 = vmul.f32 %v953_v49, %v2652_v35  ;;  %v922_v57 = vmul.f32 %v858_v33, %v2657_v37  ;;  %v822_v55 = vmul.f32 0.5, %v2600_v41 }
 0x191   : > { %v1994_v42 = vpop.eup %1993  ;;  %1546 = vst [vmem:[%s2334_s13 + $0x50] sm:$0xff] %v1747_v50  ;;  %v1763_v59 = vpack.c.bf16 %v1333_v62, %v1332_v63  ;;  %v1113_v56 = vmul.f32 0.7978846, %v1049_v10  ;;  %v890_v61 = vmul.f32 0.044715, %v2665_v36  ;;  %2003 = vtanh.f32 %v1144_v39 }
 0x192   : > { %v1081_v0 = vadd.f32 %v1017_v52, %v2652_v35  ;;  %v986_v45 = vmul.f32 %v922_v57, %v2657_v37  ;;  %v859_v1 = vmul.f32 0.044715, %v2669_v3  ;;  %v2683_v21 = vadd.f32 %v755_v4, %v2212_v8  ;;  %v763_v52 = vpop.f32.mrf.mxu1 }
 0x193   : > { %v1996_v6 = vpop.eup %1995  ;;  %1562 = vst [vmem:[%s2334_s13 + $0xd0] sm:$0xff] %v1763_v59  ;;  %2005 = vtanh.f32 %v1113_v56  ;;  %v954_v26 = vmul.f32 %v890_v61, %v2665_v36  ;;  %v2686_v41 = vadd.f32 %v679_v58, %v2210_v5  ;;  %v1238_v11 = vadd.f32 1.0, %v1994_v42 }
 0x194   : > { %v1145_v17 = vmul.f32 0.7978846, %v1081_v0  ;;  %v1050_v7 = vadd.f32 %v986_v45, %v2657_v37  ;;  %v923_v13 = vmul.f32 %v859_v1, %v2669_v3  ;;  %v791_v51 = vmul.f32 0.5, %v2603_v9  ;;  %v681_v9 = vpop.f32.mrf.mxu0 }
 0x195   : > { %v823_v19 = vmul.f32 0.5, %v2618_v44  ;;  %v1018_v2 = vmul.f32 %v954_v26, %v2665_v36  ;;  %v891_v20 = vmul.f32 0.044715, %v2683_v21  ;;  %v1270_v27 = vadd.f32 1.0, %v1996_v6 }
 0x196   : > { %v1998_v18 = vpop.eup %1997  ;;  %2007 = vtanh.f32 %v1145_v17  ;;  %v1114_v29 = vmul.f32 0.7978846, %v1050_v7  ;;  %v987_v30 = vmul.f32 %v923_v13, %v2669_v3  ;;  %v860_v34 = vmul.f32 0.044715, %v2686_v41 }
 0x197   : > { %v1239_v32 = vadd.f32 1.0, %v1998_v18  ;;  %v1082_v24 = vadd.f32 %v1018_v2, %v2665_v36  ;;  %v955_v15 = vmul.f32 %v891_v20, %v2683_v21  ;;  %v1302_v44 = vmul.f32 %v1238_v11, %v790_v22  ;;  %v683_v22 = vpop.f32.mrf.mxu0 }
 0x198   : > { %v2000_v53 = vpop.eup %1999  ;;  %2009 = vtanh.f32 %v1114_v29  ;;  %v1051_v25 = vadd.f32 %v987_v30, %v2669_v3  ;;  %v2700_v16 = vadd.f32 %v759_v47, %v2210_v5  ;;  %v1334_v23 = vmul.f32 %v1270_v27, %v822_v55 }
 0x199   : > { %v1303_v31 = vmul.f32 %v1239_v32, %v791_v51  ;;  %v1271_v43 = vadd.f32 1.0, %v2000_v53  ;;  %v1146_v63 = vmul.f32 0.7978846, %v1082_v24  ;;  %v1019_v54 = vmul.f32 %v955_v15, %v2683_v21  ;;  %v685_v51 = vpop.f32.mrf.mxu0 }
 0x19a   : > { %v2002_v14 = vpop.eup %2001  ;;  %v1115_v46 = vmul.f32 0.7978846, %v1051_v25  ;;  %v924_v28 = vmul.f32 %v860_v34, %v2686_v41  ;;  %v2705_v48 = vadd.f32 %v681_v9, %v2212_v8  ;;  %v792_v50 = vmul.f32 0.5, %v2622_v60 }
 0x19b   : > { %v1748_v39 = vpack.c.bf16 %v1303_v31, %v1302_v44  ;;  %v1335_v49 = vmul.f32 %v1271_v43, %v823_v19  ;;  %2011 = vtanh.f32 %v1146_v63  ;;  %v1083_v33 = vadd.f32 %v1019_v54, %v2683_v21 }
 0x19c   : > { %v824_v62 = vmul.f32 0.5, %v2625_v38  ;;  %2013 = vtanh.f32 %v1115_v46  ;;  %v988_v10 = vmul.f32 %v924_v28, %v2686_v41  ;;  %v1240_v4 = vadd.f32 1.0, %v2002_v14 }
 0x19d   : > { %1547 = vst [vmem:[%s2334_s13 + $0x58] sm:$0xff] %v1748_v39  ;;  %v1764_v57 = vpack.c.bf16 %v1335_v49, %v1334_v23  ;;  %v1147_v58 = vmul.f32 0.7978846, %v1083_v33  ;;  %v892_v42 = vmul.f32 0.044715, %v2700_v16  ;;  %v793_v59 = vmul.f32 0.5, %v2636_v12  ;;  %v765_v23 = vpop.f32.mrf.mxu1 }
 0x19e   : > { %v1052_v55 = vadd.f32 %v988_v10, %v2686_v41  ;;  %v861_v60 = vmul.f32 0.044715, %v2705_v48  ;;  %v2717_v56 = vadd.f32 %v761_v40, %v2212_v8  ;;  %v2004_v38 = vpop.eup %2003  ;;  %v2722_v0 = vadd.f32 %v683_v22, %v2210_v5 }
 0x19f   : > { %1563 = vst [vmem:[%s2334_s13 + $0xd8] sm:$0xff] %v1764_v57  ;;  %2015 = vtanh.f32 %v1147_v58  ;;  %v956_v61 = vmul.f32 %v892_v42, %v2700_v16  ;;  %v2725_v45 = vadd.f32 %v763_v52, %v2210_v5  ;;  %v825_v12 = vmul.f32 0.5, %v2652_v35 }
 0x1a0   : > { %v2006_v1 = vpop.eup %2005  ;;  %v1116_v6 = vmul.f32 0.7978846, %v1052_v55  ;;  %v925_v26 = vmul.f32 %v861_v60, %v2705_v48  ;;  %v893_v11 = vmul.f32 0.044715, %v2717_v56  ;;  %v1304_v17 = vmul.f32 %v1240_v4, %v792_v50 }
 0x1a1   : > { %v1241_v7 = vadd.f32 1.0, %v2006_v1  ;;  %v1020_v13 = vmul.f32 %v956_v61, %v2700_v16  ;;  %v862_v47 = vmul.f32 0.044715, %v2722_v0  ;;  %v1272_v19 = vadd.f32 1.0, %v2004_v38 }
 0x1a2   : > { %2017 = vtanh.f32 %v1116_v6  ;;  %v989_v5 = vmul.f32 %v925_v26, %v2705_v48  ;;  %v957_v2 = vmul.f32 %v893_v11, %v2717_v56  ;;  %v894_v29 = vmul.f32 0.044715, %v2725_v45 }
 0x1a3   : > { %v2008_v20 = vpop.eup %2007  ;;  %v1305_v35 = vmul.f32 %v1241_v7, %v793_v59  ;;  %v1084_v18 = vadd.f32 %v1020_v13, %v2700_v16  ;;  %v926_v27 = vmul.f32 %v862_v47, %v2722_v0  ;;  %v2740_v15 = vadd.f32 %v685_v51, %v2212_v8 }
 0x1a4   : > { %v1273_v30 = vadd.f32 1.0, %v2008_v20  ;;  %v1053_v32 = vadd.f32 %v989_v5, %v2705_v48  ;;  %v1021_v24 = vmul.f32 %v957_v2, %v2717_v56  ;;  %v958_v25 = vmul.f32 %v894_v29, %v2725_v45 }
 0x1a5   : > { %v2010_v34 = vpop.eup %2009  ;;  %v1749_v9 = vpack.c.bf16 %v1305_v35, %v1304_v17  ;;  %v1148_v53 = vmul.f32 0.7978846, %v1084_v18  ;;  %v990_v44 = vmul.f32 %v926_v27, %v2722_v0  ;;  %v1336_v40 = vmul.f32 %v1272_v19, %v824_v62 }
 0x1a6   : > { %v1337_v31 = vmul.f32 %v1273_v30, %v825_v12  ;;  %v1117_v43 = vmul.f32 0.7978846, %v1053_v32  ;;  %v1085_v63 = vadd.f32 %v1021_v24, %v2717_v56  ;;  %v1022_v14 = vmul.f32 %v958_v25, %v2725_v45 }
 0x1a7   : > { %1548 = vst [vmem:[%s2334_s13 + $0x60] sm:$0xff] %v1749_v9  ;;  %2019 = vtanh.f32 %v1148_v53  ;;  %v1054_v54 = vadd.f32 %v990_v44, %v2722_v0  ;;  %v1242_v39 = vadd.f32 1.0, %v2010_v34  ;;  %v794_v50 = vmul.f32 0.5, %v2657_v37 }
 0x1a8   : > { %v2012_v46 = vpop.eup %2011  ;;  %v1765_v28 = vpack.c.bf16 %v1337_v31, %v1336_v40  ;;  %2021 = vtanh.f32 %v1117_v43  ;;  %v1149_v49 = vmul.f32 0.7978846, %v1085_v63  ;;  %v795_v62 = vmul.f32 0.5, %v2669_v3 }
 0x1a9   : > { %v2014_v33 = vpop.eup %2013  ;;  %v863_v10 = vmul.f32 0.044715, %v2740_v15  ;;  %v1086_v52 = vadd.f32 %v1022_v14, %v2725_v45  ;;  %v766_v57 = vadd.f32 %v765_v23, %v2212_v8  ;;  %v1274_v4 = vadd.f32 1.0, %v2012_v46 }
 0x1aa   : > { %1564 = vst [vmem:[%s2334_s13 + $0xe0] sm:$0xff] %v1765_v28  ;;  %v1243_v22 = vadd.f32 1.0, %v2014_v33  ;;  %2023 = vtanh.f32 %v1149_v49  ;;  %v1118_v58 = vmul.f32 0.7978846, %v1054_v54  ;;  %v1306_v55 = vmul.f32 %v1242_v39, %v794_v50 }
 0x1ab   : > { %v927_v42 = vmul.f32 %v863_v10, %v2740_v15  ;;  %v895_v37 = vmul.f32 0.044715, %v766_v57  ;;  %v826_v3 = vmul.f32 0.5, %v2665_v36  ;;  %v827_v38 = vmul.f32 0.5, %v2683_v21 }
 0x1ac   : > { %v2016_v59 = vpop.eup %2015  ;;  %v1307_v60 = vmul.f32 %v1243_v22, %v795_v62  ;;  %v1150_v6 = vmul.f32 0.7978846, %v1086_v52  ;;  %2025 = vtanh.f32 %v1118_v58  ;;  %v796_v20 = vmul.f32 0.5, %v2686_v41 }
 0x1ad   : > { %v1275_v61 = vadd.f32 1.0, %v2016_v59  ;;  %v991_v1 = vmul.f32 %v927_v42, %v2740_v15  ;;  %v959_v8 = vmul.f32 %v895_v37, %v766_v57  ;;  %v1338_v11 = vmul.f32 %v1274_v4, %v826_v3 }
 0x1ae   : > { %v1750_v12 = vpack.c.bf16 %v1307_v60, %v1306_v55  ;;  %2027 = vtanh.f32 %v1150_v6  ;;  %v797_v18 = vmul.f32 0.5, %v2705_v48  ;;  %v828_v30 = vmul.f32 0.5, %v2700_v16 }
 0x1af   : > { %v2018_v26 = vpop.eup %2017  ;;  %v1339_v17 = vmul.f32 %v1275_v61, %v827_v38  ;;  %v1055_v7 = vadd.f32 %v991_v1, %v2740_v15  ;;  %v1023_v13 = vmul.f32 %v959_v8, %v766_v57  ;;  %v829_v34 = vmul.f32 0.5, %v2717_v56 }
 0x1b0   : > { %1549 = vst [vmem:[%s2334_s13 + $0x68] sm:$0xff] %v1750_v12  ;;  %v1244_v19 = vadd.f32 1.0, %v2018_v26  ;;  %v798_v63 = vmul.f32 0.5, %v2722_v0  ;;  %v799_v16 = vmul.f32 0.5, %v2740_v15  ;;  %v830_v28 = vmul.f32 0.5, %v2725_v45 }
 0x1b1   : > { %v1766_v47 = vpack.c.bf16 %v1339_v17, %v1338_v11  ;;  %v1119_v51 = vmul.f32 0.7978846, %v1055_v7  ;;  %v1087_v36 = vadd.f32 %v1023_v13, %v766_v57  ;;  %v831_v39 = vmul.f32 0.5, %v766_v57 }
 0x1b2   : > { %v1308_v32 = vmul.f32 %v1244_v19, %v796_v20 }
 0x1b3   : > { %1565 = vst [vmem:[%s2334_s13 + $0xe8] sm:$0xff] %v1766_v47  ;;  %2029 = vtanh.f32 %v1119_v51  ;;  %v1151_v5 = vmul.f32 0.7978846, %v1087_v36 }
 0x1b4   : > { %v2020_v21 = vpop.eup %2019 }
 0x1b5   : > { %v2022_v2 = vpop.eup %2021  ;;  %v1276_v35 = vadd.f32 1.0, %v2020_v21  ;;  %2031 = vtanh.f32 %v1151_v5 }
 0x1b6   : > { %v1245_v27 = vadd.f32 1.0, %v2022_v2 }
 0x1b7   : > { %v2024_v29 = vpop.eup %2023  ;;  %v1340_v53 = vmul.f32 %v1276_v35, %v828_v30 }
 0x1b8   : > { %v1309_v24 = vmul.f32 %v1245_v27, %v797_v18  ;;  %v1277_v9 = vadd.f32 1.0, %v2024_v29 }
 0x1b9   : > { %v2026_v40 = vpop.eup %2025 }
 0x1ba   : > { %v1751_v44 = vpack.c.bf16 %v1309_v24, %v1308_v32  ;;  %v1341_v25 = vmul.f32 %v1277_v9, %v829_v34  ;;  %v1246_v48 = vadd.f32 1.0, %v2026_v40 }
 0x1bb   : > { %v2028_v31 = vpop.eup %2027 }
 0x1bc   : > { %1550 = vst [vmem:[%s2334_s13 + $0x70] sm:$0xff] %v1751_v44  ;;  %v1767_v41 = vpack.c.bf16 %v1341_v25, %v1340_v53  ;;  %v1278_v14 = vadd.f32 1.0, %v2028_v31  ;;  %v1310_v23 = vmul.f32 %v1246_v48, %v798_v63 }
 0x1be   : > { %1566 = vst [vmem:[%s2334_s13 + $0xf0] sm:$0xff] %v1767_v41  ;;  %v1342_v50 = vmul.f32 %v1278_v14, %v830_v28 }
 0x1c0   : > { %v2030_v43 = vpop.eup %2029 }
 0x1c1   : > { %v1247_v54 = vadd.f32 1.0, %v2030_v43 }
 0x1c2   : > { %v2032_v56 = vpop.eup %2031 }
 0x1c3   : > { %v1311_v46 = vmul.f32 %v1247_v54, %v799_v16  ;;  %v1279_v49 = vadd.f32 1.0, %v2032_v56 }
 0x1c5   : > { %v1752_v33 = vpack.c.bf16 %v1311_v46, %v1310_v23  ;;  %v1343_v62 = vmul.f32 %v1279_v49, %v831_v39 }
 0x1c7   : > { %1551 = vst [vmem:[%s2334_s13 + $0x78] sm:$0xff] %v1752_v33  ;;  %v1768_v10 = vpack.c.bf16 %v1343_v62, %v1342_v50 }
 0x1c9   : > { %1567 = vst [vmem:[%s2334_s13 + $0xf8] sm:$0xff] %v1768_v10 }
 0x1ca PF: > { %s13_s12 = sadd.s32 1, %s2039_s12  }
 0x1cb   : > { %p10_p4 = scmp.ge.s32.totalorder %s13_s12, 4  }
 0x1cd   :  { %12 = sbr.rel (!%p10_p4) target bundleno = 1 (0x1), region = 62 }

// kernel: dinov2_baseline_forward.21
= control target key start
LH: loop header
LB: loop body
LE: loop exit
PB: predicated region body
PF: predicated region fallthrough
CT: control target
= control target key end

     0   :  { %s1044_s12 = smov 0   ;;  %s1221_s0 = inlined_call_operand.vmem [shape: bf16[512,256], index: 0, kind: input, shape index: {}]   ;;  %s1222_s1 = inlined_call_operand.vmem [shape: bf16[256,128], index: 1, kind: input, shape index: {}]   ;;  %s1223_s2 = inlined_call_operand.vmem [shape: f32[1,128], index: 2, kind: input, shape index: {}]   ;;  %s1224_s3 = inlined_call_operand.vmem [shape: f32[512,128], index: 3, kind: output, shape index: {}]  }
   0x1 LB: > { %s754_s13 = sadd.s32 4294967295, %s1022_s12   ;;  %p758_p0 = scmp.ge.s32.totalorder %s1022_s12, 1  ;;  %s1022_s12 = sphi %s1044_s12, %s13_s12  }
   0x2   : > { %p139_p1 = scmp.lt.s32.totalorder %s1022_s12, 3 }
   0x4   : > { %p140_p2 = pnand %p758_p0, %p139_p1 }
   0x5   : > { %s759_s16 = sshll.u32 (!%p140_p2), %s754_s13, 5 }
   0x6   : > { %143 = sbr.rel (%p140_p2) target bundleno = 304 (0x130), region = 32  ;;  %p165_p3 = scmp.lt.s32.totalorder (!%p140_p2), %s759_s16, 63 }
   0xb   : > { %v952_v0 = vld [vmem:[%s1222_s1 + $0x78] sm:$0xff]   ;;  %v954_v2 = vld [vmem:[%s1222_s1 + $0x70] sm:$0xff]   ;;  %v956_v4 = vld [vmem:[%s1222_s1 + $0x68] sm:$0xff]   ;;  %s1226_s16 = smov (!%p165_p3, %s759_s16), 63 }
   0xc   : > { %v953_v1 = vld [vmem:[%s1222_s1 + $0x38] sm:$0xff]   ;;  %816 = vmatprep.subr.bf16.mxu0 %v952_v0  ;;  %928 = vmatprep.subr.bf16.mxu1 %v952_v0  ;;  %v955_v3 = vld [vmem:[%s1222_s1 + $0x30] sm:$0xff]   ;;  %v957_v5 = vld [vmem:[%s1222_s1 + $0x28] sm:$0xff]   ;;  %s815_s4 = sshll.u32 %s1226_s16, 3 }
   0xd   : > { %817 = vmatpush3.bf16.msra.mxu0 %v953_v1  ;;  %936 = vmatpush3.bf16.msra.mxu1 %v953_v1  ;;  %v958_v6 = vld [vmem:[%s1222_s1 + $0x60] sm:$0xff]   ;;  %v960_v8 = vld [vmem:[%s1222_s1 + $0x58] sm:$0xff]   ;;  %s1087_s9 = scalar_lea.vmem %s1221_s0, %s815_s4  ;;  %v962_v10 = vld [vmem:[%s1222_s1 + $0x50] sm:$0xff]   ;;  %s1152_s30 = scalar_lea.vmem %s1224_s3, %s815_s4 }
   0xe   : > { %818 = vmatprep.subr.bf16.mxu0 %v954_v2  ;;  %929 = vmatprep.subr.bf16.mxu1 %v954_v2  ;;  %v959_v7 = vld [vmem:[%s1222_s1 + $0x20] sm:$0xff]   ;;  %v961_v9 = vld [vmem:[%s1222_s1 + $0x18] sm:$0xff]   ;;  %v963_v13 = vld [vmem:[%s1222_s1 + $0x10] sm:$0xff]  }
   0xf   : > { %v970_v11 = vld [vmem:[%s1087_s9 + $0x4] ss:$8 sps:$4 sm:$0xff]   ;;  %v968_v18 = vld [vmem:[%s1087_s9] ss:$8 sps:$4 sm:$0xff]   ;;  %v974_v20 = vld [vmem:[%s1087_s9 + $0x14] ss:$8 sps:$4 sm:$0xff]  }
  0x10   : > { %v973_v12 = vld [vmem:[%s1087_s9 + $0x84] ss:$8 sps:$4 sm:$0xff]   ;;  %537 = vmatprep.mubr.bf16.mxu0 %v970_v11  ;;  %v971_v19 = vld [vmem:[%s1087_s9 + $0x80] ss:$8 sps:$4 sm:$0xff]   ;;  %v976_v21 = vld [vmem:[%s1087_s9 + $0x94] ss:$8 sps:$4 sm:$0xff]  }
  0x11   : > { %819 = vmatpush3.bf16.msra.mxu0 %v955_v3  ;;  %937 = vmatpush3.bf16.msra.mxu1 %v955_v3  ;;  %v964_v14 = vld [vmem:[%s1222_s1 + $0x48] sm:$0xff]   ;;  %v966_v16 = vld [vmem:[%s1222_s1 + $0x40] sm:$0xff]   ;;  %v978_v22 = vld [vmem:[%s1087_s9 + $0x10] ss:$8 sps:$4 sm:$0xff]  }
  0x12   : > { %820 = vmatprep.subr.bf16.mxu0 %v956_v4  ;;  %930 = vmatprep.subr.bf16.mxu1 %v956_v4  ;;  %v965_v15 = vld [vmem:[%s1222_s1 + $0x8] sm:$0xff]   ;;  %v967_v17 = vld [vmem:[%s1222_s1] sm:$0xff]   ;;  %v979_v23 = vld [vmem:[%s1087_s9 + $0x90] ss:$8 sps:$4 sm:$0xff]  }
  0x13   : > { %601 = vmatprep.mubr.bf16.mxu1 %v973_v12  ;;  %v980_v24 = vld [vmem:[%s1087_s9 + $0x24] ss:$8 sps:$4 sm:$0xff]   ;;  %v984_v26 = vld [vmem:[%s1087_s9 + $0x20] ss:$8 sps:$4 sm:$0xff]   ;;  %v986_v28 = vld [vmem:[%s1087_s9 + $0x34] ss:$8 sps:$4 sm:$0xff]  }
  0x14   : > { %v982_v25 = vld [vmem:[%s1087_s9 + $0xa4] ss:$8 sps:$4 sm:$0xff]   ;;  %v985_v27 = vld [vmem:[%s1087_s9 + $0xa0] ss:$8 sps:$4 sm:$0xff]   ;;  %v988_v29 = vld [vmem:[%s1087_s9 + $0xb4] ss:$8 sps:$4 sm:$0xff]  }
  0x15   : > { %821 = vmatpush3.bf16.msra.mxu0 %v957_v5  ;;  %938 = vmatpush3.bf16.msra.mxu1 %v957_v5  ;;  %v990_v30 = vld [vmem:[%s1087_s9 + $0x30] ss:$8 sps:$4 sm:$0xff]   ;;  %v992_v32 = vld [vmem:[%s1087_s9 + $0x44] ss:$8 sps:$4 sm:$0xff]   ;;  %v996_v34 = vld [vmem:[%s1087_s9 + $0x40] ss:$8 sps:$4 sm:$0xff]  }
  0x16   : > { %822 = vmatprep.subr.bf16.mxu0 %v958_v6  ;;  %931 = vmatprep.subr.bf16.mxu1 %v958_v6  ;;  %v991_v31 = vld [vmem:[%s1087_s9 + $0xb0] ss:$8 sps:$4 sm:$0xff]   ;;  %v994_v33 = vld [vmem:[%s1087_s9 + $0xc4] ss:$8 sps:$4 sm:$0xff]   ;;  %v997_v35 = vld [vmem:[%s1087_s9 + $0xc0] ss:$8 sps:$4 sm:$0xff]  }
  0x17   : > { %v998_v36 = vld [vmem:[%s1087_s9 + $0x54] ss:$8 sps:$4 sm:$0xff]   ;;  %v1002_v38 = vld [vmem:[%s1087_s9 + $0x50] ss:$8 sps:$4 sm:$0xff]   ;;  %v1004_v40 = vld [vmem:[%s1087_s9 + $0x64] ss:$8 sps:$4 sm:$0xff]  }
  0x18   : > { %v1000_v37 = vld [vmem:[%s1087_s9 + $0xd4] ss:$8 sps:$4 sm:$0xff]   ;;  %v1003_v39 = vld [vmem:[%s1087_s9 + $0xd0] ss:$8 sps:$4 sm:$0xff]   ;;  %v1006_v41 = vld [vmem:[%s1087_s9 + $0xe4] ss:$8 sps:$4 sm:$0xff]  }
  0x19   : > { %823 = vmatpush3.bf16.msra.mxu0 %v959_v7  ;;  %939 = vmatpush3.bf16.msra.mxu1 %v959_v7  ;;  %v1008_v42 = vld [vmem:[%s1087_s9 + $0x60] ss:$8 sps:$4 sm:$0xff]   ;;  %v1010_v44 = vld [vmem:[%s1087_s9 + $0x74] ss:$8 sps:$4 sm:$0xff]   ;;  %v1014_v46 = vld [vmem:[%s1087_s9 + $0x70] ss:$8 sps:$4 sm:$0xff]  }
  0x1a   : > { %824 = vmatprep.subr.bf16.mxu0 %v960_v8  ;;  %932 = vmatprep.subr.bf16.mxu1 %v960_v8  ;;  %v1009_v43 = vld [vmem:[%s1087_s9 + $0xe0] ss:$8 sps:$4 sm:$0xff]   ;;  %v1012_v45 = vld [vmem:[%s1087_s9 + $0xf4] ss:$8 sps:$4 sm:$0xff]   ;;  %v1015_v47 = vld [vmem:[%s1087_s9 + $0xf0] ss:$8 sps:$4 sm:$0xff]  }
  0x1b   : > { %v1145_v50 = vld [vmem:[%s1223_s2] ss:$0 sm:$0xff] }
  0x1d   : > { %825 = vmatpush3.bf16.msra.mxu0 %v961_v9  ;;  %940 = vmatpush3.bf16.msra.mxu1 %v961_v9 }
  0x1e   : > { %826 = vmatprep.subr.bf16.mxu0 %v962_v10  ;;  %933 = vmatprep.subr.bf16.mxu1 %v962_v10 }
  0x21   : > { %827 = vmatpush3.bf16.msra.mxu0 %v963_v13  ;;  %941 = vmatpush3.bf16.msra.mxu1 %v963_v13 }
  0x22   : > { %828 = vmatprep.subr.bf16.mxu0 %v964_v14  ;;  %934 = vmatprep.subr.bf16.mxu1 %v964_v14 }
  0x25   : > { %829 = vmatpush3.bf16.msra.mxu0 %v965_v15  ;;  %942 = vmatpush3.bf16.msra.mxu1 %v965_v15 }
  0x26   : > { %830 = vmatprep.subr.bf16.mxu0 %v966_v16  ;;  %935 = vmatprep.subr.bf16.mxu1 %v966_v16 }
  0x29   : > { %831 = vmatpush3.bf16.msra.mxu0 %v967_v17  ;;  %943 = vmatpush3.bf16.msra.mxu1 %v967_v17 }
  0x2c   : > { %538 = vmatmul.mubr.bf16.vlgmr.msra.gmra.mxu0 %v968_v18  ;;  %602 = vmatmul.mubr.bf16.vlgmr.msra.gmra.mxu1 %v971_v19 }
  0x2d   : > { %545 = vmatprep.mubr.bf16.mxu0 %v974_v20  ;;  %609 = vmatprep.mubr.bf16.mxu1 %v976_v21 }
  0x34   : > { %546 = vmatmul.mubr.bf16.gmra.mxu0 %v978_v22  ;;  %610 = vmatmul.mubr.bf16.gmra.mxu1 %v979_v23 }
  0x35   : > { %553 = vmatprep.mubr.bf16.mxu0 %v980_v24  ;;  %617 = vmatprep.mubr.bf16.mxu1 %v982_v25 }
  0x3c   : > { %554 = vmatmul.mubr.bf16.gmra.mxu0 %v984_v26  ;;  %618 = vmatmul.mubr.bf16.gmra.mxu1 %v985_v27 }
  0x3d   : > { %561 = vmatprep.mubr.bf16.mxu0 %v986_v28  ;;  %625 = vmatprep.mubr.bf16.mxu1 %v988_v29 }
  0x44   : > { %562 = vmatmul.mubr.bf16.gmra.mxu0 %v990_v30  ;;  %626 = vmatmul.mubr.bf16.gmra.mxu1 %v991_v31 }
  0x45   : > { %569 = vmatprep.mubr.bf16.mxu0 %v992_v32  ;;  %633 = vmatprep.mubr.bf16.mxu1 %v994_v33 }
  0x4c   : > { %570 = vmatmul.mubr.bf16.gmra.mxu0 %v996_v34  ;;  %634 = vmatmul.mubr.bf16.gmra.mxu1 %v997_v35 }
  0x4d   : > { %577 = vmatprep.mubr.bf16.mxu0 %v998_v36  ;;  %641 = vmatprep.mubr.bf16.mxu1 %v1000_v37 }
  0x54   : > { %578 = vmatmul.mubr.bf16.gmra.mxu0 %v1002_v38  ;;  %642 = vmatmul.mubr.bf16.gmra.mxu1 %v1003_v39 }
  0x55   : > { %585 = vmatprep.mubr.bf16.mxu0 %v1004_v40  ;;  %649 = vmatprep.mubr.bf16.mxu1 %v1006_v41 }
  0x5c   : > { %586 = vmatmul.mubr.bf16.gmra.mxu0 %v1008_v42  ;;  %650 = vmatmul.mubr.bf16.gmra.mxu1 %v1009_v43 }
  0x5d   : > { %593 = vmatprep.mubr.bf16.mxu0 %v1010_v44  ;;  %657 = vmatprep.mubr.bf16.mxu1 %v1012_v45 }
  0x64   : > { %594 = vmatmul.mubr.bf16.gmra.mxu0 %v1014_v46  ;;  %658 = vmatmul.mubr.bf16.gmra.mxu1 %v1015_v47 }
  0xec   : > { %v832_v48 = vpop.f32.mrf.mxu0  ;;  %v880_v49 = vpop.f32.mrf.mxu1 }
  0xee   : > { %v833_v51 = vpop.f32.mrf.mxu0  ;;  %v881_v52 = vpop.f32.mrf.mxu1 }
  0xef   : > { %v834_v53 = vadd.f32 %v833_v51, %v832_v48  ;;  %v882_v54 = vadd.f32 %v881_v52, %v880_v49 }
  0xf0   : > { %v835_v55 = vpop.f32.mrf.mxu0  ;;  %v883_v56 = vpop.f32.mrf.mxu1 }
  0xf1   : > { %v540_v57 = vadd.f32 %v834_v53, %v1145_v50  ;;  %v604_v58 = vadd.f32 %v882_v54, %v1145_v50 }
  0xf2   : > { %v836_v59 = vpop.f32.mrf.mxu0  ;;  %v884_v60 = vpop.f32.mrf.mxu1 }
  0xf3   : > { %666 = vst [vmem:[%s1152_s30] sm:$0xff] %v540_v57  ;;  %682 = vst [vmem:[%s1152_s30 + $0x80] sm:$0xff] %v604_v58  ;;  %v837_v61 = vadd.f32 %v836_v59, %v835_v55  ;;  %v885_v62 = vadd.f32 %v884_v60, %v883_v56 }
  0xf4   : > { %v838_v63 = vpop.f32.mrf.mxu0  ;;  %v886_v0 = vpop.f32.mrf.mxu1 }
  0xf5   : > { %v543_v1 = vadd.f32 %v837_v61, %v1145_v50  ;;  %v607_v2 = vadd.f32 %v885_v62, %v1145_v50 }
  0xf6   : > { %v839_v3 = vpop.f32.mrf.mxu0  ;;  %v887_v4 = vpop.f32.mrf.mxu1 }
  0xf7   : > { %667 = vst [vmem:[%s1152_s30 + $0x8] sm:$0xff] %v543_v1  ;;  %683 = vst [vmem:[%s1152_s30 + $0x88] sm:$0xff] %v607_v2  ;;  %v840_v5 = vadd.f32 %v839_v3, %v838_v63  ;;  %v888_v6 = vadd.f32 %v887_v4, %v886_v0 }
  0xf8   : > { %v841_v7 = vpop.f32.mrf.mxu0  ;;  %v889_v8 = vpop.f32.mrf.mxu1 }
  0xf9   : > { %v548_v9 = vadd.f32 %v840_v5, %v1145_v50  ;;  %v612_v10 = vadd.f32 %v888_v6, %v1145_v50 }
  0xfa   : > { %v842_v11 = vpop.f32.mrf.mxu0  ;;  %v890_v12 = vpop.f32.mrf.mxu1 }
  0xfb   : > { %668 = vst [vmem:[%s1152_s30 + $0x10] sm:$0xff] %v548_v9  ;;  %684 = vst [vmem:[%s1152_s30 + $0x90] sm:$0xff] %v612_v10  ;;  %v843_v13 = vadd.f32 %v842_v11, %v841_v7  ;;  %v891_v14 = vadd.f32 %v890_v12, %v889_v8 }
  0xfc   : > { %v844_v15 = vpop.f32.mrf.mxu0  ;;  %v892_v16 = vpop.f32.mrf.mxu1 }
  0xfd   : > { %v551_v17 = vadd.f32 %v843_v13, %v1145_v50  ;;  %v615_v18 = vadd.f32 %v891_v14, %v1145_v50 }
  0xfe   : > { %v845_v19 = vpop.f32.mrf.mxu0  ;;  %v893_v20 = vpop.f32.mrf.mxu1 }
  0xff   : > { %669 = vst [vmem:[%s1152_s30 + $0x18] sm:$0xff] %v551_v17  ;;  %685 = vst [vmem:[%s1152_s30 + $0x98] sm:$0xff] %v615_v18  ;;  %v846_v21 = vadd.f32 %v845_v19, %v844_v15  ;;  %v894_v22 = vadd.f32 %v893_v20, %v892_v16 }
 0x100   : > { %v847_v23 = vpop.f32.mrf.mxu0  ;;  %v895_v24 = vpop.f32.mrf.mxu1 }
 0x101   : > { %v556_v25 = vadd.f32 %v846_v21, %v1145_v50  ;;  %v620_v26 = vadd.f32 %v894_v22, %v1145_v50 }
 0x102   : > { %v848_v27 = vpop.f32.mrf.mxu0  ;;  %v896_v28 = vpop.f32.mrf.mxu1 }
 0x103   : > { %670 = vst [vmem:[%s1152_s30 + $0x20] sm:$0xff] %v556_v25  ;;  %686 = vst [vmem:[%s1152_s30 + $0xa0] sm:$0xff] %v620_v26  ;;  %v849_v29 = vadd.f32 %v848_v27, %v847_v23  ;;  %v897_v30 = vadd.f32 %v896_v28, %v895_v24 }
 0x104   : > { %v850_v31 = vpop.f32.mrf.mxu0  ;;  %v898_v32 = vpop.f32.mrf.mxu1 }
 0x105   : > { %v559_v33 = vadd.f32 %v849_v29, %v1145_v50  ;;  %v623_v34 = vadd.f32 %v897_v30, %v1145_v50 }
 0x106   : > { %v851_v35 = vpop.f32.mrf.mxu0  ;;  %v899_v36 = vpop.f32.mrf.mxu1 }
 0x107   : > { %671 = vst [vmem:[%s1152_s30 + $0x28] sm:$0xff] %v559_v33  ;;  %687 = vst [vmem:[%s1152_s30 + $0xa8] sm:$0xff] %v623_v34  ;;  %v852_v37 = vadd.f32 %v851_v35, %v850_v31  ;;  %v900_v38 = vadd.f32 %v899_v36, %v898_v32 }
 0x108   : > { %v853_v39 = vpop.f32.mrf.mxu0  ;;  %v901_v40 = vpop.f32.mrf.mxu1 }
 0x109   : > { %v564_v41 = vadd.f32 %v852_v37, %v1145_v50  ;;  %v628_v42 = vadd.f32 %v900_v38, %v1145_v50 }
 0x10a   : > { %v854_v43 = vpop.f32.mrf.mxu0  ;;  %v902_v44 = vpop.f32.mrf.mxu1 }
 0x10b   : > { %672 = vst [vmem:[%s1152_s30 + $0x30] sm:$0xff] %v564_v41  ;;  %688 = vst [vmem:[%s1152_s30 + $0xb0] sm:$0xff] %v628_v42  ;;  %v855_v45 = vadd.f32 %v854_v43, %v853_v39  ;;  %v903_v46 = vadd.f32 %v902_v44, %v901_v40 }
 0x10c   : > { %v856_v47 = vpop.f32.mrf.mxu0  ;;  %v904_v48 = vpop.f32.mrf.mxu1 }
 0x10d   : > { %v567_v49 = vadd.f32 %v855_v45, %v1145_v50  ;;  %v631_v51 = vadd.f32 %v903_v46, %v1145_v50 }
 0x10e   : > { %v857_v52 = vpop.f32.mrf.mxu0  ;;  %v905_v53 = vpop.f32.mrf.mxu1 }
 0x10f   : > { %673 = vst [vmem:[%s1152_s30 + $0x38] sm:$0xff] %v567_v49  ;;  %689 = vst [vmem:[%s1152_s30 + $0xb8] sm:$0xff] %v631_v51  ;;  %v858_v54 = vadd.f32 %v857_v52, %v856_v47  ;;  %v906_v55 = vadd.f32 %v905_v53, %v904_v48 }
 0x110   : > { %v859_v56 = vpop.f32.mrf.mxu0  ;;  %v907_v57 = vpop.f32.mrf.mxu1 }
 0x111   : > { %v572_v58 = vadd.f32 %v858_v54, %v1145_v50  ;;  %v636_v59 = vadd.f32 %v906_v55, %v1145_v50 }
 0x112   : > { %v860_v60 = vpop.f32.mrf.mxu0  ;;  %v908_v61 = vpop.f32.mrf.mxu1 }
 0x113   : > { %674 = vst [vmem:[%s1152_s30 + $0x40] sm:$0xff] %v572_v58  ;;  %690 = vst [vmem:[%s1152_s30 + $0xc0] sm:$0xff] %v636_v59  ;;  %v861_v62 = vadd.f32 %v860_v60, %v859_v56  ;;  %v909_v63 = vadd.f32 %v908_v61, %v907_v57 }
 0x114   : > { %v862_v0 = vpop.f32.mrf.mxu0  ;;  %v910_v1 = vpop.f32.mrf.mxu1 }
 0x115   : > { %v575_v2 = vadd.f32 %v861_v62, %v1145_v50  ;;  %v639_v3 = vadd.f32 %v909_v63, %v1145_v50 }
 0x116   : > { %v863_v4 = vpop.f32.mrf.mxu0  ;;  %v911_v5 = vpop.f32.mrf.mxu1 }
 0x117   : > { %675 = vst [vmem:[%s1152_s30 + $0x48] sm:$0xff] %v575_v2  ;;  %691 = vst [vmem:[%s1152_s30 + $0xc8] sm:$0xff] %v639_v3  ;;  %v864_v6 = vadd.f32 %v863_v4, %v862_v0  ;;  %v912_v7 = vadd.f32 %v911_v5, %v910_v1 }
 0x118   : > { %v865_v8 = vpop.f32.mrf.mxu0  ;;  %v913_v9 = vpop.f32.mrf.mxu1 }
 0x119   : > { %v580_v10 = vadd.f32 %v864_v6, %v1145_v50  ;;  %v644_v11 = vadd.f32 %v912_v7, %v1145_v50 }
 0x11a   : > { %v866_v12 = vpop.f32.mrf.mxu0  ;;  %v914_v13 = vpop.f32.mrf.mxu1 }
 0x11b   : > { %676 = vst [vmem:[%s1152_s30 + $0x50] sm:$0xff] %v580_v10  ;;  %692 = vst [vmem:[%s1152_s30 + $0xd0] sm:$0xff] %v644_v11  ;;  %v867_v14 = vadd.f32 %v866_v12, %v865_v8  ;;  %v915_v15 = vadd.f32 %v914_v13, %v913_v9 }
 0x11c   : > { %v868_v16 = vpop.f32.mrf.mxu0  ;;  %v916_v17 = vpop.f32.mrf.mxu1 }
 0x11d   : > { %v583_v18 = vadd.f32 %v867_v14, %v1145_v50  ;;  %v647_v19 = vadd.f32 %v915_v15, %v1145_v50 }
 0x11e   : > { %v869_v20 = vpop.f32.mrf.mxu0  ;;  %v917_v21 = vpop.f32.mrf.mxu1 }
 0x11f   : > { %677 = vst [vmem:[%s1152_s30 + $0x58] sm:$0xff] %v583_v18  ;;  %693 = vst [vmem:[%s1152_s30 + $0xd8] sm:$0xff] %v647_v19  ;;  %v870_v22 = vadd.f32 %v869_v20, %v868_v16  ;;  %v918_v23 = vadd.f32 %v917_v21, %v916_v17 }
 0x120   : > { %v871_v24 = vpop.f32.mrf.mxu0  ;;  %v919_v25 = vpop.f32.mrf.mxu1 }
 0x121   : > { %v588_v26 = vadd.f32 %v870_v22, %v1145_v50  ;;  %v652_v27 = vadd.f32 %v918_v23, %v1145_v50 }
 0x122   : > { %v872_v28 = vpop.f32.mrf.mxu0  ;;  %v920_v29 = vpop.f32.mrf.mxu1 }
 0x123   : > { %678 = vst [vmem:[%s1152_s30 + $0x60] sm:$0xff] %v588_v26  ;;  %694 = vst [vmem:[%s1152_s30 + $0xe0] sm:$0xff] %v652_v27  ;;  %v873_v30 = vadd.f32 %v872_v28, %v871_v24  ;;  %v921_v31 = vadd.f32 %v920_v29, %v919_v25 }
 0x124   : > { %v874_v32 = vpop.f32.mrf.mxu0  ;;  %v922_v33 = vpop.f32.mrf.mxu1 }
 0x125   : > { %v591_v34 = vadd.f32 %v873_v30, %v1145_v50  ;;  %v655_v35 = vadd.f32 %v921_v31, %v1145_v50 }
 0x126   : > { %v875_v36 = vpop.f32.mrf.mxu0  ;;  %v923_v37 = vpop.f32.mrf.mxu1 }
 0x127   : > { %679 = vst [vmem:[%s1152_s30 + $0x68] sm:$0xff] %v591_v34  ;;  %695 = vst [vmem:[%s1152_s30 + $0xe8] sm:$0xff] %v655_v35  ;;  %v876_v38 = vadd.f32 %v875_v36, %v874_v32  ;;  %v924_v39 = vadd.f32 %v923_v37, %v922_v33 }
 0x128   : > { %v877_v40 = vpop.f32.mrf.mxu0  ;;  %v925_v41 = vpop.f32.mrf.mxu1 }
 0x129   : > { %v596_v42 = vadd.f32 %v876_v38, %v1145_v50  ;;  %v660_v43 = vadd.f32 %v924_v39, %v1145_v50 }
 0x12a   : > { %v878_v44 = vpop.f32.mrf.mxu0  ;;  %v926_v45 = vpop.f32.mrf.mxu1 }
 0x12b   : > { %680 = vst [vmem:[%s1152_s30 + $0x70] sm:$0xff] %v596_v42  ;;  %696 = vst [vmem:[%s1152_s30 + $0xf0] sm:$0xff] %v660_v43  ;;  %v879_v46 = vadd.f32 %v878_v44, %v877_v40  ;;  %v927_v47 = vadd.f32 %v926_v45, %v925_v41 }
 0x12d   : > { %v599_v48 = vadd.f32 %v879_v46, %v1145_v50  ;;  %v663_v49 = vadd.f32 %v927_v47, %v1145_v50 }
 0x12f   : > { %681 = vst [vmem:[%s1152_s30 + $0x78] sm:$0xff] %v599_v48  ;;  %697 = vst [vmem:[%s1152_s30 + $0xf8] sm:$0xff] %v663_v49 }
 0x130 PF: > { %s13_s12 = sadd.s32 1, %s1022_s12  }
 0x131   : > { %p10_p4 = scmp.ge.s32.totalorder %s13_s12, 4  }
 0x133   :  { %12 = sbr.rel (!%p10_p4) target bundleno = 1 (0x1), region = 62 }

</bundles_post_ra>
